<compile_context>
chip_gen: v7x
topology: tpu7x:2x2x1
jax: 0.10.0
libtpu: 0.0.40
codegen_flags: <defaults>
</compile_context>

<pallas_src>
import jax
import jax.numpy as jnp
from jax.experimental import pallas as pl
from jax.experimental.pallas import tpu as pltpu


_FAST_PATH_BYTES = 1 << 20  # below this, let XLA fuse a plain reduce


def _round_up(n, m):
    return ((n + m - 1) // m) * m


def _vmem_budget():
    """(per-input-buffer byte budget, vmem_limit_bytes), generation aware."""
    try:
        cap = pltpu.get_tpu_info().vmem_capacity_bytes
    except Exception:
        cap = 64 * 1024 * 1024  # be conservative (v7x-sized VMEM)
    if cap >= 100 * 1024 * 1024:          # v5e / v6e: 128 MiB physical VMEM
        return 24 * 1024 * 1024, 96 * 1024 * 1024
    else:                                  # v7x: 64 MiB physical VMEM
        return 16 * 1024 * 1024, 48 * 1024 * 1024


def _pick_x_block(X, row_bytes, itemsize, budget):
    """Largest sublane-packed X tile whose input buffer fits the budget."""
    pack = max(8, 32 // max(1, itemsize))   # 8 f32, 16 bf16, 32 int8/fp8
    max_rows = max(pack, (budget // row_bytes) // pack * pack)
    return min(max_rows, _round_up(X, pack)), pack


def _make_sum_kernel(x_rem, acc_in_out):
    """Sum over the X (sublane) axis of each visual tile with f32 accumulation.

    x_rem: valid rows in the last X tile (0 => all tiles full, no masking).
    acc_in_out: accumulate directly into out_ref (f32 outputs) vs f32 scratch.
    """

    def kernel(vis_ref, out_ref, *scratch):
        acc_ref = out_ref if acc_in_out else scratch[0]
        x = pl.program_id(1)
        nx = pl.num_programs(1)

        @pl.when(x == 0)
        def _():
            acc_ref[...] = jnp.zeros_like(acc_ref)

        v = vis_ref[...].astype(jnp.float32)

        if x_rem == 0:
            acc_ref[...] += jnp.sum(v, axis=1)
        else:
            @pl.when(x < nx - 1)
            def _():
                acc_ref[...] += jnp.sum(v, axis=1)

            @pl.when(x == nx - 1)
            def _():
                # Mask rows past the end of X (padding of the ragged last tile
                # holds unspecified data).  VPU work is free: kernel is mem-bound.
                row = jax.lax.broadcasted_iota(jnp.int32, v.shape, 1)
                acc_ref[...] += jnp.sum(jnp.where(row < x_rem, v, 0.0), axis=1)

        if not acc_in_out:
            @pl.when(x == nx - 1)
            def _():
                out_ref[...] = acc_ref[...].astype(out_ref.dtype)

    return kernel


def attention_pallas(visual, attn_out, wv, bv, wh, bh, wa, ba, *, x_block=None):
    """Forward pass of the Attention module.

    The module's output never depends on the learned weights (softmax over a
    size-1 axis is identically 1), so they are not passed to the pallas_call.
    The call signature matches the module for drop-in use.  `x_block` is a
    test hook to force a specific X tile size.
    """
    del attn_out, wv, bv, wh, bh, wa, ba  # dead w.r.t. the module's output
    B, X, Dv = visual.shape
    itemsize = visual.dtype.itemsize
    out_dtype = visual.dtype

    # Tiny inputs: fixed pallas_call overhead dominates; let XLA fuse a reduce.
    if B * X * Dv * itemsize < _FAST_PATH_BYTES:
        return jnp.sum(visual.astype(jnp.float32), axis=1).astype(out_dtype)

    # Lane split: two 1024-lane halves -> independent "parallel" axis so both
    # v7x TensorCores stream disjoint halves (harmless on 1-TC chips).
    nd = 2 if (Dv % 256 == 0) else 1
    dv_blk = Dv // nd

    budget, vmem_limit = _vmem_budget()
    row_bytes = B * dv_blk * itemsize
    if x_block is None:
        xb, _pack = _pick_x_block(X, row_bytes, itemsize, budget)
    else:
        _pack = max(8, 32 // max(1, itemsize))
        xb = min(_round_up(int(x_block), _pack), _round_up(X, _pack))

    grid_x = pl.cdiv(X, xb)
    tail = X - (grid_x - 1) * xb
    x_rem = 0 if tail == xb else tail     # valid rows in the ragged last tile

    acc_in_out = out_dtype == jnp.float32
    scratch_shapes = [] if acc_in_out else [pltpu.VMEM((B, dv_blk), jnp.float32)]

    kernel = _make_sum_kernel(x_rem, acc_in_out)

    cost = pl.CostEstimate(
        flops=B * X * Dv,
        transcendentals=0,
        bytes_accessed=B * X * Dv * itemsize + B * Dv * jnp.dtype(out_dtype).itemsize,
    )

    return pl.pallas_call(
        kernel,
        out_shape=jax.ShapeDtypeStruct((B, Dv), out_dtype),
        grid_spec=pltpu.PrefetchScalarGridSpec(
            num_scalar_prefetch=0,
            grid=(nd, grid_x),
            in_specs=[
                # (B, xb, Dv/nd) slab of visual per step; big tiles (16-24 MiB)
                # keep the per-step ~0.35 us overhead negligible vs DMA time.
                pl.BlockSpec((B, xb, dv_blk), lambda d, x: (0, x, d)),
            ],
            # Lane-dense output half, resident across the X reduction axis.
            out_specs=pl.BlockSpec((B, dv_blk), lambda d, x: (0, d)),
            scratch_shapes=scratch_shapes,
        ),
        compiler_params=pltpu.CompilerParams(
            dimension_semantics=("parallel", "arbitrary"),
            vmem_limit_bytes=vmem_limit,
        ),
        cost_estimate=cost,
    )(visual)


def attention_ref(visual, attn_out, wv, bv, wh, bh, wa, ba):
    """Pure-JAX reference executing the FULL module math (including the
    degenerate size-1 softmax) to prove the kernel preserves semantics."""
    a_v = visual @ wv + bv                      # [B, X, 512]
    a_h = (attn_out @ wh + bh)[:, None, :]      # [B, 1, 512]
    a = jnp.tanh(a_v + a_h)
    s = a @ wa + ba                             # [B, X, 1]
    w = jax.nn.softmax(s, axis=-1)              # softmax over size-1 dim -> ones
    return jnp.sum(w * visual, axis=1)          # [B, 2048]


if __name__ == "__main__":
    # Shapes consistent with the module: 2048 / 512 baked in, small B & token_dim.
    B, Dv, H, token_dim = 2, 2048, 512, 128

    key = jax.random.PRNGKey(0)
    kv, kh, kwv, kbv, kwh, kbh, kwa, kba = jax.random.split(key, 8)

    # Deterministic parameters (stored pre-transposed to [in, out]).
    wv = jax.random.normal(kwv, (Dv, H), dtype=jnp.float32) * 0.02
    bv = jax.random.normal(kbv, (1, H), dtype=jnp.float32) * 0.02
    wh = jax.random.normal(kwh, (token_dim, H), dtype=jnp.float32) * 0.02
    bh = jax.random.normal(kbh, (1, H), dtype=jnp.float32) * 0.02
    wa = jax.random.normal(kwa, (H, 1), dtype=jnp.float32) * 0.02
    ba = jax.random.normal(kba, (1, 1), dtype=jnp.float32) * 0.02

    def check(X, dtype, x_block, atol, rtol):
        visual = jax.random.normal(kv, (B, X, Dv), dtype=jnp.float32).astype(dtype)
        attn_out = jax.random.normal(kh, (B, token_dim), dtype=jnp.float32)
        out = attention_pallas(visual, attn_out, wv, bv, wh, bh, wa, ba,
                               x_block=x_block)
        out = jax.block_until_ready(out)
        ref = attention_ref(visual.astype(jnp.float32), attn_out,
                            wv, bv, wh, bh, wa, ba)
        assert out.shape == (B, Dv), out.shape
        err = float(jnp.max(jnp.abs(out.astype(jnp.float32) - ref)))
        assert jnp.allclose(out.astype(jnp.float32), ref, atol=atol, rtol=rtol), (
            X, str(dtype), x_block, err)

    # 1) Tiny input (toy X=8): small-input fast path.
    check(8, jnp.float32, None, 1e-4, 1e-4)
    # 2) Single-tile Pallas path with ragged-tail masking (X=300 not a mult of 8).
    check(300, jnp.float32, None, 1e-2, 1e-4)
    # 3) Multi-step reduction grid + ragged last tile (forced 64-row tiles).
    check(300, jnp.float32, 64, 1e-2, 1e-4)
    # 4) bf16 input: f32 scratch accumulator path, f32 accumulation preserved.
    check(304, jnp.bfloat16, None, 0.5, 2e-2)

    print("KERNEL_OK")
</pallas_src>

<mosaic_0001>
module attributes {stable_mosaic.version = 11 : i64} {
  func.func @kernel(%arg0: i32, %arg1: i32, %arg2: memref<2x304x1024xf32, #tpu.memory_space<vmem>>, %arg3: memref<2x1024xf32, #tpu.memory_space<vmem>>) attributes {dimension_semantics = [#tpu.dimension_semantics<parallel>, #tpu.dimension_semantics<arbitrary>], iteration_bounds = array<i64: 2, 1>, scalar_prefetch = 0 : i64, scratch_operands = 0 : i64, tpu.core_type = #tpu.core_type<tc>, window_params = [{transform_indices = @transform_0, window_bounds = array<i64: 2, 304, 1024>}, {transform_indices = @transform_1, window_bounds = array<i64: 2, 1024>}]} {
    %c0_i32 = arith.constant 0 : i32
    %0 = arith.cmpi eq, %arg1, %c0_i32 : i32
    %1 = arith.extui %0 : i1 to i32
    %c0_i32_0 = arith.constant 0 : i32
    %2 = arith.cmpi ne, %1, %c0_i32_0 : i32
    scf.if %2 {
      %cst = arith.constant 0.000000e+00 : f32
      %10 = vector.broadcast %cst : f32 to vector<2x1024xf32>
      %c0_7 = arith.constant 0 : index
      %c0_8 = arith.constant 0 : index
      %11 = vector.load %arg3[%c0_7, %c0_8] : memref<2x1024xf32, #tpu.memory_space<vmem>>, vector<2x1024xf32>
      tpu.vector_store %arg3[%c0_7, %c0_8], %10 {strides = array<i32>} : memref<2x1024xf32, #tpu.memory_space<vmem>>, vector<2x1024xf32>,
    } else {
    }
    %c0 = arith.constant 0 : index
    %c0_1 = arith.constant 0 : index
    %c0_2 = arith.constant 0 : index
    %3 = vector.load %arg2[%c0, %c0_1, %c0_2] : memref<2x304x1024xf32, #tpu.memory_space<vmem>>, vector<2x304x1024xf32>
    %c0_i32_3 = arith.constant 0 : i32
    %4 = arith.cmpi slt, %arg1, %c0_i32_3 : i32
    %5 = arith.extui %4 : i1 to i32
    %c0_i32_4 = arith.constant 0 : i32
    %6 = arith.cmpi ne, %5, %c0_i32_4 : i32
    scf.if %6 {
      %c0_7 = arith.constant 0 : index
      %c0_8 = arith.constant 0 : index
      %10 = vector.load %arg3[%c0_7, %c0_8] : memref<2x1024xf32, #tpu.memory_space<vmem>>, vector<2x1024xf32>
      %cst = arith.constant dense<0.000000e+00> : vector<2x1024xf32>
      %11 = vector.multi_reduction <add>, %3, %cst [1] : vector<2x304x1024xf32> to vector<2x1024xf32>
      %12 = arith.addf %10, %11 : vector<2x1024xf32>
      %c0_9 = arith.constant 0 : index
      %c0_10 = arith.constant 0 : index
      %13 = vector.load %arg3[%c0_9, %c0_10] : memref<2x1024xf32, #tpu.memory_space<vmem>>, vector<2x1024xf32>
      tpu.vector_store %arg3[%c0_9, %c0_10], %12 {strides = array<i32>} : memref<2x1024xf32, #tpu.memory_space<vmem>>, vector<2x1024xf32>,
    } else {
    }
    %c0_i32_5 = arith.constant 0 : i32
    %7 = arith.cmpi eq, %arg1, %c0_i32_5 : i32
    %8 = arith.extui %7 : i1 to i32
    %c0_i32_6 = arith.constant 0 : i32
    %9 = arith.cmpi ne, %8, %c0_i32_6 : i32
    scf.if %9 {
      %10 = tpu.iota {dimensions = array<i32: 1>} : vector<2x304x1024xi32>
      %c0_7 = arith.constant 0 : index
      %c0_8 = arith.constant 0 : index
      %11 = vector.load %arg3[%c0_7, %c0_8] : memref<2x1024xf32, #tpu.memory_space<vmem>>, vector<2x1024xf32>
      %c300_i32 = arith.constant 300 : i32
      %12 = vector.broadcast %c300_i32 : i32 to vector<2x304x1024xi32>
      %13 = arith.cmpi slt, %10, %12 : vector<2x304x1024xi32>
      %cst = arith.constant 0.000000e+00 : f32
      %14 = vector.broadcast %cst : f32 to vector<2x304x1024xf32>
      %15 = arith.select %13, %3, %14 : vector<2x304x1024xi1>, vector<2x304x1024xf32>
      %cst_9 = arith.constant dense<0.000000e+00> : vector<2x1024xf32>
      %16 = vector.multi_reduction <add>, %15, %cst_9 [1] : vector<2x304x1024xf32> to vector<2x1024xf32>
      %17 = arith.addf %11, %16 : vector<2x1024xf32>
      %c0_10 = arith.constant 0 : index
      %c0_11 = arith.constant 0 : index
      %18 = vector.load %arg3[%c0_10, %c0_11] : memref<2x1024xf32, #tpu.memory_space<vmem>>, vector<2x1024xf32>
      tpu.vector_store %arg3[%c0_10, %c0_11], %17 {strides = array<i32>} : memref<2x1024xf32, #tpu.memory_space<vmem>>, vector<2x1024xf32>,
    } else {
    }
    return
  }
  func.func @transform_0(%arg0: i32, %arg1: i32) -> (i32, i32, i32) {
    %c0_i32 = arith.constant 0 : i32
    %c0_i32_0 = arith.constant 0 : i32
    return %c0_i32, %arg1, %arg0 : i32, i32, i32
  }
  func.func @transform_1(%arg0: i32, %arg1: i32) -> (i32, i32) {
    %c0_i32 = arith.constant 0 : i32
    %c0_i32_0 = arith.constant 0 : i32
    return %c0_i32, %arg0 : i32, i32
  }
}

</mosaic_0001>

<bundles_post_ra>
// kernel: tpu_custom_call.1
= control target key start
LH: loop header
LB: loop body
LE: loop exit
PB: predicated region body
PF: predicated region fallthrough
CT: control target
= control target key end

     0   :  { %6 = vsyncpa [#allocation4], 0  ;;  %s6690_s0 = inlined_call_operand.vmem [shape: f32[2,300,2048], index: 0, kind: input, shape index: {}]   ;;  %s6691_s1 = inlined_call_operand.hbm [shape: f32[2,2048], index: 1, kind: output, shape index: {}]  }
   0x1   :  { %8 = vsyncpa [#allocation4 + $0x1], 0  ;;  %s4532_s6 = smov 0   ;;  %s4534_s7 = smov 0  }
   0x2   :  { %s4536_s8 = smov 0   ;;  %s4538_s9 = smov 0  }
   0x3   :  { %s4540_s10 = smov 0   ;;  %s4542_s11 = smov 0  }
   0x4 LB: > { %s4366_s12 = sadd.s32 4294967295, %s4518_s11   ;;  %s4367_s13 = sadd.s32 4294967294, %s4518_s11   ;;  %s4518_s11 = sphi %s4542_s11, %s14_s11   ;;  %s4514_s10 = sphi %s4540_s10, %s6698_s10   ;;  %s4510_s9 = sphi %s4538_s9, %s6697_s9   ;;  %s4506_s8 = sphi %s4536_s8, %s6696_s8   ;;  %s4502_s7 = sphi %s4534_s7, %s6695_s7   ;;  %s4498_s6 = sphi %s4532_s6, %s6694_s6  }
   0x5   : > { %s26_s14 = sadd.s32 1, %s4514_s10  ;;  %s35_s15 = sadd.s32 1, %s4506_s8 }
   0x6   : > { %p28_p0 = scmp.ge.s32.totalorder %s26_s14, 2  ;;  %p42_p1 = scmp.ne.s32.totalorder %s4506_s8, %s4502_s7 }
   0x7   : > { %p43_p2 = scmp.eq.s32.totalorder %s4518_s11, 0  ;;  %p72_p3 = scmp.eq.s32.totalorder %s4366_s12, 1 }
   0x8   : > { %s6700_s14 = smov (%p28_p0, %s26_s14), 0  ;;  %p77_p6 = scmp.ne.s32.totalorder %s4502_s7, %s4498_s6 }
   0x9   : > { %p44_p4 = por %p43_p2, %p42_p1  ;;  %p4571_p5 = por %p72_p3, %p42_p1 }
   0xa   : > { %s31_s17 = ssub.s32 %s4514_s10, %s6700_s14  ;;  %p78_p8 = scmp.eq.s32.totalorder %s4367_s13, 1 }
   0xb   : > { %p33_p7 = scmp.eq.s32.totalorder %s31_s17, 0  ;;  %p4369_p10 = scmp.ge.s32.totalorder %s4518_s11, 2 }
   0xc   : > { %p4582_p9 = por %p78_p8, %p77_p6 }
   0xd   : > { %s4580_s18 = scalar_select %p33_p7, %s4506_s8, %s35_s15  }
   0xe   : > { %94 = sbr.rel (%p4369_p10) target bundleno = 330 (0x14a), region = 16 }
  0x15   : > { %97 = sbr.rel (!%p44_p4) target bundleno = 330 (0x14a), region = 20  ;;  %s99_s20 = sand.u32 (%p44_p4), 1, %s4506_s8  }
  0x16   : > { %s4379_s21 = sshll.u32 (%p44_p4), %s4514_s10, 6  ;;  %s4381_s22 = smul.u32 (%p44_p4), 4864, %s99_s20 }
  0x17   : > { %s4594_s25 = scalar_lea.vmem (%p44_p4), %s6690_s0, %s4379_s21 }
  0x18   : > { %v120_v0 = vld [vmem:[%s4594_s25] sm:$0xff] (%p44_p4)  ;;  %v122_v1 = vld [vmem:[%s4594_s25 + $0x8] sm:$0xff] (%p44_p4)  ;;  %v124_v2 = vld [vmem:[%s4594_s25 + $0x10] sm:$0xff] (%p44_p4)  ;;  %s4602_s26 = scalar_lea.vmem (%p44_p4), [#allocation2], %s4381_s22 }
  0x19   : > { %v126_v3 = vld [vmem:[%s4594_s25 + $0x18] sm:$0xff] (%p44_p4)  ;;  %v128_v4 = vld [vmem:[%s4594_s25 + $0x20] sm:$0xff] (%p44_p4)  ;;  %v130_v5 = vld [vmem:[%s4594_s25 + $0x28] sm:$0xff] (%p44_p4)  ;;  %121 = vst [vmem:[%s4602_s26] sm:$0xff] (%p44_p4), %v120_v0 }
  0x1a   : > { %123 = vst [vmem:[%s4602_s26 + $0x8] sm:$0xff] (%p44_p4), %v122_v1  ;;  %125 = vst [vmem:[%s4602_s26 + $0x10] sm:$0xff] (%p44_p4), %v124_v2  ;;  %v132_v6 = vld [vmem:[%s4594_s25 + $0x30] sm:$0xff] (%p44_p4)  ;;  %v134_v7 = vld [vmem:[%s4594_s25 + $0x38] sm:$0xff] (%p44_p4) }
  0x1b   : > { %127 = vst [vmem:[%s4602_s26 + $0x18] sm:$0xff] (%p44_p4), %v126_v3  ;;  %129 = vst [vmem:[%s4602_s26 + $0x20] sm:$0xff] (%p44_p4), %v128_v4  ;;  %v136_v8 = vld [vmem:[%s4594_s25 + $0x80] sm:$0xff] (%p44_p4)  ;;  %v138_v9 = vld [vmem:[%s4594_s25 + $0x88] sm:$0xff] (%p44_p4) }
  0x1c   : > { %131 = vst [vmem:[%s4602_s26 + $0x28] sm:$0xff] %v130_v5  ;;  %133 = vst [vmem:[%s4602_s26 + $0x30] sm:$0xff] %v132_v6  ;;  %v140_v10 = vld [vmem:[%s4594_s25 + $0x90] sm:$0xff]  ;;  %v142_v11 = vld [vmem:[%s4594_s25 + $0x98] sm:$0xff] }
  0x1d   : > { %135 = vst [vmem:[%s4602_s26 + $0x38] sm:$0xff] %v134_v7  ;;  %137 = vst [vmem:[%s4602_s26 + $0x40] sm:$0xff] %v136_v8  ;;  %v144_v12 = vld [vmem:[%s4594_s25 + $0xa0] sm:$0xff]  ;;  %v146_v13 = vld [vmem:[%s4594_s25 + $0xa8] sm:$0xff] }
  0x1e   : > { %139 = vst [vmem:[%s4602_s26 + $0x48] sm:$0xff] %v138_v9  ;;  %141 = vst [vmem:[%s4602_s26 + $0x50] sm:$0xff] %v140_v10  ;;  %v148_v14 = vld [vmem:[%s4594_s25 + $0xb0] sm:$0xff]  ;;  %v150_v15 = vld [vmem:[%s4594_s25 + $0xb8] sm:$0xff] }
  0x1f   : > { %143 = vst [vmem:[%s4602_s26 + $0x58] sm:$0xff] %v142_v11  ;;  %145 = vst [vmem:[%s4602_s26 + $0x60] sm:$0xff] %v144_v12  ;;  %v152_v16 = vld [vmem:[%s4594_s25 + $0x100] sm:$0xff]  ;;  %v154_v17 = vld [vmem:[%s4594_s25 + $0x108] sm:$0xff] }
  0x20   : > { %147 = vst [vmem:[%s4602_s26 + $0x68] sm:$0xff] %v146_v13  ;;  %149 = vst [vmem:[%s4602_s26 + $0x70] sm:$0xff] %v148_v14  ;;  %v156_v18 = vld [vmem:[%s4594_s25 + $0x110] sm:$0xff]  ;;  %v158_v19 = vld [vmem:[%s4594_s25 + $0x118] sm:$0xff] }
  0x21   : > { %151 = vst [vmem:[%s4602_s26 + $0x78] sm:$0xff] %v150_v15  ;;  %153 = vst [vmem:[%s4602_s26 + $0x80] sm:$0xff] %v152_v16  ;;  %v160_v20 = vld [vmem:[%s4594_s25 + $0x120] sm:$0xff]  ;;  %v162_v21 = vld [vmem:[%s4594_s25 + $0x128] sm:$0xff] }
  0x22   : > { %155 = vst [vmem:[%s4602_s26 + $0x88] sm:$0xff] %v154_v17  ;;  %157 = vst [vmem:[%s4602_s26 + $0x90] sm:$0xff] %v156_v18  ;;  %v164_v22 = vld [vmem:[%s4594_s25 + $0x130] sm:$0xff]  ;;  %v166_v23 = vld [vmem:[%s4594_s25 + $0x138] sm:$0xff] }
  0x23   : > { %159 = vst [vmem:[%s4602_s26 + $0x98] sm:$0xff] %v158_v19  ;;  %161 = vst [vmem:[%s4602_s26 + $0xa0] sm:$0xff] %v160_v20  ;;  %v168_v24 = vld [vmem:[%s4594_s25 + $0x180] sm:$0xff]  ;;  %v170_v25 = vld [vmem:[%s4594_s25 + $0x188] sm:$0xff] }
  0x24   : > { %163 = vst [vmem:[%s4602_s26 + $0xa8] sm:$0xff] %v162_v21  ;;  %165 = vst [vmem:[%s4602_s26 + $0xb0] sm:$0xff] %v164_v22  ;;  %v172_v26 = vld [vmem:[%s4594_s25 + $0x190] sm:$0xff]  ;;  %v174_v27 = vld [vmem:[%s4594_s25 + $0x198] sm:$0xff] }
  0x25   : > { %167 = vst [vmem:[%s4602_s26 + $0xb8] sm:$0xff] %v166_v23  ;;  %169 = vst [vmem:[%s4602_s26 + $0xc0] sm:$0xff] %v168_v24  ;;  %v176_v28 = vld [vmem:[%s4594_s25 + $0x1a0] sm:$0xff]  ;;  %v178_v29 = vld [vmem:[%s4594_s25 + $0x1a8] sm:$0xff] }
  0x26   : > { %171 = vst [vmem:[%s4602_s26 + $0xc8] sm:$0xff] %v170_v25  ;;  %173 = vst [vmem:[%s4602_s26 + $0xd0] sm:$0xff] %v172_v26  ;;  %v180_v30 = vld [vmem:[%s4594_s25 + $0x1b0] sm:$0xff]  ;;  %v182_v31 = vld [vmem:[%s4594_s25 + $0x1b8] sm:$0xff] }
  0x27   : > { %175 = vst [vmem:[%s4602_s26 + $0xd8] sm:$0xff] %v174_v27  ;;  %177 = vst [vmem:[%s4602_s26 + $0xe0] sm:$0xff] %v176_v28  ;;  %v184_v32 = vld [vmem:[%s4594_s25 + $0x200] sm:$0xff]  ;;  %v186_v33 = vld [vmem:[%s4594_s25 + $0x208] sm:$0xff] }
  0x28   : > { %179 = vst [vmem:[%s4602_s26 + $0xe8] sm:$0xff] %v178_v29  ;;  %181 = vst [vmem:[%s4602_s26 + $0xf0] sm:$0xff] %v180_v30  ;;  %v188_v34 = vld [vmem:[%s4594_s25 + $0x210] sm:$0xff]  ;;  %v190_v35 = vld [vmem:[%s4594_s25 + $0x218] sm:$0xff] }
  0x29   : > { %183 = vst [vmem:[%s4602_s26 + $0xf8] sm:$0xff] %v182_v31  ;;  %185 = vst [vmem:[%s4602_s26 + $0x100] sm:$0xff] %v184_v32  ;;  %v192_v36 = vld [vmem:[%s4594_s25 + $0x220] sm:$0xff]  ;;  %v194_v37 = vld [vmem:[%s4594_s25 + $0x228] sm:$0xff] }
  0x2a   : > { %187 = vst [vmem:[%s4602_s26 + $0x108] sm:$0xff] %v186_v33  ;;  %189 = vst [vmem:[%s4602_s26 + $0x110] sm:$0xff] %v188_v34  ;;  %v196_v38 = vld [vmem:[%s4594_s25 + $0x230] sm:$0xff]  ;;  %v198_v39 = vld [vmem:[%s4594_s25 + $0x238] sm:$0xff] }
  0x2b   : > { %191 = vst [vmem:[%s4602_s26 + $0x118] sm:$0xff] %v190_v35  ;;  %193 = vst [vmem:[%s4602_s26 + $0x120] sm:$0xff] %v192_v36  ;;  %v200_v40 = vld [vmem:[%s4594_s25 + $0x280] sm:$0xff]  ;;  %v202_v41 = vld [vmem:[%s4594_s25 + $0x288] sm:$0xff] }
  0x2c   : > { %195 = vst [vmem:[%s4602_s26 + $0x128] sm:$0xff] %v194_v37  ;;  %197 = vst [vmem:[%s4602_s26 + $0x130] sm:$0xff] %v196_v38  ;;  %v204_v42 = vld [vmem:[%s4594_s25 + $0x290] sm:$0xff]  ;;  %v206_v43 = vld [vmem:[%s4594_s25 + $0x298] sm:$0xff] }
  0x2d   : > { %199 = vst [vmem:[%s4602_s26 + $0x138] sm:$0xff] %v198_v39  ;;  %201 = vst [vmem:[%s4602_s26 + $0x140] sm:$0xff] %v200_v40  ;;  %v208_v44 = vld [vmem:[%s4594_s25 + $0x2a0] sm:$0xff]  ;;  %v210_v45 = vld [vmem:[%s4594_s25 + $0x2a8] sm:$0xff] }
  0x2e   : > { %203 = vst [vmem:[%s4602_s26 + $0x148] sm:$0xff] %v202_v41  ;;  %205 = vst [vmem:[%s4602_s26 + $0x150] sm:$0xff] %v204_v42  ;;  %v212_v46 = vld [vmem:[%s4594_s25 + $0x2b0] sm:$0xff]  ;;  %v214_v47 = vld [vmem:[%s4594_s25 + $0x2b8] sm:$0xff] }
  0x2f   : > { %207 = vst [vmem:[%s4602_s26 + $0x158] sm:$0xff] %v206_v43  ;;  %209 = vst [vmem:[%s4602_s26 + $0x160] sm:$0xff] %v208_v44  ;;  %v216_v48 = vld [vmem:[%s4594_s25 + $0x300] sm:$0xff]  ;;  %v218_v49 = vld [vmem:[%s4594_s25 + $0x308] sm:$0xff] }
  0x30   : > { %211 = vst [vmem:[%s4602_s26 + $0x168] sm:$0xff] %v210_v45  ;;  %213 = vst [vmem:[%s4602_s26 + $0x170] sm:$0xff] %v212_v46  ;;  %v220_v50 = vld [vmem:[%s4594_s25 + $0x310] sm:$0xff]  ;;  %v222_v51 = vld [vmem:[%s4594_s25 + $0x318] sm:$0xff] }
  0x31   : > { %215 = vst [vmem:[%s4602_s26 + $0x178] sm:$0xff] %v214_v47  ;;  %217 = vst [vmem:[%s4602_s26 + $0x180] sm:$0xff] %v216_v48  ;;  %v224_v52 = vld [vmem:[%s4594_s25 + $0x320] sm:$0xff]  ;;  %v226_v53 = vld [vmem:[%s4594_s25 + $0x328] sm:$0xff] }
  0x32   : > { %219 = vst [vmem:[%s4602_s26 + $0x188] sm:$0xff] %v218_v49  ;;  %221 = vst [vmem:[%s4602_s26 + $0x190] sm:$0xff] %v220_v50  ;;  %v228_v54 = vld [vmem:[%s4594_s25 + $0x330] sm:$0xff]  ;;  %v230_v55 = vld [vmem:[%s4594_s25 + $0x338] sm:$0xff] }
  0x33   : > { %223 = vst [vmem:[%s4602_s26 + $0x198] sm:$0xff] %v222_v51  ;;  %225 = vst [vmem:[%s4602_s26 + $0x1a0] sm:$0xff] %v224_v52  ;;  %v232_v56 = vld [vmem:[%s4594_s25 + $0x380] sm:$0xff]  ;;  %v234_v57 = vld [vmem:[%s4594_s25 + $0x388] sm:$0xff] }
  0x34   : > { %227 = vst [vmem:[%s4602_s26 + $0x1a8] sm:$0xff] %v226_v53  ;;  %229 = vst [vmem:[%s4602_s26 + $0x1b0] sm:$0xff] %v228_v54  ;;  %v236_v58 = vld [vmem:[%s4594_s25 + $0x390] sm:$0xff]  ;;  %v238_v59 = vld [vmem:[%s4594_s25 + $0x398] sm:$0xff] }
  0x35   : > { %231 = vst [vmem:[%s4602_s26 + $0x1b8] sm:$0xff] %v230_v55  ;;  %233 = vst [vmem:[%s4602_s26 + $0x1c0] sm:$0xff] %v232_v56  ;;  %v240_v60 = vld [vmem:[%s4594_s25 + $0x3a0] sm:$0xff]  ;;  %v242_v61 = vld [vmem:[%s4594_s25 + $0x3a8] sm:$0xff] }
  0x36   : > { %235 = vst [vmem:[%s4602_s26 + $0x1c8] sm:$0xff] %v234_v57  ;;  %237 = vst [vmem:[%s4602_s26 + $0x1d0] sm:$0xff] %v236_v58  ;;  %v244_v62 = vld [vmem:[%s4594_s25 + $0x3b0] sm:$0xff]  ;;  %v246_v63 = vld [vmem:[%s4594_s25 + $0x3b8] sm:$0xff] }
  0x37   : > { %239 = vst [vmem:[%s4602_s26 + $0x1d8] sm:$0xff] %v238_v59  ;;  %241 = vst [vmem:[%s4602_s26 + $0x1e0] sm:$0xff] %v240_v60  ;;  %v248_v0 = vld [vmem:[%s4594_s25 + $0x400] sm:$0xff]  ;;  %v250_v1 = vld [vmem:[%s4594_s25 + $0x408] sm:$0xff] }
  0x38   : > { %243 = vst [vmem:[%s4602_s26 + $0x1e8] sm:$0xff] %v242_v61  ;;  %245 = vst [vmem:[%s4602_s26 + $0x1f0] sm:$0xff] %v244_v62  ;;  %v252_v2 = vld [vmem:[%s4594_s25 + $0x410] sm:$0xff]  ;;  %v254_v3 = vld [vmem:[%s4594_s25 + $0x418] sm:$0xff] }
  0x39   : > { %247 = vst [vmem:[%s4602_s26 + $0x1f8] sm:$0xff] %v246_v63  ;;  %249 = vst [vmem:[%s4602_s26 + $0x200] sm:$0xff] %v248_v0  ;;  %v256_v4 = vld [vmem:[%s4594_s25 + $0x420] sm:$0xff]  ;;  %v258_v5 = vld [vmem:[%s4594_s25 + $0x428] sm:$0xff] }
  0x3a   : > { %251 = vst [vmem:[%s4602_s26 + $0x208] sm:$0xff] %v250_v1  ;;  %253 = vst [vmem:[%s4602_s26 + $0x210] sm:$0xff] %v252_v2  ;;  %v260_v6 = vld [vmem:[%s4594_s25 + $0x430] sm:$0xff]  ;;  %v262_v7 = vld [vmem:[%s4594_s25 + $0x438] sm:$0xff] }
  0x3b   : > { %255 = vst [vmem:[%s4602_s26 + $0x218] sm:$0xff] %v254_v3  ;;  %257 = vst [vmem:[%s4602_s26 + $0x220] sm:$0xff] %v256_v4  ;;  %v264_v8 = vld [vmem:[%s4594_s25 + $0x480] sm:$0xff]  ;;  %v266_v9 = vld [vmem:[%s4594_s25 + $0x488] sm:$0xff] }
  0x3c   : > { %259 = vst [vmem:[%s4602_s26 + $0x228] sm:$0xff] %v258_v5  ;;  %261 = vst [vmem:[%s4602_s26 + $0x230] sm:$0xff] %v260_v6  ;;  %v268_v10 = vld [vmem:[%s4594_s25 + $0x490] sm:$0xff]  ;;  %v270_v11 = vld [vmem:[%s4594_s25 + $0x498] sm:$0xff] }
  0x3d   : > { %263 = vst [vmem:[%s4602_s26 + $0x238] sm:$0xff] %v262_v7  ;;  %265 = vst [vmem:[%s4602_s26 + $0x240] sm:$0xff] %v264_v8  ;;  %v272_v12 = vld [vmem:[%s4594_s25 + $0x4a0] sm:$0xff]  ;;  %v274_v13 = vld [vmem:[%s4594_s25 + $0x4a8] sm:$0xff] }
  0x3e   : > { %267 = vst [vmem:[%s4602_s26 + $0x248] sm:$0xff] %v266_v9  ;;  %269 = vst [vmem:[%s4602_s26 + $0x250] sm:$0xff] %v268_v10  ;;  %v276_v14 = vld [vmem:[%s4594_s25 + $0x4b0] sm:$0xff]  ;;  %v278_v15 = vld [vmem:[%s4594_s25 + $0x4b8] sm:$0xff] }
  0x3f   : > { %271 = vst [vmem:[%s4602_s26 + $0x258] sm:$0xff] %v270_v11  ;;  %273 = vst [vmem:[%s4602_s26 + $0x260] sm:$0xff] %v272_v12  ;;  %v280_v16 = vld [vmem:[%s4594_s25 + $0x500] sm:$0xff]  ;;  %v282_v17 = vld [vmem:[%s4594_s25 + $0x508] sm:$0xff] }
  0x40   : > { %275 = vst [vmem:[%s4602_s26 + $0x268] sm:$0xff] %v274_v13  ;;  %277 = vst [vmem:[%s4602_s26 + $0x270] sm:$0xff] %v276_v14  ;;  %v284_v18 = vld [vmem:[%s4594_s25 + $0x510] sm:$0xff]  ;;  %v286_v19 = vld [vmem:[%s4594_s25 + $0x518] sm:$0xff] }
  0x41   : > { %279 = vst [vmem:[%s4602_s26 + $0x278] sm:$0xff] %v278_v15  ;;  %281 = vst [vmem:[%s4602_s26 + $0x280] sm:$0xff] %v280_v16  ;;  %v288_v20 = vld [vmem:[%s4594_s25 + $0x520] sm:$0xff]  ;;  %v290_v21 = vld [vmem:[%s4594_s25 + $0x528] sm:$0xff] }
  0x42   : > { %283 = vst [vmem:[%s4602_s26 + $0x288] sm:$0xff] %v282_v17  ;;  %285 = vst [vmem:[%s4602_s26 + $0x290] sm:$0xff] %v284_v18  ;;  %v292_v22 = vld [vmem:[%s4594_s25 + $0x530] sm:$0xff]  ;;  %v294_v23 = vld [vmem:[%s4594_s25 + $0x538] sm:$0xff] }
  0x43   : > { %287 = vst [vmem:[%s4602_s26 + $0x298] sm:$0xff] %v286_v19  ;;  %289 = vst [vmem:[%s4602_s26 + $0x2a0] sm:$0xff] %v288_v20  ;;  %v296_v24 = vld [vmem:[%s4594_s25 + $0x580] sm:$0xff]  ;;  %v298_v25 = vld [vmem:[%s4594_s25 + $0x588] sm:$0xff] }
  0x44   : > { %291 = vst [vmem:[%s4602_s26 + $0x2a8] sm:$0xff] %v290_v21  ;;  %293 = vst [vmem:[%s4602_s26 + $0x2b0] sm:$0xff] %v292_v22  ;;  %v300_v26 = vld [vmem:[%s4594_s25 + $0x590] sm:$0xff]  ;;  %v302_v27 = vld [vmem:[%s4594_s25 + $0x598] sm:$0xff] }
  0x45   : > { %295 = vst [vmem:[%s4602_s26 + $0x2b8] sm:$0xff] %v294_v23  ;;  %297 = vst [vmem:[%s4602_s26 + $0x2c0] sm:$0xff] %v296_v24  ;;  %v304_v28 = vld [vmem:[%s4594_s25 + $0x5a0] sm:$0xff]  ;;  %v306_v29 = vld [vmem:[%s4594_s25 + $0x5a8] sm:$0xff] }
  0x46   : > { %299 = vst [vmem:[%s4602_s26 + $0x2c8] sm:$0xff] %v298_v25  ;;  %301 = vst [vmem:[%s4602_s26 + $0x2d0] sm:$0xff] %v300_v26  ;;  %v308_v30 = vld [vmem:[%s4594_s25 + $0x5b0] sm:$0xff]  ;;  %v310_v31 = vld [vmem:[%s4594_s25 + $0x5b8] sm:$0xff] }
  0x47   : > { %303 = vst [vmem:[%s4602_s26 + $0x2d8] sm:$0xff] %v302_v27  ;;  %305 = vst [vmem:[%s4602_s26 + $0x2e0] sm:$0xff] %v304_v28  ;;  %v312_v32 = vld [vmem:[%s4594_s25 + $0x600] sm:$0xff]  ;;  %v314_v33 = vld [vmem:[%s4594_s25 + $0x608] sm:$0xff] }
  0x48   : > { %307 = vst [vmem:[%s4602_s26 + $0x2e8] sm:$0xff] %v306_v29  ;;  %309 = vst [vmem:[%s4602_s26 + $0x2f0] sm:$0xff] %v308_v30  ;;  %v316_v34 = vld [vmem:[%s4594_s25 + $0x610] sm:$0xff]  ;;  %v318_v35 = vld [vmem:[%s4594_s25 + $0x618] sm:$0xff] }
  0x49   : > { %311 = vst [vmem:[%s4602_s26 + $0x2f8] sm:$0xff] %v310_v31  ;;  %313 = vst [vmem:[%s4602_s26 + $0x300] sm:$0xff] %v312_v32  ;;  %v320_v36 = vld [vmem:[%s4594_s25 + $0x620] sm:$0xff]  ;;  %v322_v37 = vld [vmem:[%s4594_s25 + $0x628] sm:$0xff] }
  0x4a   : > { %315 = vst [vmem:[%s4602_s26 + $0x308] sm:$0xff] %v314_v33  ;;  %317 = vst [vmem:[%s4602_s26 + $0x310] sm:$0xff] %v316_v34  ;;  %v324_v38 = vld [vmem:[%s4594_s25 + $0x630] sm:$0xff]  ;;  %v326_v39 = vld [vmem:[%s4594_s25 + $0x638] sm:$0xff] }
  0x4b   : > { %319 = vst [vmem:[%s4602_s26 + $0x318] sm:$0xff] %v318_v35  ;;  %321 = vst [vmem:[%s4602_s26 + $0x320] sm:$0xff] %v320_v36  ;;  %v328_v40 = vld [vmem:[%s4594_s25 + $0x680] sm:$0xff]  ;;  %v330_v41 = vld [vmem:[%s4594_s25 + $0x688] sm:$0xff] }
  0x4c   : > { %323 = vst [vmem:[%s4602_s26 + $0x328] sm:$0xff] %v322_v37  ;;  %325 = vst [vmem:[%s4602_s26 + $0x330] sm:$0xff] %v324_v38  ;;  %v332_v42 = vld [vmem:[%s4594_s25 + $0x690] sm:$0xff]  ;;  %v334_v43 = vld [vmem:[%s4594_s25 + $0x698] sm:$0xff] }
  0x4d   : > { %327 = vst [vmem:[%s4602_s26 + $0x338] sm:$0xff] %v326_v39  ;;  %329 = vst [vmem:[%s4602_s26 + $0x340] sm:$0xff] %v328_v40  ;;  %v336_v44 = vld [vmem:[%s4594_s25 + $0x6a0] sm:$0xff]  ;;  %v338_v45 = vld [vmem:[%s4594_s25 + $0x6a8] sm:$0xff] }
  0x4e   : > { %331 = vst [vmem:[%s4602_s26 + $0x348] sm:$0xff] %v330_v41  ;;  %333 = vst [vmem:[%s4602_s26 + $0x350] sm:$0xff] %v332_v42  ;;  %v340_v46 = vld [vmem:[%s4594_s25 + $0x6b0] sm:$0xff]  ;;  %v342_v47 = vld [vmem:[%s4594_s25 + $0x6b8] sm:$0xff] }
  0x4f   : > { %335 = vst [vmem:[%s4602_s26 + $0x358] sm:$0xff] %v334_v43  ;;  %337 = vst [vmem:[%s4602_s26 + $0x360] sm:$0xff] %v336_v44  ;;  %v344_v48 = vld [vmem:[%s4594_s25 + $0x700] sm:$0xff]  ;;  %v346_v49 = vld [vmem:[%s4594_s25 + $0x708] sm:$0xff] }
  0x50   : > { %339 = vst [vmem:[%s4602_s26 + $0x368] sm:$0xff] %v338_v45  ;;  %341 = vst [vmem:[%s4602_s26 + $0x370] sm:$0xff] %v340_v46  ;;  %v348_v50 = vld [vmem:[%s4594_s25 + $0x710] sm:$0xff]  ;;  %v350_v51 = vld [vmem:[%s4594_s25 + $0x718] sm:$0xff] }
  0x51   : > { %343 = vst [vmem:[%s4602_s26 + $0x378] sm:$0xff] %v342_v47  ;;  %345 = vst [vmem:[%s4602_s26 + $0x380] sm:$0xff] %v344_v48  ;;  %v352_v52 = vld [vmem:[%s4594_s25 + $0x720] sm:$0xff]  ;;  %v354_v53 = vld [vmem:[%s4594_s25 + $0x728] sm:$0xff] }
  0x52   : > { %347 = vst [vmem:[%s4602_s26 + $0x388] sm:$0xff] %v346_v49  ;;  %349 = vst [vmem:[%s4602_s26 + $0x390] sm:$0xff] %v348_v50  ;;  %v356_v54 = vld [vmem:[%s4594_s25 + $0x730] sm:$0xff]  ;;  %v358_v55 = vld [vmem:[%s4594_s25 + $0x738] sm:$0xff] }
  0x53   : > { %351 = vst [vmem:[%s4602_s26 + $0x398] sm:$0xff] %v350_v51  ;;  %353 = vst [vmem:[%s4602_s26 + $0x3a0] sm:$0xff] %v352_v52  ;;  %v360_v56 = vld [vmem:[%s4594_s25 + $0x780] sm:$0xff]  ;;  %v362_v57 = vld [vmem:[%s4594_s25 + $0x788] sm:$0xff] }
  0x54   : > { %355 = vst [vmem:[%s4602_s26 + $0x3a8] sm:$0xff] %v354_v53  ;;  %357 = vst [vmem:[%s4602_s26 + $0x3b0] sm:$0xff] %v356_v54  ;;  %v364_v58 = vld [vmem:[%s4594_s25 + $0x790] sm:$0xff]  ;;  %v366_v59 = vld [vmem:[%s4594_s25 + $0x798] sm:$0xff] }
  0x55   : > { %359 = vst [vmem:[%s4602_s26 + $0x3b8] sm:$0xff] %v358_v55  ;;  %361 = vst [vmem:[%s4602_s26 + $0x3c0] sm:$0xff] %v360_v56  ;;  %v368_v60 = vld [vmem:[%s4594_s25 + $0x7a0] sm:$0xff]  ;;  %v370_v61 = vld [vmem:[%s4594_s25 + $0x7a8] sm:$0xff] }
  0x56   : > { %363 = vst [vmem:[%s4602_s26 + $0x3c8] sm:$0xff] %v362_v57  ;;  %365 = vst [vmem:[%s4602_s26 + $0x3d0] sm:$0xff] %v364_v58  ;;  %v372_v62 = vld [vmem:[%s4594_s25 + $0x7b0] sm:$0xff]  ;;  %v374_v63 = vld [vmem:[%s4594_s25 + $0x7b8] sm:$0xff] }
  0x57   : > { %367 = vst [vmem:[%s4602_s26 + $0x3d8] sm:$0xff] %v366_v59  ;;  %369 = vst [vmem:[%s4602_s26 + $0x3e0] sm:$0xff] %v368_v60  ;;  %v376_v0 = vld [vmem:[%s4594_s25 + $0x800] sm:$0xff]  ;;  %v378_v1 = vld [vmem:[%s4594_s25 + $0x808] sm:$0xff] }
  0x58   : > { %371 = vst [vmem:[%s4602_s26 + $0x3e8] sm:$0xff] %v370_v61  ;;  %373 = vst [vmem:[%s4602_s26 + $0x3f0] sm:$0xff] %v372_v62  ;;  %v380_v2 = vld [vmem:[%s4594_s25 + $0x810] sm:$0xff]  ;;  %v382_v3 = vld [vmem:[%s4594_s25 + $0x818] sm:$0xff] }
  0x59   : > { %375 = vst [vmem:[%s4602_s26 + $0x3f8] sm:$0xff] %v374_v63  ;;  %377 = vst [vmem:[%s4602_s26 + $0x400] sm:$0xff] %v376_v0  ;;  %v384_v4 = vld [vmem:[%s4594_s25 + $0x820] sm:$0xff]  ;;  %v386_v5 = vld [vmem:[%s4594_s25 + $0x828] sm:$0xff] }
  0x5a   : > { %379 = vst [vmem:[%s4602_s26 + $0x408] sm:$0xff] %v378_v1  ;;  %381 = vst [vmem:[%s4602_s26 + $0x410] sm:$0xff] %v380_v2  ;;  %v388_v6 = vld [vmem:[%s4594_s25 + $0x830] sm:$0xff]  ;;  %v390_v7 = vld [vmem:[%s4594_s25 + $0x838] sm:$0xff] }
  0x5b   : > { %383 = vst [vmem:[%s4602_s26 + $0x418] sm:$0xff] %v382_v3  ;;  %385 = vst [vmem:[%s4602_s26 + $0x420] sm:$0xff] %v384_v4  ;;  %v392_v8 = vld [vmem:[%s4594_s25 + $0x880] sm:$0xff]  ;;  %v394_v9 = vld [vmem:[%s4594_s25 + $0x888] sm:$0xff] }
  0x5c   : > { %387 = vst [vmem:[%s4602_s26 + $0x428] sm:$0xff] %v386_v5  ;;  %389 = vst [vmem:[%s4602_s26 + $0x430] sm:$0xff] %v388_v6  ;;  %v396_v10 = vld [vmem:[%s4594_s25 + $0x890] sm:$0xff]  ;;  %v398_v11 = vld [vmem:[%s4594_s25 + $0x898] sm:$0xff] }
  0x5d   : > { %391 = vst [vmem:[%s4602_s26 + $0x438] sm:$0xff] %v390_v7  ;;  %393 = vst [vmem:[%s4602_s26 + $0x440] sm:$0xff] %v392_v8  ;;  %v400_v12 = vld [vmem:[%s4594_s25 + $0x8a0] sm:$0xff]  ;;  %v402_v13 = vld [vmem:[%s4594_s25 + $0x8a8] sm:$0xff] }
  0x5e   : > { %395 = vst [vmem:[%s4602_s26 + $0x448] sm:$0xff] %v394_v9  ;;  %397 = vst [vmem:[%s4602_s26 + $0x450] sm:$0xff] %v396_v10  ;;  %v404_v14 = vld [vmem:[%s4594_s25 + $0x8b0] sm:$0xff]  ;;  %v406_v15 = vld [vmem:[%s4594_s25 + $0x8b8] sm:$0xff] }
  0x5f   : > { %399 = vst [vmem:[%s4602_s26 + $0x458] sm:$0xff] %v398_v11  ;;  %401 = vst [vmem:[%s4602_s26 + $0x460] sm:$0xff] %v400_v12  ;;  %v408_v16 = vld [vmem:[%s4594_s25 + $0x900] sm:$0xff]  ;;  %v410_v17 = vld [vmem:[%s4594_s25 + $0x908] sm:$0xff] }
  0x60   : > { %403 = vst [vmem:[%s4602_s26 + $0x468] sm:$0xff] %v402_v13  ;;  %405 = vst [vmem:[%s4602_s26 + $0x470] sm:$0xff] %v404_v14  ;;  %v412_v18 = vld [vmem:[%s4594_s25 + $0x910] sm:$0xff]  ;;  %v414_v19 = vld [vmem:[%s4594_s25 + $0x918] sm:$0xff] }
  0x61   : > { %407 = vst [vmem:[%s4602_s26 + $0x478] sm:$0xff] %v406_v15  ;;  %409 = vst [vmem:[%s4602_s26 + $0x480] sm:$0xff] %v408_v16  ;;  %v416_v20 = vld [vmem:[%s4594_s25 + $0x920] sm:$0xff]  ;;  %v418_v21 = vld [vmem:[%s4594_s25 + $0x928] sm:$0xff] }
  0x62   : > { %411 = vst [vmem:[%s4602_s26 + $0x488] sm:$0xff] %v410_v17  ;;  %413 = vst [vmem:[%s4602_s26 + $0x490] sm:$0xff] %v412_v18  ;;  %v420_v22 = vld [vmem:[%s4594_s25 + $0x930] sm:$0xff]  ;;  %v422_v23 = vld [vmem:[%s4594_s25 + $0x938] sm:$0xff] }
  0x63   : > { %415 = vst [vmem:[%s4602_s26 + $0x498] sm:$0xff] %v414_v19  ;;  %417 = vst [vmem:[%s4602_s26 + $0x4a0] sm:$0xff] %v416_v20  ;;  %v424_v24 = vld [vmem:[%s4594_s25 + $0x980] sm:$0xff]  ;;  %v426_v25 = vld [vmem:[%s4594_s25 + $0x988] sm:$0xff] }
  0x64   : > { %419 = vst [vmem:[%s4602_s26 + $0x4a8] sm:$0xff] %v418_v21  ;;  %421 = vst [vmem:[%s4602_s26 + $0x4b0] sm:$0xff] %v420_v22  ;;  %v428_v26 = vld [vmem:[%s4594_s25 + $0x990] sm:$0xff]  ;;  %v430_v27 = vld [vmem:[%s4594_s25 + $0x998] sm:$0xff] }
  0x65   : > { %423 = vst [vmem:[%s4602_s26 + $0x4b8] sm:$0xff] %v422_v23  ;;  %425 = vst [vmem:[%s4602_s26 + $0x4c0] sm:$0xff] %v424_v24  ;;  %v432_v28 = vld [vmem:[%s4594_s25 + $0x9a0] sm:$0xff]  ;;  %v434_v29 = vld [vmem:[%s4594_s25 + $0x9a8] sm:$0xff] }
  0x66   : > { %427 = vst [vmem:[%s4602_s26 + $0x4c8] sm:$0xff] %v426_v25  ;;  %429 = vst [vmem:[%s4602_s26 + $0x4d0] sm:$0xff] %v428_v26  ;;  %v436_v30 = vld [vmem:[%s4594_s25 + $0x9b0] sm:$0xff]  ;;  %v438_v31 = vld [vmem:[%s4594_s25 + $0x9b8] sm:$0xff] }
  0x67   : > { %431 = vst [vmem:[%s4602_s26 + $0x4d8] sm:$0xff] %v430_v27  ;;  %433 = vst [vmem:[%s4602_s26 + $0x4e0] sm:$0xff] %v432_v28  ;;  %v440_v32 = vld [vmem:[%s4594_s25 + $0xa00] sm:$0xff]  ;;  %v442_v33 = vld [vmem:[%s4594_s25 + $0xa08] sm:$0xff] }
  0x68   : > { %435 = vst [vmem:[%s4602_s26 + $0x4e8] sm:$0xff] %v434_v29  ;;  %437 = vst [vmem:[%s4602_s26 + $0x4f0] sm:$0xff] %v436_v30  ;;  %v444_v34 = vld [vmem:[%s4594_s25 + $0xa10] sm:$0xff]  ;;  %v446_v35 = vld [vmem:[%s4594_s25 + $0xa18] sm:$0xff] }
  0x69   : > { %439 = vst [vmem:[%s4602_s26 + $0x4f8] sm:$0xff] %v438_v31  ;;  %441 = vst [vmem:[%s4602_s26 + $0x500] sm:$0xff] %v440_v32  ;;  %v448_v36 = vld [vmem:[%s4594_s25 + $0xa20] sm:$0xff]  ;;  %v450_v37 = vld [vmem:[%s4594_s25 + $0xa28] sm:$0xff] }
  0x6a   : > { %443 = vst [vmem:[%s4602_s26 + $0x508] sm:$0xff] %v442_v33  ;;  %445 = vst [vmem:[%s4602_s26 + $0x510] sm:$0xff] %v444_v34  ;;  %v452_v38 = vld [vmem:[%s4594_s25 + $0xa30] sm:$0xff]  ;;  %v454_v39 = vld [vmem:[%s4594_s25 + $0xa38] sm:$0xff] }
  0x6b   : > { %447 = vst [vmem:[%s4602_s26 + $0x518] sm:$0xff] %v446_v35  ;;  %449 = vst [vmem:[%s4602_s26 + $0x520] sm:$0xff] %v448_v36  ;;  %v456_v40 = vld [vmem:[%s4594_s25 + $0xa80] sm:$0xff]  ;;  %v458_v41 = vld [vmem:[%s4594_s25 + $0xa88] sm:$0xff] }
  0x6c   : > { %451 = vst [vmem:[%s4602_s26 + $0x528] sm:$0xff] %v450_v37  ;;  %453 = vst [vmem:[%s4602_s26 + $0x530] sm:$0xff] %v452_v38  ;;  %v460_v42 = vld [vmem:[%s4594_s25 + $0xa90] sm:$0xff]  ;;  %v462_v43 = vld [vmem:[%s4594_s25 + $0xa98] sm:$0xff] }
  0x6d   : > { %455 = vst [vmem:[%s4602_s26 + $0x538] sm:$0xff] %v454_v39  ;;  %457 = vst [vmem:[%s4602_s26 + $0x540] sm:$0xff] %v456_v40  ;;  %v464_v44 = vld [vmem:[%s4594_s25 + $0xaa0] sm:$0xff]  ;;  %v466_v45 = vld [vmem:[%s4594_s25 + $0xaa8] sm:$0xff] }
  0x6e   : > { %459 = vst [vmem:[%s4602_s26 + $0x548] sm:$0xff] %v458_v41  ;;  %461 = vst [vmem:[%s4602_s26 + $0x550] sm:$0xff] %v460_v42  ;;  %v468_v46 = vld [vmem:[%s4594_s25 + $0xab0] sm:$0xff]  ;;  %v470_v47 = vld [vmem:[%s4594_s25 + $0xab8] sm:$0xff] }
  0x6f   : > { %463 = vst [vmem:[%s4602_s26 + $0x558] sm:$0xff] %v462_v43  ;;  %465 = vst [vmem:[%s4602_s26 + $0x560] sm:$0xff] %v464_v44  ;;  %v472_v48 = vld [vmem:[%s4594_s25 + $0xb00] sm:$0xff]  ;;  %v474_v49 = vld [vmem:[%s4594_s25 + $0xb08] sm:$0xff] }
  0x70   : > { %467 = vst [vmem:[%s4602_s26 + $0x568] sm:$0xff] %v466_v45  ;;  %469 = vst [vmem:[%s4602_s26 + $0x570] sm:$0xff] %v468_v46  ;;  %v476_v50 = vld [vmem:[%s4594_s25 + $0xb10] sm:$0xff]  ;;  %v478_v51 = vld [vmem:[%s4594_s25 + $0xb18] sm:$0xff] }
  0x71   : > { %471 = vst [vmem:[%s4602_s26 + $0x578] sm:$0xff] %v470_v47  ;;  %473 = vst [vmem:[%s4602_s26 + $0x580] sm:$0xff] %v472_v48  ;;  %v480_v52 = vld [vmem:[%s4594_s25 + $0xb20] sm:$0xff]  ;;  %v482_v53 = vld [vmem:[%s4594_s25 + $0xb28] sm:$0xff] }
  0x72   : > { %475 = vst [vmem:[%s4602_s26 + $0x588] sm:$0xff] %v474_v49  ;;  %477 = vst [vmem:[%s4602_s26 + $0x590] sm:$0xff] %v476_v50  ;;  %v484_v54 = vld [vmem:[%s4594_s25 + $0xb30] sm:$0xff]  ;;  %v486_v55 = vld [vmem:[%s4594_s25 + $0xb38] sm:$0xff] }
  0x73   : > { %479 = vst [vmem:[%s4602_s26 + $0x598] sm:$0xff] %v478_v51  ;;  %481 = vst [vmem:[%s4602_s26 + $0x5a0] sm:$0xff] %v480_v52  ;;  %v488_v56 = vld [vmem:[%s4594_s25 + $0xb80] sm:$0xff]  ;;  %v490_v57 = vld [vmem:[%s4594_s25 + $0xb88] sm:$0xff] }
  0x74   : > { %483 = vst [vmem:[%s4602_s26 + $0x5a8] sm:$0xff] %v482_v53  ;;  %485 = vst [vmem:[%s4602_s26 + $0x5b0] sm:$0xff] %v484_v54  ;;  %v492_v58 = vld [vmem:[%s4594_s25 + $0xb90] sm:$0xff]  ;;  %v494_v59 = vld [vmem:[%s4594_s25 + $0xb98] sm:$0xff] }
  0x75   : > { %487 = vst [vmem:[%s4602_s26 + $0x5b8] sm:$0xff] %v486_v55  ;;  %489 = vst [vmem:[%s4602_s26 + $0x5c0] sm:$0xff] %v488_v56  ;;  %v496_v60 = vld [vmem:[%s4594_s25 + $0xba0] sm:$0xff]  ;;  %v498_v61 = vld [vmem:[%s4594_s25 + $0xba8] sm:$0xff] }
  0x76   : > { %491 = vst [vmem:[%s4602_s26 + $0x5c8] sm:$0xff] %v490_v57  ;;  %493 = vst [vmem:[%s4602_s26 + $0x5d0] sm:$0xff] %v492_v58  ;;  %v500_v62 = vld [vmem:[%s4594_s25 + $0xbb0] sm:$0xff]  ;;  %v502_v63 = vld [vmem:[%s4594_s25 + $0xbb8] sm:$0xff] }
  0x77   : > { %495 = vst [vmem:[%s4602_s26 + $0x5d8] sm:$0xff] %v494_v59  ;;  %497 = vst [vmem:[%s4602_s26 + $0x5e0] sm:$0xff] %v496_v60  ;;  %v504_v0 = vld [vmem:[%s4594_s25 + $0xc00] sm:$0xff]  ;;  %v506_v1 = vld [vmem:[%s4594_s25 + $0xc08] sm:$0xff] }
  0x78   : > { %499 = vst [vmem:[%s4602_s26 + $0x5e8] sm:$0xff] %v498_v61  ;;  %501 = vst [vmem:[%s4602_s26 + $0x5f0] sm:$0xff] %v500_v62  ;;  %v508_v2 = vld [vmem:[%s4594_s25 + $0xc10] sm:$0xff]  ;;  %v510_v3 = vld [vmem:[%s4594_s25 + $0xc18] sm:$0xff] }
  0x79   : > { %503 = vst [vmem:[%s4602_s26 + $0x5f8] sm:$0xff] %v502_v63  ;;  %505 = vst [vmem:[%s4602_s26 + $0x600] sm:$0xff] %v504_v0  ;;  %v512_v4 = vld [vmem:[%s4594_s25 + $0xc20] sm:$0xff]  ;;  %v514_v5 = vld [vmem:[%s4594_s25 + $0xc28] sm:$0xff] }
  0x7a   : > { %507 = vst [vmem:[%s4602_s26 + $0x608] sm:$0xff] %v506_v1  ;;  %509 = vst [vmem:[%s4602_s26 + $0x610] sm:$0xff] %v508_v2  ;;  %v516_v6 = vld [vmem:[%s4594_s25 + $0xc30] sm:$0xff]  ;;  %v518_v7 = vld [vmem:[%s4594_s25 + $0xc38] sm:$0xff] }
  0x7b   : > { %511 = vst [vmem:[%s4602_s26 + $0x618] sm:$0xff] %v510_v3  ;;  %513 = vst [vmem:[%s4602_s26 + $0x620] sm:$0xff] %v512_v4  ;;  %v520_v8 = vld [vmem:[%s4594_s25 + $0xc80] sm:$0xff]  ;;  %v522_v9 = vld [vmem:[%s4594_s25 + $0xc88] sm:$0xff] }
  0x7c   : > { %515 = vst [vmem:[%s4602_s26 + $0x628] sm:$0xff] %v514_v5  ;;  %517 = vst [vmem:[%s4602_s26 + $0x630] sm:$0xff] %v516_v6  ;;  %v524_v10 = vld [vmem:[%s4594_s25 + $0xc90] sm:$0xff]  ;;  %v526_v11 = vld [vmem:[%s4594_s25 + $0xc98] sm:$0xff] }
  0x7d   : > { %519 = vst [vmem:[%s4602_s26 + $0x638] sm:$0xff] %v518_v7  ;;  %521 = vst [vmem:[%s4602_s26 + $0x640] sm:$0xff] %v520_v8  ;;  %v528_v12 = vld [vmem:[%s4594_s25 + $0xca0] sm:$0xff]  ;;  %v530_v13 = vld [vmem:[%s4594_s25 + $0xca8] sm:$0xff] }
  0x7e   : > { %523 = vst [vmem:[%s4602_s26 + $0x648] sm:$0xff] %v522_v9  ;;  %525 = vst [vmem:[%s4602_s26 + $0x650] sm:$0xff] %v524_v10  ;;  %v532_v14 = vld [vmem:[%s4594_s25 + $0xcb0] sm:$0xff]  ;;  %v534_v15 = vld [vmem:[%s4594_s25 + $0xcb8] sm:$0xff] }
  0x7f   : > { %527 = vst [vmem:[%s4602_s26 + $0x658] sm:$0xff] %v526_v11  ;;  %529 = vst [vmem:[%s4602_s26 + $0x660] sm:$0xff] %v528_v12  ;;  %v536_v16 = vld [vmem:[%s4594_s25 + $0xd00] sm:$0xff]  ;;  %v538_v17 = vld [vmem:[%s4594_s25 + $0xd08] sm:$0xff] }
  0x80   : > { %531 = vst [vmem:[%s4602_s26 + $0x668] sm:$0xff] %v530_v13  ;;  %533 = vst [vmem:[%s4602_s26 + $0x670] sm:$0xff] %v532_v14  ;;  %v540_v18 = vld [vmem:[%s4594_s25 + $0xd10] sm:$0xff]  ;;  %v542_v19 = vld [vmem:[%s4594_s25 + $0xd18] sm:$0xff] }
  0x81   : > { %535 = vst [vmem:[%s4602_s26 + $0x678] sm:$0xff] %v534_v15  ;;  %537 = vst [vmem:[%s4602_s26 + $0x680] sm:$0xff] %v536_v16  ;;  %v544_v20 = vld [vmem:[%s4594_s25 + $0xd20] sm:$0xff]  ;;  %v546_v21 = vld [vmem:[%s4594_s25 + $0xd28] sm:$0xff] }
  0x82   : > { %539 = vst [vmem:[%s4602_s26 + $0x688] sm:$0xff] %v538_v17  ;;  %541 = vst [vmem:[%s4602_s26 + $0x690] sm:$0xff] %v540_v18  ;;  %v548_v22 = vld [vmem:[%s4594_s25 + $0xd30] sm:$0xff]  ;;  %v550_v23 = vld [vmem:[%s4594_s25 + $0xd38] sm:$0xff] }
  0x83   : > { %543 = vst [vmem:[%s4602_s26 + $0x698] sm:$0xff] %v542_v19  ;;  %545 = vst [vmem:[%s4602_s26 + $0x6a0] sm:$0xff] %v544_v20  ;;  %v552_v24 = vld [vmem:[%s4594_s25 + $0xd80] sm:$0xff]  ;;  %v554_v25 = vld [vmem:[%s4594_s25 + $0xd88] sm:$0xff] }
  0x84   : > { %547 = vst [vmem:[%s4602_s26 + $0x6a8] sm:$0xff] %v546_v21  ;;  %549 = vst [vmem:[%s4602_s26 + $0x6b0] sm:$0xff] %v548_v22  ;;  %v556_v26 = vld [vmem:[%s4594_s25 + $0xd90] sm:$0xff]  ;;  %v558_v27 = vld [vmem:[%s4594_s25 + $0xd98] sm:$0xff] }
  0x85   : > { %551 = vst [vmem:[%s4602_s26 + $0x6b8] sm:$0xff] %v550_v23  ;;  %553 = vst [vmem:[%s4602_s26 + $0x6c0] sm:$0xff] %v552_v24  ;;  %v560_v28 = vld [vmem:[%s4594_s25 + $0xda0] sm:$0xff]  ;;  %v562_v29 = vld [vmem:[%s4594_s25 + $0xda8] sm:$0xff] }
  0x86   : > { %555 = vst [vmem:[%s4602_s26 + $0x6c8] sm:$0xff] %v554_v25  ;;  %557 = vst [vmem:[%s4602_s26 + $0x6d0] sm:$0xff] %v556_v26  ;;  %v564_v30 = vld [vmem:[%s4594_s25 + $0xdb0] sm:$0xff]  ;;  %v566_v31 = vld [vmem:[%s4594_s25 + $0xdb8] sm:$0xff] }
  0x87   : > { %559 = vst [vmem:[%s4602_s26 + $0x6d8] sm:$0xff] %v558_v27  ;;  %561 = vst [vmem:[%s4602_s26 + $0x6e0] sm:$0xff] %v560_v28  ;;  %v568_v32 = vld [vmem:[%s4594_s25 + $0xe00] sm:$0xff]  ;;  %v570_v33 = vld [vmem:[%s4594_s25 + $0xe08] sm:$0xff] }
  0x88   : > { %563 = vst [vmem:[%s4602_s26 + $0x6e8] sm:$0xff] %v562_v29  ;;  %565 = vst [vmem:[%s4602_s26 + $0x6f0] sm:$0xff] %v564_v30  ;;  %v572_v34 = vld [vmem:[%s4594_s25 + $0xe10] sm:$0xff]  ;;  %v574_v35 = vld [vmem:[%s4594_s25 + $0xe18] sm:$0xff] }
  0x89   : > { %567 = vst [vmem:[%s4602_s26 + $0x6f8] sm:$0xff] %v566_v31  ;;  %569 = vst [vmem:[%s4602_s26 + $0x700] sm:$0xff] %v568_v32  ;;  %v576_v36 = vld [vmem:[%s4594_s25 + $0xe20] sm:$0xff]  ;;  %v578_v37 = vld [vmem:[%s4594_s25 + $0xe28] sm:$0xff] }
  0x8a   : > { %571 = vst [vmem:[%s4602_s26 + $0x708] sm:$0xff] %v570_v33  ;;  %573 = vst [vmem:[%s4602_s26 + $0x710] sm:$0xff] %v572_v34  ;;  %v580_v38 = vld [vmem:[%s4594_s25 + $0xe30] sm:$0xff]  ;;  %v582_v39 = vld [vmem:[%s4594_s25 + $0xe38] sm:$0xff] }
  0x8b   : > { %575 = vst [vmem:[%s4602_s26 + $0x718] sm:$0xff] %v574_v35  ;;  %577 = vst [vmem:[%s4602_s26 + $0x720] sm:$0xff] %v576_v36  ;;  %v584_v40 = vld [vmem:[%s4594_s25 + $0xe80] sm:$0xff]  ;;  %v586_v41 = vld [vmem:[%s4594_s25 + $0xe88] sm:$0xff] }
  0x8c   : > { %579 = vst [vmem:[%s4602_s26 + $0x728] sm:$0xff] %v578_v37  ;;  %581 = vst [vmem:[%s4602_s26 + $0x730] sm:$0xff] %v580_v38  ;;  %v588_v42 = vld [vmem:[%s4594_s25 + $0xe90] sm:$0xff]  ;;  %v590_v43 = vld [vmem:[%s4594_s25 + $0xe98] sm:$0xff] }
  0x8d   : > { %583 = vst [vmem:[%s4602_s26 + $0x738] sm:$0xff] %v582_v39  ;;  %585 = vst [vmem:[%s4602_s26 + $0x740] sm:$0xff] %v584_v40  ;;  %v592_v44 = vld [vmem:[%s4594_s25 + $0xea0] sm:$0xff]  ;;  %v594_v45 = vld [vmem:[%s4594_s25 + $0xea8] sm:$0xff] }
  0x8e   : > { %587 = vst [vmem:[%s4602_s26 + $0x748] sm:$0xff] %v586_v41  ;;  %589 = vst [vmem:[%s4602_s26 + $0x750] sm:$0xff] %v588_v42  ;;  %v596_v46 = vld [vmem:[%s4594_s25 + $0xeb0] sm:$0xff]  ;;  %v598_v47 = vld [vmem:[%s4594_s25 + $0xeb8] sm:$0xff] }
  0x8f   : > { %591 = vst [vmem:[%s4602_s26 + $0x758] sm:$0xff] %v590_v43  ;;  %593 = vst [vmem:[%s4602_s26 + $0x760] sm:$0xff] %v592_v44  ;;  %v600_v48 = vld [vmem:[%s4594_s25 + $0xf00] sm:$0xff]  ;;  %v602_v49 = vld [vmem:[%s4594_s25 + $0xf08] sm:$0xff] }
  0x90   : > { %595 = vst [vmem:[%s4602_s26 + $0x768] sm:$0xff] %v594_v45  ;;  %597 = vst [vmem:[%s4602_s26 + $0x770] sm:$0xff] %v596_v46  ;;  %v604_v50 = vld [vmem:[%s4594_s25 + $0xf10] sm:$0xff]  ;;  %v606_v51 = vld [vmem:[%s4594_s25 + $0xf18] sm:$0xff] }
  0x91   : > { %599 = vst [vmem:[%s4602_s26 + $0x778] sm:$0xff] %v598_v47  ;;  %601 = vst [vmem:[%s4602_s26 + $0x780] sm:$0xff] %v600_v48  ;;  %v608_v52 = vld [vmem:[%s4594_s25 + $0xf20] sm:$0xff]  ;;  %v610_v53 = vld [vmem:[%s4594_s25 + $0xf28] sm:$0xff] }
  0x92   : > { %603 = vst [vmem:[%s4602_s26 + $0x788] sm:$0xff] %v602_v49  ;;  %605 = vst [vmem:[%s4602_s26 + $0x790] sm:$0xff] %v604_v50  ;;  %v612_v54 = vld [vmem:[%s4594_s25 + $0xf30] sm:$0xff]  ;;  %v614_v55 = vld [vmem:[%s4594_s25 + $0xf38] sm:$0xff] }
  0x93   : > { %607 = vst [vmem:[%s4602_s26 + $0x798] sm:$0xff] %v606_v51  ;;  %609 = vst [vmem:[%s4602_s26 + $0x7a0] sm:$0xff] %v608_v52  ;;  %v616_v56 = vld [vmem:[%s4594_s25 + $0xf80] sm:$0xff]  ;;  %v618_v57 = vld [vmem:[%s4594_s25 + $0xf88] sm:$0xff] }
  0x94   : > { %611 = vst [vmem:[%s4602_s26 + $0x7a8] sm:$0xff] %v610_v53  ;;  %613 = vst [vmem:[%s4602_s26 + $0x7b0] sm:$0xff] %v612_v54  ;;  %v620_v58 = vld [vmem:[%s4594_s25 + $0xf90] sm:$0xff]  ;;  %v622_v59 = vld [vmem:[%s4594_s25 + $0xf98] sm:$0xff] }
  0x95   : > { %615 = vst [vmem:[%s4602_s26 + $0x7b8] sm:$0xff] %v614_v55  ;;  %617 = vst [vmem:[%s4602_s26 + $0x7c0] sm:$0xff] %v616_v56  ;;  %v624_v60 = vld [vmem:[%s4594_s25 + $0xfa0] sm:$0xff]  ;;  %v626_v61 = vld [vmem:[%s4594_s25 + $0xfa8] sm:$0xff] }
  0x96   : > { %619 = vst [vmem:[%s4602_s26 + $0x7c8] sm:$0xff] %v618_v57  ;;  %621 = vst [vmem:[%s4602_s26 + $0x7d0] sm:$0xff] %v620_v58  ;;  %v628_v62 = vld [vmem:[%s4594_s25 + $0xfb0] sm:$0xff]  ;;  %v630_v63 = vld [vmem:[%s4594_s25 + $0xfb8] sm:$0xff] }
  0x97   : > { %623 = vst [vmem:[%s4602_s26 + $0x7d8] sm:$0xff] %v622_v59  ;;  %625 = vst [vmem:[%s4602_s26 + $0x7e0] sm:$0xff] %v624_v60  ;;  %v632_v0 = vld [vmem:[%s4594_s25 + $0x1000] sm:$0xff]  ;;  %v634_v1 = vld [vmem:[%s4594_s25 + $0x1008] sm:$0xff] }
  0x98   : > { %627 = vst [vmem:[%s4602_s26 + $0x7e8] sm:$0xff] %v626_v61  ;;  %629 = vst [vmem:[%s4602_s26 + $0x7f0] sm:$0xff] %v628_v62  ;;  %v636_v2 = vld [vmem:[%s4594_s25 + $0x1010] sm:$0xff]  ;;  %v638_v3 = vld [vmem:[%s4594_s25 + $0x1018] sm:$0xff] }
  0x99   : > { %631 = vst [vmem:[%s4602_s26 + $0x7f8] sm:$0xff] %v630_v63  ;;  %633 = vst [vmem:[%s4602_s26 + $0x800] sm:$0xff] %v632_v0  ;;  %v640_v4 = vld [vmem:[%s4594_s25 + $0x1020] sm:$0xff]  ;;  %v642_v5 = vld [vmem:[%s4594_s25 + $0x1028] sm:$0xff] }
  0x9a   : > { %635 = vst [vmem:[%s4602_s26 + $0x808] sm:$0xff] %v634_v1  ;;  %637 = vst [vmem:[%s4602_s26 + $0x810] sm:$0xff] %v636_v2  ;;  %v644_v6 = vld [vmem:[%s4594_s25 + $0x1030] sm:$0xff]  ;;  %v646_v7 = vld [vmem:[%s4594_s25 + $0x1038] sm:$0xff] }
  0x9b   : > { %639 = vst [vmem:[%s4602_s26 + $0x818] sm:$0xff] %v638_v3  ;;  %641 = vst [vmem:[%s4602_s26 + $0x820] sm:$0xff] %v640_v4  ;;  %v648_v8 = vld [vmem:[%s4594_s25 + $0x1080] sm:$0xff]  ;;  %v650_v9 = vld [vmem:[%s4594_s25 + $0x1088] sm:$0xff] }
  0x9c   : > { %643 = vst [vmem:[%s4602_s26 + $0x828] sm:$0xff] %v642_v5  ;;  %645 = vst [vmem:[%s4602_s26 + $0x830] sm:$0xff] %v644_v6  ;;  %v652_v10 = vld [vmem:[%s4594_s25 + $0x1090] sm:$0xff]  ;;  %v654_v11 = vld [vmem:[%s4594_s25 + $0x1098] sm:$0xff] }
  0x9d   : > { %647 = vst [vmem:[%s4602_s26 + $0x838] sm:$0xff] %v646_v7  ;;  %649 = vst [vmem:[%s4602_s26 + $0x840] sm:$0xff] %v648_v8  ;;  %v656_v12 = vld [vmem:[%s4594_s25 + $0x10a0] sm:$0xff]  ;;  %v658_v13 = vld [vmem:[%s4594_s25 + $0x10a8] sm:$0xff] }
  0x9e   : > { %651 = vst [vmem:[%s4602_s26 + $0x848] sm:$0xff] %v650_v9  ;;  %653 = vst [vmem:[%s4602_s26 + $0x850] sm:$0xff] %v652_v10  ;;  %v660_v14 = vld [vmem:[%s4594_s25 + $0x10b0] sm:$0xff]  ;;  %v662_v15 = vld [vmem:[%s4594_s25 + $0x10b8] sm:$0xff] }
  0x9f   : > { %655 = vst [vmem:[%s4602_s26 + $0x858] sm:$0xff] %v654_v11  ;;  %657 = vst [vmem:[%s4602_s26 + $0x860] sm:$0xff] %v656_v12  ;;  %v664_v16 = vld [vmem:[%s4594_s25 + $0x1100] sm:$0xff]  ;;  %v666_v17 = vld [vmem:[%s4594_s25 + $0x1108] sm:$0xff] }
  0xa0   : > { %659 = vst [vmem:[%s4602_s26 + $0x868] sm:$0xff] %v658_v13  ;;  %661 = vst [vmem:[%s4602_s26 + $0x870] sm:$0xff] %v660_v14  ;;  %v668_v18 = vld [vmem:[%s4594_s25 + $0x1110] sm:$0xff]  ;;  %v670_v19 = vld [vmem:[%s4594_s25 + $0x1118] sm:$0xff] }
  0xa1   : > { %663 = vst [vmem:[%s4602_s26 + $0x878] sm:$0xff] %v662_v15  ;;  %665 = vst [vmem:[%s4602_s26 + $0x880] sm:$0xff] %v664_v16  ;;  %v672_v20 = vld [vmem:[%s4594_s25 + $0x1120] sm:$0xff]  ;;  %v674_v21 = vld [vmem:[%s4594_s25 + $0x1128] sm:$0xff] }
  0xa2   : > { %667 = vst [vmem:[%s4602_s26 + $0x888] sm:$0xff] %v666_v17  ;;  %669 = vst [vmem:[%s4602_s26 + $0x890] sm:$0xff] %v668_v18  ;;  %v676_v22 = vld [vmem:[%s4594_s25 + $0x1130] sm:$0xff]  ;;  %v678_v23 = vld [vmem:[%s4594_s25 + $0x1138] sm:$0xff] }
  0xa3   : > { %671 = vst [vmem:[%s4602_s26 + $0x898] sm:$0xff] %v670_v19  ;;  %673 = vst [vmem:[%s4602_s26 + $0x8a0] sm:$0xff] %v672_v20  ;;  %v680_v24 = vld [vmem:[%s4594_s25 + $0x1180] sm:$0xff]  ;;  %v682_v25 = vld [vmem:[%s4594_s25 + $0x1188] sm:$0xff] }
  0xa4   : > { %675 = vst [vmem:[%s4602_s26 + $0x8a8] sm:$0xff] %v674_v21  ;;  %677 = vst [vmem:[%s4602_s26 + $0x8b0] sm:$0xff] %v676_v22  ;;  %v684_v26 = vld [vmem:[%s4594_s25 + $0x1190] sm:$0xff]  ;;  %v686_v27 = vld [vmem:[%s4594_s25 + $0x1198] sm:$0xff] }
  0xa5   : > { %679 = vst [vmem:[%s4602_s26 + $0x8b8] sm:$0xff] %v678_v23  ;;  %681 = vst [vmem:[%s4602_s26 + $0x8c0] sm:$0xff] %v680_v24  ;;  %v688_v28 = vld [vmem:[%s4594_s25 + $0x11a0] sm:$0xff]  ;;  %v690_v29 = vld [vmem:[%s4594_s25 + $0x11a8] sm:$0xff] }
  0xa6   : > { %683 = vst [vmem:[%s4602_s26 + $0x8c8] sm:$0xff] %v682_v25  ;;  %685 = vst [vmem:[%s4602_s26 + $0x8d0] sm:$0xff] %v684_v26  ;;  %v692_v30 = vld [vmem:[%s4594_s25 + $0x11b0] sm:$0xff]  ;;  %v694_v31 = vld [vmem:[%s4594_s25 + $0x11b8] sm:$0xff] }
  0xa7   : > { %687 = vst [vmem:[%s4602_s26 + $0x8d8] sm:$0xff] %v686_v27  ;;  %689 = vst [vmem:[%s4602_s26 + $0x8e0] sm:$0xff] %v688_v28  ;;  %v696_v32 = vld [vmem:[%s4594_s25 + $0x1200] sm:$0xff]  ;;  %v698_v33 = vld [vmem:[%s4594_s25 + $0x1208] sm:$0xff] }
  0xa8   : > { %691 = vst [vmem:[%s4602_s26 + $0x8e8] sm:$0xff] %v690_v29  ;;  %693 = vst [vmem:[%s4602_s26 + $0x8f0] sm:$0xff] %v692_v30  ;;  %v700_v34 = vld [vmem:[%s4594_s25 + $0x1210] sm:$0xff]  ;;  %v702_v35 = vld [vmem:[%s4594_s25 + $0x1218] sm:$0xff] }
  0xa9   : > { %695 = vst [vmem:[%s4602_s26 + $0x8f8] sm:$0xff] %v694_v31  ;;  %697 = vst [vmem:[%s4602_s26 + $0x900] sm:$0xff] %v696_v32  ;;  %v704_v36 = vld [vmem:[%s4594_s25 + $0x1220] sm:$0xff]  ;;  %v706_v37 = vld [vmem:[%s4594_s25 + $0x1228] sm:$0xff] }
  0xaa   : > { %699 = vst [vmem:[%s4602_s26 + $0x908] sm:$0xff] %v698_v33  ;;  %701 = vst [vmem:[%s4602_s26 + $0x910] sm:$0xff] %v700_v34  ;;  %v708_v38 = vld [vmem:[%s4594_s25 + $0x1230] sm:$0xff]  ;;  %v710_v39 = vld [vmem:[%s4594_s25 + $0x1238] sm:$0xff] }
  0xab   : > { %703 = vst [vmem:[%s4602_s26 + $0x918] sm:$0xff] %v702_v35  ;;  %705 = vst [vmem:[%s4602_s26 + $0x920] sm:$0xff] %v704_v36  ;;  %v712_v40 = vld [vmem:[%s4594_s25 + $0x1280] sm:$0xff]  ;;  %v714_v41 = vld [vmem:[%s4594_s25 + $0x1288] sm:$0xff] }
  0xac   : > { %707 = vst [vmem:[%s4602_s26 + $0x928] sm:$0xff] %v706_v37  ;;  %709 = vst [vmem:[%s4602_s26 + $0x930] sm:$0xff] %v708_v38  ;;  %v716_v42 = vld [vmem:[%s4594_s25 + $0x1290] sm:$0xff]  ;;  %v718_v43 = vld [vmem:[%s4594_s25 + $0x1298] sm:$0xff] }
  0xad   : > { %711 = vst [vmem:[%s4602_s26 + $0x938] sm:$0xff] %v710_v39  ;;  %713 = vst [vmem:[%s4602_s26 + $0x940] sm:$0xff] %v712_v40  ;;  %v720_v44 = vld [vmem:[%s4594_s25 + $0x12a0] sm:$0xff]  ;;  %v722_v45 = vld [vmem:[%s4594_s25 + $0x12a8] sm:$0xff] }
  0xae   : > { %715 = vst [vmem:[%s4602_s26 + $0x948] sm:$0xff] %v714_v41  ;;  %717 = vst [vmem:[%s4602_s26 + $0x950] sm:$0xff] %v716_v42  ;;  %v724_v46 = vld [vmem:[%s4594_s25 + $0x12b0] sm:$0xff]  ;;  %v726_v47 = vld [vmem:[%s4594_s25 + $0x12b8] sm:$0xff] }
  0xaf   : > { %719 = vst [vmem:[%s4602_s26 + $0x958] sm:$0xff] %v718_v43  ;;  %721 = vst [vmem:[%s4602_s26 + $0x960] sm:$0xff] %v720_v44  ;;  %v728_v48 = vld [vmem:[%s4594_s25 + $0x1300] sm:$0xff]  ;;  %v730_v49 = vld [vmem:[%s4594_s25 + $0x1308] sm:$0xff] }
  0xb0   : > { %723 = vst [vmem:[%s4602_s26 + $0x968] sm:$0xff] %v722_v45  ;;  %725 = vst [vmem:[%s4602_s26 + $0x970] sm:$0xff] %v724_v46  ;;  %v732_v50 = vld [vmem:[%s4594_s25 + $0x1310] sm:$0xff]  ;;  %v734_v51 = vld [vmem:[%s4594_s25 + $0x1318] sm:$0xff] }
  0xb1   : > { %727 = vst [vmem:[%s4602_s26 + $0x978] sm:$0xff] %v726_v47  ;;  %729 = vst [vmem:[%s4602_s26 + $0x980] sm:$0xff] %v728_v48  ;;  %v736_v52 = vld [vmem:[%s4594_s25 + $0x1320] sm:$0xff]  ;;  %v738_v53 = vld [vmem:[%s4594_s25 + $0x1328] sm:$0xff] }
  0xb2   : > { %731 = vst [vmem:[%s4602_s26 + $0x988] sm:$0xff] %v730_v49  ;;  %733 = vst [vmem:[%s4602_s26 + $0x990] sm:$0xff] %v732_v50  ;;  %v740_v54 = vld [vmem:[%s4594_s25 + $0x1330] sm:$0xff]  ;;  %v742_v55 = vld [vmem:[%s4594_s25 + $0x1338] sm:$0xff] }
  0xb3   : > { %735 = vst [vmem:[%s4602_s26 + $0x998] sm:$0xff] %v734_v51  ;;  %737 = vst [vmem:[%s4602_s26 + $0x9a0] sm:$0xff] %v736_v52  ;;  %v744_v56 = vld [vmem:[%s4594_s25 + $0x1380] sm:$0xff]  ;;  %v746_v57 = vld [vmem:[%s4594_s25 + $0x1388] sm:$0xff] }
  0xb4   : > { %739 = vst [vmem:[%s4602_s26 + $0x9a8] sm:$0xff] %v738_v53  ;;  %741 = vst [vmem:[%s4602_s26 + $0x9b0] sm:$0xff] %v740_v54  ;;  %v748_v58 = vld [vmem:[%s4594_s25 + $0x1390] sm:$0xff]  ;;  %v750_v59 = vld [vmem:[%s4594_s25 + $0x1398] sm:$0xff] }
  0xb5   : > { %743 = vst [vmem:[%s4602_s26 + $0x9b8] sm:$0xff] %v742_v55  ;;  %745 = vst [vmem:[%s4602_s26 + $0x9c0] sm:$0xff] %v744_v56  ;;  %v752_v60 = vld [vmem:[%s4594_s25 + $0x13a0] sm:$0xff]  ;;  %v754_v61 = vld [vmem:[%s4594_s25 + $0x13a8] sm:$0xff] }
  0xb6   : > { %747 = vst [vmem:[%s4602_s26 + $0x9c8] sm:$0xff] %v746_v57  ;;  %749 = vst [vmem:[%s4602_s26 + $0x9d0] sm:$0xff] %v748_v58  ;;  %v756_v62 = vld [vmem:[%s4594_s25 + $0x13b0] sm:$0xff]  ;;  %v758_v63 = vld [vmem:[%s4594_s25 + $0x13b8] sm:$0xff] }
  0xb7   : > { %751 = vst [vmem:[%s4602_s26 + $0x9d8] sm:$0xff] %v750_v59  ;;  %753 = vst [vmem:[%s4602_s26 + $0x9e0] sm:$0xff] %v752_v60  ;;  %v760_v0 = vld [vmem:[%s4594_s25 + $0x1400] sm:$0xff]  ;;  %v762_v1 = vld [vmem:[%s4594_s25 + $0x1408] sm:$0xff] }
  0xb8   : > { %755 = vst [vmem:[%s4602_s26 + $0x9e8] sm:$0xff] %v754_v61  ;;  %757 = vst [vmem:[%s4602_s26 + $0x9f0] sm:$0xff] %v756_v62  ;;  %v764_v2 = vld [vmem:[%s4594_s25 + $0x1410] sm:$0xff]  ;;  %v766_v3 = vld [vmem:[%s4594_s25 + $0x1418] sm:$0xff] }
  0xb9   : > { %759 = vst [vmem:[%s4602_s26 + $0x9f8] sm:$0xff] %v758_v63  ;;  %761 = vst [vmem:[%s4602_s26 + $0xa00] sm:$0xff] %v760_v0  ;;  %v768_v4 = vld [vmem:[%s4594_s25 + $0x1420] sm:$0xff]  ;;  %v770_v5 = vld [vmem:[%s4594_s25 + $0x1428] sm:$0xff] }
  0xba   : > { %763 = vst [vmem:[%s4602_s26 + $0xa08] sm:$0xff] %v762_v1  ;;  %765 = vst [vmem:[%s4602_s26 + $0xa10] sm:$0xff] %v764_v2  ;;  %v772_v6 = vld [vmem:[%s4594_s25 + $0x1430] sm:$0xff]  ;;  %v774_v7 = vld [vmem:[%s4594_s25 + $0x1438] sm:$0xff] }
  0xbb   : > { %767 = vst [vmem:[%s4602_s26 + $0xa18] sm:$0xff] %v766_v3  ;;  %769 = vst [vmem:[%s4602_s26 + $0xa20] sm:$0xff] %v768_v4  ;;  %v776_v8 = vld [vmem:[%s4594_s25 + $0x1480] sm:$0xff]  ;;  %v778_v9 = vld [vmem:[%s4594_s25 + $0x1488] sm:$0xff] }
  0xbc   : > { %771 = vst [vmem:[%s4602_s26 + $0xa28] sm:$0xff] %v770_v5  ;;  %773 = vst [vmem:[%s4602_s26 + $0xa30] sm:$0xff] %v772_v6  ;;  %v780_v10 = vld [vmem:[%s4594_s25 + $0x1490] sm:$0xff]  ;;  %v782_v11 = vld [vmem:[%s4594_s25 + $0x1498] sm:$0xff] }
  0xbd   : > { %775 = vst [vmem:[%s4602_s26 + $0xa38] sm:$0xff] %v774_v7  ;;  %777 = vst [vmem:[%s4602_s26 + $0xa40] sm:$0xff] %v776_v8  ;;  %v784_v12 = vld [vmem:[%s4594_s25 + $0x14a0] sm:$0xff]  ;;  %v786_v13 = vld [vmem:[%s4594_s25 + $0x14a8] sm:$0xff] }
  0xbe   : > { %779 = vst [vmem:[%s4602_s26 + $0xa48] sm:$0xff] %v778_v9  ;;  %781 = vst [vmem:[%s4602_s26 + $0xa50] sm:$0xff] %v780_v10  ;;  %v788_v14 = vld [vmem:[%s4594_s25 + $0x14b0] sm:$0xff]  ;;  %v790_v15 = vld [vmem:[%s4594_s25 + $0x14b8] sm:$0xff] }
  0xbf   : > { %783 = vst [vmem:[%s4602_s26 + $0xa58] sm:$0xff] %v782_v11  ;;  %785 = vst [vmem:[%s4602_s26 + $0xa60] sm:$0xff] %v784_v12  ;;  %v792_v16 = vld [vmem:[%s4594_s25 + $0x1500] sm:$0xff]  ;;  %v794_v17 = vld [vmem:[%s4594_s25 + $0x1508] sm:$0xff] }
  0xc0   : > { %787 = vst [vmem:[%s4602_s26 + $0xa68] sm:$0xff] %v786_v13  ;;  %789 = vst [vmem:[%s4602_s26 + $0xa70] sm:$0xff] %v788_v14  ;;  %v796_v18 = vld [vmem:[%s4594_s25 + $0x1510] sm:$0xff]  ;;  %v798_v19 = vld [vmem:[%s4594_s25 + $0x1518] sm:$0xff] }
  0xc1   : > { %791 = vst [vmem:[%s4602_s26 + $0xa78] sm:$0xff] %v790_v15  ;;  %793 = vst [vmem:[%s4602_s26 + $0xa80] sm:$0xff] %v792_v16  ;;  %v800_v20 = vld [vmem:[%s4594_s25 + $0x1520] sm:$0xff]  ;;  %v802_v21 = vld [vmem:[%s4594_s25 + $0x1528] sm:$0xff] }
  0xc2   : > { %795 = vst [vmem:[%s4602_s26 + $0xa88] sm:$0xff] %v794_v17  ;;  %797 = vst [vmem:[%s4602_s26 + $0xa90] sm:$0xff] %v796_v18  ;;  %v804_v22 = vld [vmem:[%s4594_s25 + $0x1530] sm:$0xff]  ;;  %v806_v23 = vld [vmem:[%s4594_s25 + $0x1538] sm:$0xff] }
  0xc3   : > { %799 = vst [vmem:[%s4602_s26 + $0xa98] sm:$0xff] %v798_v19  ;;  %801 = vst [vmem:[%s4602_s26 + $0xaa0] sm:$0xff] %v800_v20  ;;  %v808_v24 = vld [vmem:[%s4594_s25 + $0x1580] sm:$0xff]  ;;  %v810_v25 = vld [vmem:[%s4594_s25 + $0x1588] sm:$0xff] }
  0xc4   : > { %803 = vst [vmem:[%s4602_s26 + $0xaa8] sm:$0xff] %v802_v21  ;;  %805 = vst [vmem:[%s4602_s26 + $0xab0] sm:$0xff] %v804_v22  ;;  %v812_v26 = vld [vmem:[%s4594_s25 + $0x1590] sm:$0xff]  ;;  %v814_v27 = vld [vmem:[%s4594_s25 + $0x1598] sm:$0xff] }
  0xc5   : > { %807 = vst [vmem:[%s4602_s26 + $0xab8] sm:$0xff] %v806_v23  ;;  %809 = vst [vmem:[%s4602_s26 + $0xac0] sm:$0xff] %v808_v24  ;;  %v816_v28 = vld [vmem:[%s4594_s25 + $0x15a0] sm:$0xff]  ;;  %v818_v29 = vld [vmem:[%s4594_s25 + $0x15a8] sm:$0xff] }
  0xc6   : > { %811 = vst [vmem:[%s4602_s26 + $0xac8] sm:$0xff] %v810_v25  ;;  %813 = vst [vmem:[%s4602_s26 + $0xad0] sm:$0xff] %v812_v26  ;;  %v820_v30 = vld [vmem:[%s4594_s25 + $0x15b0] sm:$0xff]  ;;  %v822_v31 = vld [vmem:[%s4594_s25 + $0x15b8] sm:$0xff] }
  0xc7   : > { %815 = vst [vmem:[%s4602_s26 + $0xad8] sm:$0xff] %v814_v27  ;;  %817 = vst [vmem:[%s4602_s26 + $0xae0] sm:$0xff] %v816_v28  ;;  %v824_v32 = vld [vmem:[%s4594_s25 + $0x1600] sm:$0xff]  ;;  %v826_v33 = vld [vmem:[%s4594_s25 + $0x1608] sm:$0xff] }
  0xc8   : > { %819 = vst [vmem:[%s4602_s26 + $0xae8] sm:$0xff] %v818_v29  ;;  %821 = vst [vmem:[%s4602_s26 + $0xaf0] sm:$0xff] %v820_v30  ;;  %v828_v34 = vld [vmem:[%s4594_s25 + $0x1610] sm:$0xff]  ;;  %v830_v35 = vld [vmem:[%s4594_s25 + $0x1618] sm:$0xff] }
  0xc9   : > { %823 = vst [vmem:[%s4602_s26 + $0xaf8] sm:$0xff] %v822_v31  ;;  %825 = vst [vmem:[%s4602_s26 + $0xb00] sm:$0xff] %v824_v32  ;;  %v832_v36 = vld [vmem:[%s4594_s25 + $0x1620] sm:$0xff]  ;;  %v834_v37 = vld [vmem:[%s4594_s25 + $0x1628] sm:$0xff] }
  0xca   : > { %827 = vst [vmem:[%s4602_s26 + $0xb08] sm:$0xff] %v826_v33  ;;  %829 = vst [vmem:[%s4602_s26 + $0xb10] sm:$0xff] %v828_v34  ;;  %v836_v38 = vld [vmem:[%s4594_s25 + $0x1630] sm:$0xff]  ;;  %v838_v39 = vld [vmem:[%s4594_s25 + $0x1638] sm:$0xff] }
  0xcb   : > { %831 = vst [vmem:[%s4602_s26 + $0xb18] sm:$0xff] %v830_v35  ;;  %833 = vst [vmem:[%s4602_s26 + $0xb20] sm:$0xff] %v832_v36  ;;  %v840_v40 = vld [vmem:[%s4594_s25 + $0x1680] sm:$0xff]  ;;  %v842_v41 = vld [vmem:[%s4594_s25 + $0x1688] sm:$0xff] }
  0xcc   : > { %835 = vst [vmem:[%s4602_s26 + $0xb28] sm:$0xff] %v834_v37  ;;  %837 = vst [vmem:[%s4602_s26 + $0xb30] sm:$0xff] %v836_v38  ;;  %v844_v42 = vld [vmem:[%s4594_s25 + $0x1690] sm:$0xff]  ;;  %v846_v43 = vld [vmem:[%s4594_s25 + $0x1698] sm:$0xff] }
  0xcd   : > { %839 = vst [vmem:[%s4602_s26 + $0xb38] sm:$0xff] %v838_v39  ;;  %841 = vst [vmem:[%s4602_s26 + $0xb40] sm:$0xff] %v840_v40  ;;  %v848_v44 = vld [vmem:[%s4594_s25 + $0x16a0] sm:$0xff]  ;;  %v850_v45 = vld [vmem:[%s4594_s25 + $0x16a8] sm:$0xff] }
  0xce   : > { %843 = vst [vmem:[%s4602_s26 + $0xb48] sm:$0xff] %v842_v41  ;;  %845 = vst [vmem:[%s4602_s26 + $0xb50] sm:$0xff] %v844_v42  ;;  %v852_v46 = vld [vmem:[%s4594_s25 + $0x16b0] sm:$0xff]  ;;  %v854_v47 = vld [vmem:[%s4594_s25 + $0x16b8] sm:$0xff] }
  0xcf   : > { %847 = vst [vmem:[%s4602_s26 + $0xb58] sm:$0xff] %v846_v43  ;;  %849 = vst [vmem:[%s4602_s26 + $0xb60] sm:$0xff] %v848_v44  ;;  %v856_v48 = vld [vmem:[%s4594_s25 + $0x1700] sm:$0xff]  ;;  %v858_v49 = vld [vmem:[%s4594_s25 + $0x1708] sm:$0xff] }
  0xd0   : > { %851 = vst [vmem:[%s4602_s26 + $0xb68] sm:$0xff] %v850_v45  ;;  %853 = vst [vmem:[%s4602_s26 + $0xb70] sm:$0xff] %v852_v46  ;;  %v860_v50 = vld [vmem:[%s4594_s25 + $0x1710] sm:$0xff]  ;;  %v862_v51 = vld [vmem:[%s4594_s25 + $0x1718] sm:$0xff] }
  0xd1   : > { %855 = vst [vmem:[%s4602_s26 + $0xb78] sm:$0xff] %v854_v47  ;;  %857 = vst [vmem:[%s4602_s26 + $0xb80] sm:$0xff] %v856_v48  ;;  %v864_v52 = vld [vmem:[%s4594_s25 + $0x1720] sm:$0xff]  ;;  %v866_v53 = vld [vmem:[%s4594_s25 + $0x1728] sm:$0xff] }
  0xd2   : > { %859 = vst [vmem:[%s4602_s26 + $0xb88] sm:$0xff] %v858_v49  ;;  %861 = vst [vmem:[%s4602_s26 + $0xb90] sm:$0xff] %v860_v50  ;;  %v868_v54 = vld [vmem:[%s4594_s25 + $0x1730] sm:$0xff]  ;;  %v870_v55 = vld [vmem:[%s4594_s25 + $0x1738] sm:$0xff] }
  0xd3   : > { %863 = vst [vmem:[%s4602_s26 + $0xb98] sm:$0xff] %v862_v51  ;;  %865 = vst [vmem:[%s4602_s26 + $0xba0] sm:$0xff] %v864_v52  ;;  %v872_v56 = vld [vmem:[%s4594_s25 + $0x1780] sm:$0xff]  ;;  %v874_v57 = vld [vmem:[%s4594_s25 + $0x1788] sm:$0xff] }
  0xd4   : > { %867 = vst [vmem:[%s4602_s26 + $0xba8] sm:$0xff] %v866_v53  ;;  %869 = vst [vmem:[%s4602_s26 + $0xbb0] sm:$0xff] %v868_v54  ;;  %v876_v58 = vld [vmem:[%s4594_s25 + $0x1790] sm:$0xff]  ;;  %v878_v59 = vld [vmem:[%s4594_s25 + $0x1798] sm:$0xff] }
  0xd5   : > { %871 = vst [vmem:[%s4602_s26 + $0xbb8] sm:$0xff] %v870_v55  ;;  %873 = vst [vmem:[%s4602_s26 + $0xbc0] sm:$0xff] %v872_v56  ;;  %v880_v60 = vld [vmem:[%s4594_s25 + $0x17a0] sm:$0xff]  ;;  %v882_v61 = vld [vmem:[%s4594_s25 + $0x17a8] sm:$0xff] }
  0xd6   : > { %875 = vst [vmem:[%s4602_s26 + $0xbc8] sm:$0xff] %v874_v57  ;;  %877 = vst [vmem:[%s4602_s26 + $0xbd0] sm:$0xff] %v876_v58  ;;  %v884_v62 = vld [vmem:[%s4594_s25 + $0x17b0] sm:$0xff]  ;;  %v886_v63 = vld [vmem:[%s4594_s25 + $0x17b8] sm:$0xff] }
  0xd7   : > { %879 = vst [vmem:[%s4602_s26 + $0xbd8] sm:$0xff] %v878_v59  ;;  %881 = vst [vmem:[%s4602_s26 + $0xbe0] sm:$0xff] %v880_v60  ;;  %v888_v0 = vld [vmem:[%s4594_s25 + $0x1800] sm:$0xff]  ;;  %v890_v1 = vld [vmem:[%s4594_s25 + $0x1808] sm:$0xff] }
  0xd8   : > { %883 = vst [vmem:[%s4602_s26 + $0xbe8] sm:$0xff] %v882_v61  ;;  %885 = vst [vmem:[%s4602_s26 + $0xbf0] sm:$0xff] %v884_v62  ;;  %v892_v2 = vld [vmem:[%s4594_s25 + $0x1810] sm:$0xff]  ;;  %v894_v3 = vld [vmem:[%s4594_s25 + $0x1818] sm:$0xff] }
  0xd9   : > { %887 = vst [vmem:[%s4602_s26 + $0xbf8] sm:$0xff] %v886_v63  ;;  %889 = vst [vmem:[%s4602_s26 + $0xc00] sm:$0xff] %v888_v0  ;;  %v896_v4 = vld [vmem:[%s4594_s25 + $0x1820] sm:$0xff]  ;;  %v898_v5 = vld [vmem:[%s4594_s25 + $0x1828] sm:$0xff] }
  0xda   : > { %891 = vst [vmem:[%s4602_s26 + $0xc08] sm:$0xff] %v890_v1  ;;  %893 = vst [vmem:[%s4602_s26 + $0xc10] sm:$0xff] %v892_v2  ;;  %v900_v6 = vld [vmem:[%s4594_s25 + $0x1830] sm:$0xff]  ;;  %v902_v7 = vld [vmem:[%s4594_s25 + $0x1838] sm:$0xff] }
  0xdb   : > { %895 = vst [vmem:[%s4602_s26 + $0xc18] sm:$0xff] %v894_v3  ;;  %897 = vst [vmem:[%s4602_s26 + $0xc20] sm:$0xff] %v896_v4  ;;  %v904_v8 = vld [vmem:[%s4594_s25 + $0x1880] sm:$0xff]  ;;  %v906_v9 = vld [vmem:[%s4594_s25 + $0x1888] sm:$0xff] }
  0xdc   : > { %899 = vst [vmem:[%s4602_s26 + $0xc28] sm:$0xff] %v898_v5  ;;  %901 = vst [vmem:[%s4602_s26 + $0xc30] sm:$0xff] %v900_v6  ;;  %v908_v10 = vld [vmem:[%s4594_s25 + $0x1890] sm:$0xff]  ;;  %v910_v11 = vld [vmem:[%s4594_s25 + $0x1898] sm:$0xff] }
  0xdd   : > { %903 = vst [vmem:[%s4602_s26 + $0xc38] sm:$0xff] %v902_v7  ;;  %905 = vst [vmem:[%s4602_s26 + $0xc40] sm:$0xff] %v904_v8  ;;  %v912_v12 = vld [vmem:[%s4594_s25 + $0x18a0] sm:$0xff]  ;;  %v914_v13 = vld [vmem:[%s4594_s25 + $0x18a8] sm:$0xff] }
  0xde   : > { %907 = vst [vmem:[%s4602_s26 + $0xc48] sm:$0xff] %v906_v9  ;;  %909 = vst [vmem:[%s4602_s26 + $0xc50] sm:$0xff] %v908_v10  ;;  %v916_v14 = vld [vmem:[%s4594_s25 + $0x18b0] sm:$0xff]  ;;  %v918_v15 = vld [vmem:[%s4594_s25 + $0x18b8] sm:$0xff] }
  0xdf   : > { %911 = vst [vmem:[%s4602_s26 + $0xc58] sm:$0xff] %v910_v11  ;;  %913 = vst [vmem:[%s4602_s26 + $0xc60] sm:$0xff] %v912_v12  ;;  %v920_v16 = vld [vmem:[%s4594_s25 + $0x1900] sm:$0xff]  ;;  %v922_v17 = vld [vmem:[%s4594_s25 + $0x1908] sm:$0xff] }
  0xe0   : > { %915 = vst [vmem:[%s4602_s26 + $0xc68] sm:$0xff] %v914_v13  ;;  %917 = vst [vmem:[%s4602_s26 + $0xc70] sm:$0xff] %v916_v14  ;;  %v924_v18 = vld [vmem:[%s4594_s25 + $0x1910] sm:$0xff]  ;;  %v926_v19 = vld [vmem:[%s4594_s25 + $0x1918] sm:$0xff] }
  0xe1   : > { %919 = vst [vmem:[%s4602_s26 + $0xc78] sm:$0xff] %v918_v15  ;;  %921 = vst [vmem:[%s4602_s26 + $0xc80] sm:$0xff] %v920_v16  ;;  %v928_v20 = vld [vmem:[%s4594_s25 + $0x1920] sm:$0xff]  ;;  %v930_v21 = vld [vmem:[%s4594_s25 + $0x1928] sm:$0xff] }
  0xe2   : > { %923 = vst [vmem:[%s4602_s26 + $0xc88] sm:$0xff] %v922_v17  ;;  %925 = vst [vmem:[%s4602_s26 + $0xc90] sm:$0xff] %v924_v18  ;;  %v932_v22 = vld [vmem:[%s4594_s25 + $0x1930] sm:$0xff]  ;;  %v934_v23 = vld [vmem:[%s4594_s25 + $0x1938] sm:$0xff] }
  0xe3   : > { %927 = vst [vmem:[%s4602_s26 + $0xc98] sm:$0xff] %v926_v19  ;;  %929 = vst [vmem:[%s4602_s26 + $0xca0] sm:$0xff] %v928_v20  ;;  %v936_v24 = vld [vmem:[%s4594_s25 + $0x1980] sm:$0xff]  ;;  %v938_v25 = vld [vmem:[%s4594_s25 + $0x1988] sm:$0xff] }
  0xe4   : > { %931 = vst [vmem:[%s4602_s26 + $0xca8] sm:$0xff] %v930_v21  ;;  %933 = vst [vmem:[%s4602_s26 + $0xcb0] sm:$0xff] %v932_v22  ;;  %v940_v26 = vld [vmem:[%s4594_s25 + $0x1990] sm:$0xff]  ;;  %v942_v27 = vld [vmem:[%s4594_s25 + $0x1998] sm:$0xff] }
  0xe5   : > { %935 = vst [vmem:[%s4602_s26 + $0xcb8] sm:$0xff] %v934_v23  ;;  %937 = vst [vmem:[%s4602_s26 + $0xcc0] sm:$0xff] %v936_v24  ;;  %v944_v28 = vld [vmem:[%s4594_s25 + $0x19a0] sm:$0xff]  ;;  %v946_v29 = vld [vmem:[%s4594_s25 + $0x19a8] sm:$0xff] }
  0xe6   : > { %939 = vst [vmem:[%s4602_s26 + $0xcc8] sm:$0xff] %v938_v25  ;;  %941 = vst [vmem:[%s4602_s26 + $0xcd0] sm:$0xff] %v940_v26  ;;  %v948_v30 = vld [vmem:[%s4594_s25 + $0x19b0] sm:$0xff]  ;;  %v950_v31 = vld [vmem:[%s4594_s25 + $0x19b8] sm:$0xff] }
  0xe7   : > { %943 = vst [vmem:[%s4602_s26 + $0xcd8] sm:$0xff] %v942_v27  ;;  %945 = vst [vmem:[%s4602_s26 + $0xce0] sm:$0xff] %v944_v28  ;;  %v952_v32 = vld [vmem:[%s4594_s25 + $0x1a00] sm:$0xff]  ;;  %v954_v33 = vld [vmem:[%s4594_s25 + $0x1a08] sm:$0xff] }
  0xe8   : > { %947 = vst [vmem:[%s4602_s26 + $0xce8] sm:$0xff] %v946_v29  ;;  %949 = vst [vmem:[%s4602_s26 + $0xcf0] sm:$0xff] %v948_v30  ;;  %v956_v34 = vld [vmem:[%s4594_s25 + $0x1a10] sm:$0xff]  ;;  %v958_v35 = vld [vmem:[%s4594_s25 + $0x1a18] sm:$0xff] }
  0xe9   : > { %951 = vst [vmem:[%s4602_s26 + $0xcf8] sm:$0xff] %v950_v31  ;;  %953 = vst [vmem:[%s4602_s26 + $0xd00] sm:$0xff] %v952_v32  ;;  %v960_v36 = vld [vmem:[%s4594_s25 + $0x1a20] sm:$0xff]  ;;  %v962_v37 = vld [vmem:[%s4594_s25 + $0x1a28] sm:$0xff] }
  0xea   : > { %955 = vst [vmem:[%s4602_s26 + $0xd08] sm:$0xff] %v954_v33  ;;  %957 = vst [vmem:[%s4602_s26 + $0xd10] sm:$0xff] %v956_v34  ;;  %v964_v38 = vld [vmem:[%s4594_s25 + $0x1a30] sm:$0xff]  ;;  %v966_v39 = vld [vmem:[%s4594_s25 + $0x1a38] sm:$0xff] }
  0xeb   : > { %959 = vst [vmem:[%s4602_s26 + $0xd18] sm:$0xff] %v958_v35  ;;  %961 = vst [vmem:[%s4602_s26 + $0xd20] sm:$0xff] %v960_v36  ;;  %v968_v40 = vld [vmem:[%s4594_s25 + $0x1a80] sm:$0xff]  ;;  %v970_v41 = vld [vmem:[%s4594_s25 + $0x1a88] sm:$0xff] }
  0xec   : > { %963 = vst [vmem:[%s4602_s26 + $0xd28] sm:$0xff] %v962_v37  ;;  %965 = vst [vmem:[%s4602_s26 + $0xd30] sm:$0xff] %v964_v38  ;;  %v972_v42 = vld [vmem:[%s4594_s25 + $0x1a90] sm:$0xff]  ;;  %v974_v43 = vld [vmem:[%s4594_s25 + $0x1a98] sm:$0xff] }
  0xed   : > { %967 = vst [vmem:[%s4602_s26 + $0xd38] sm:$0xff] %v966_v39  ;;  %969 = vst [vmem:[%s4602_s26 + $0xd40] sm:$0xff] %v968_v40  ;;  %v976_v44 = vld [vmem:[%s4594_s25 + $0x1aa0] sm:$0xff]  ;;  %v978_v45 = vld [vmem:[%s4594_s25 + $0x1aa8] sm:$0xff] }
  0xee   : > { %971 = vst [vmem:[%s4602_s26 + $0xd48] sm:$0xff] %v970_v41  ;;  %973 = vst [vmem:[%s4602_s26 + $0xd50] sm:$0xff] %v972_v42  ;;  %v980_v46 = vld [vmem:[%s4594_s25 + $0x1ab0] sm:$0xff]  ;;  %v982_v47 = vld [vmem:[%s4594_s25 + $0x1ab8] sm:$0xff] }
  0xef   : > { %975 = vst [vmem:[%s4602_s26 + $0xd58] sm:$0xff] %v974_v43  ;;  %977 = vst [vmem:[%s4602_s26 + $0xd60] sm:$0xff] %v976_v44  ;;  %v984_v48 = vld [vmem:[%s4594_s25 + $0x1b00] sm:$0xff]  ;;  %v986_v49 = vld [vmem:[%s4594_s25 + $0x1b08] sm:$0xff] }
  0xf0   : > { %979 = vst [vmem:[%s4602_s26 + $0xd68] sm:$0xff] %v978_v45  ;;  %981 = vst [vmem:[%s4602_s26 + $0xd70] sm:$0xff] %v980_v46  ;;  %v988_v50 = vld [vmem:[%s4594_s25 + $0x1b10] sm:$0xff]  ;;  %v990_v51 = vld [vmem:[%s4594_s25 + $0x1b18] sm:$0xff] }
  0xf1   : > { %983 = vst [vmem:[%s4602_s26 + $0xd78] sm:$0xff] %v982_v47  ;;  %985 = vst [vmem:[%s4602_s26 + $0xd80] sm:$0xff] %v984_v48  ;;  %v992_v52 = vld [vmem:[%s4594_s25 + $0x1b20] sm:$0xff]  ;;  %v994_v53 = vld [vmem:[%s4594_s25 + $0x1b28] sm:$0xff] }
  0xf2   : > { %987 = vst [vmem:[%s4602_s26 + $0xd88] sm:$0xff] %v986_v49  ;;  %989 = vst [vmem:[%s4602_s26 + $0xd90] sm:$0xff] %v988_v50  ;;  %v996_v54 = vld [vmem:[%s4594_s25 + $0x1b30] sm:$0xff]  ;;  %v998_v55 = vld [vmem:[%s4594_s25 + $0x1b38] sm:$0xff] }
  0xf3   : > { %991 = vst [vmem:[%s4602_s26 + $0xd98] sm:$0xff] %v990_v51  ;;  %993 = vst [vmem:[%s4602_s26 + $0xda0] sm:$0xff] %v992_v52  ;;  %v1000_v56 = vld [vmem:[%s4594_s25 + $0x1b80] sm:$0xff]  ;;  %v1002_v57 = vld [vmem:[%s4594_s25 + $0x1b88] sm:$0xff] }
  0xf4   : > { %995 = vst [vmem:[%s4602_s26 + $0xda8] sm:$0xff] %v994_v53  ;;  %997 = vst [vmem:[%s4602_s26 + $0xdb0] sm:$0xff] %v996_v54  ;;  %v1004_v58 = vld [vmem:[%s4594_s25 + $0x1b90] sm:$0xff]  ;;  %v1006_v59 = vld [vmem:[%s4594_s25 + $0x1b98] sm:$0xff] }
  0xf5   : > { %999 = vst [vmem:[%s4602_s26 + $0xdb8] sm:$0xff] %v998_v55  ;;  %1001 = vst [vmem:[%s4602_s26 + $0xdc0] sm:$0xff] %v1000_v56  ;;  %v1008_v60 = vld [vmem:[%s4594_s25 + $0x1ba0] sm:$0xff]  ;;  %v1010_v61 = vld [vmem:[%s4594_s25 + $0x1ba8] sm:$0xff] }
  0xf6   : > { %1003 = vst [vmem:[%s4602_s26 + $0xdc8] sm:$0xff] %v1002_v57  ;;  %1005 = vst [vmem:[%s4602_s26 + $0xdd0] sm:$0xff] %v1004_v58  ;;  %v1012_v62 = vld [vmem:[%s4594_s25 + $0x1bb0] sm:$0xff]  ;;  %v1014_v63 = vld [vmem:[%s4594_s25 + $0x1bb8] sm:$0xff] }
  0xf7   : > { %1007 = vst [vmem:[%s4602_s26 + $0xdd8] sm:$0xff] %v1006_v59  ;;  %1009 = vst [vmem:[%s4602_s26 + $0xde0] sm:$0xff] %v1008_v60  ;;  %v1016_v0 = vld [vmem:[%s4594_s25 + $0x1c00] sm:$0xff]  ;;  %v1018_v1 = vld [vmem:[%s4594_s25 + $0x1c08] sm:$0xff] }
  0xf8   : > { %1011 = vst [vmem:[%s4602_s26 + $0xde8] sm:$0xff] %v1010_v61  ;;  %1013 = vst [vmem:[%s4602_s26 + $0xdf0] sm:$0xff] %v1012_v62  ;;  %v1020_v2 = vld [vmem:[%s4594_s25 + $0x1c10] sm:$0xff]  ;;  %v1022_v3 = vld [vmem:[%s4594_s25 + $0x1c18] sm:$0xff] }
  0xf9   : > { %1015 = vst [vmem:[%s4602_s26 + $0xdf8] sm:$0xff] %v1014_v63  ;;  %1017 = vst [vmem:[%s4602_s26 + $0xe00] sm:$0xff] %v1016_v0  ;;  %v1024_v4 = vld [vmem:[%s4594_s25 + $0x1c20] sm:$0xff]  ;;  %v1026_v5 = vld [vmem:[%s4594_s25 + $0x1c28] sm:$0xff] }
  0xfa   : > { %1019 = vst [vmem:[%s4602_s26 + $0xe08] sm:$0xff] %v1018_v1  ;;  %1021 = vst [vmem:[%s4602_s26 + $0xe10] sm:$0xff] %v1020_v2  ;;  %v1028_v6 = vld [vmem:[%s4594_s25 + $0x1c30] sm:$0xff]  ;;  %v1030_v7 = vld [vmem:[%s4594_s25 + $0x1c38] sm:$0xff] }
  0xfb   : > { %1023 = vst [vmem:[%s4602_s26 + $0xe18] sm:$0xff] %v1022_v3  ;;  %1025 = vst [vmem:[%s4602_s26 + $0xe20] sm:$0xff] %v1024_v4  ;;  %v1032_v8 = vld [vmem:[%s4594_s25 + $0x1c80] sm:$0xff]  ;;  %v1034_v9 = vld [vmem:[%s4594_s25 + $0x1c88] sm:$0xff] }
  0xfc   : > { %1027 = vst [vmem:[%s4602_s26 + $0xe28] sm:$0xff] %v1026_v5  ;;  %1029 = vst [vmem:[%s4602_s26 + $0xe30] sm:$0xff] %v1028_v6  ;;  %v1036_v10 = vld [vmem:[%s4594_s25 + $0x1c90] sm:$0xff]  ;;  %v1038_v11 = vld [vmem:[%s4594_s25 + $0x1c98] sm:$0xff] }
  0xfd   : > { %1031 = vst [vmem:[%s4602_s26 + $0xe38] sm:$0xff] %v1030_v7  ;;  %1033 = vst [vmem:[%s4602_s26 + $0xe40] sm:$0xff] %v1032_v8  ;;  %v1040_v12 = vld [vmem:[%s4594_s25 + $0x1ca0] sm:$0xff]  ;;  %v1042_v13 = vld [vmem:[%s4594_s25 + $0x1ca8] sm:$0xff] }
  0xfe   : > { %1035 = vst [vmem:[%s4602_s26 + $0xe48] sm:$0xff] %v1034_v9  ;;  %1037 = vst [vmem:[%s4602_s26 + $0xe50] sm:$0xff] %v1036_v10  ;;  %v1044_v14 = vld [vmem:[%s4594_s25 + $0x1cb0] sm:$0xff]  ;;  %v1046_v15 = vld [vmem:[%s4594_s25 + $0x1cb8] sm:$0xff] }
  0xff   : > { %1039 = vst [vmem:[%s4602_s26 + $0xe58] sm:$0xff] %v1038_v11  ;;  %1041 = vst [vmem:[%s4602_s26 + $0xe60] sm:$0xff] %v1040_v12  ;;  %v1048_v16 = vld [vmem:[%s4594_s25 + $0x1d00] sm:$0xff]  ;;  %v1050_v17 = vld [vmem:[%s4594_s25 + $0x1d08] sm:$0xff] }
 0x100   : > { %1043 = vst [vmem:[%s4602_s26 + $0xe68] sm:$0xff] %v1042_v13  ;;  %1045 = vst [vmem:[%s4602_s26 + $0xe70] sm:$0xff] %v1044_v14  ;;  %v1052_v18 = vld [vmem:[%s4594_s25 + $0x1d10] sm:$0xff]  ;;  %v1054_v19 = vld [vmem:[%s4594_s25 + $0x1d18] sm:$0xff] }
 0x101   : > { %1047 = vst [vmem:[%s4602_s26 + $0xe78] sm:$0xff] %v1046_v15  ;;  %1049 = vst [vmem:[%s4602_s26 + $0xe80] sm:$0xff] %v1048_v16  ;;  %v1056_v20 = vld [vmem:[%s4594_s25 + $0x1d20] sm:$0xff]  ;;  %v1058_v21 = vld [vmem:[%s4594_s25 + $0x1d28] sm:$0xff] }
 0x102   : > { %1051 = vst [vmem:[%s4602_s26 + $0xe88] sm:$0xff] %v1050_v17  ;;  %1053 = vst [vmem:[%s4602_s26 + $0xe90] sm:$0xff] %v1052_v18  ;;  %v1060_v22 = vld [vmem:[%s4594_s25 + $0x1d30] sm:$0xff]  ;;  %v1062_v23 = vld [vmem:[%s4594_s25 + $0x1d38] sm:$0xff] }
 0x103   : > { %1055 = vst [vmem:[%s4602_s26 + $0xe98] sm:$0xff] %v1054_v19  ;;  %1057 = vst [vmem:[%s4602_s26 + $0xea0] sm:$0xff] %v1056_v20  ;;  %v1064_v24 = vld [vmem:[%s4594_s25 + $0x1d80] sm:$0xff]  ;;  %v1066_v25 = vld [vmem:[%s4594_s25 + $0x1d88] sm:$0xff] }
 0x104   : > { %1059 = vst [vmem:[%s4602_s26 + $0xea8] sm:$0xff] %v1058_v21  ;;  %1061 = vst [vmem:[%s4602_s26 + $0xeb0] sm:$0xff] %v1060_v22  ;;  %v1068_v26 = vld [vmem:[%s4594_s25 + $0x1d90] sm:$0xff]  ;;  %v1070_v27 = vld [vmem:[%s4594_s25 + $0x1d98] sm:$0xff] }
 0x105   : > { %1063 = vst [vmem:[%s4602_s26 + $0xeb8] sm:$0xff] %v1062_v23  ;;  %1065 = vst [vmem:[%s4602_s26 + $0xec0] sm:$0xff] %v1064_v24  ;;  %v1072_v28 = vld [vmem:[%s4594_s25 + $0x1da0] sm:$0xff]  ;;  %v1074_v29 = vld [vmem:[%s4594_s25 + $0x1da8] sm:$0xff] }
 0x106   : > { %1067 = vst [vmem:[%s4602_s26 + $0xec8] sm:$0xff] %v1066_v25  ;;  %1069 = vst [vmem:[%s4602_s26 + $0xed0] sm:$0xff] %v1068_v26  ;;  %v1076_v30 = vld [vmem:[%s4594_s25 + $0x1db0] sm:$0xff]  ;;  %v1078_v31 = vld [vmem:[%s4594_s25 + $0x1db8] sm:$0xff] }
 0x107   : > { %1071 = vst [vmem:[%s4602_s26 + $0xed8] sm:$0xff] %v1070_v27  ;;  %1073 = vst [vmem:[%s4602_s26 + $0xee0] sm:$0xff] %v1072_v28  ;;  %v1080_v32 = vld [vmem:[%s4594_s25 + $0x1e00] sm:$0xff]  ;;  %v1082_v33 = vld [vmem:[%s4594_s25 + $0x1e08] sm:$0xff] }
 0x108   : > { %1075 = vst [vmem:[%s4602_s26 + $0xee8] sm:$0xff] %v1074_v29  ;;  %1077 = vst [vmem:[%s4602_s26 + $0xef0] sm:$0xff] %v1076_v30  ;;  %v1084_v34 = vld [vmem:[%s4594_s25 + $0x1e10] sm:$0xff]  ;;  %v1086_v35 = vld [vmem:[%s4594_s25 + $0x1e18] sm:$0xff] }
 0x109   : > { %1079 = vst [vmem:[%s4602_s26 + $0xef8] sm:$0xff] %v1078_v31  ;;  %1081 = vst [vmem:[%s4602_s26 + $0xf00] sm:$0xff] %v1080_v32  ;;  %v1088_v36 = vld [vmem:[%s4594_s25 + $0x1e20] sm:$0xff]  ;;  %v1090_v37 = vld [vmem:[%s4594_s25 + $0x1e28] sm:$0xff] }
 0x10a   : > { %1083 = vst [vmem:[%s4602_s26 + $0xf08] sm:$0xff] %v1082_v33  ;;  %1085 = vst [vmem:[%s4602_s26 + $0xf10] sm:$0xff] %v1084_v34  ;;  %v1092_v38 = vld [vmem:[%s4594_s25 + $0x1e30] sm:$0xff]  ;;  %v1094_v39 = vld [vmem:[%s4594_s25 + $0x1e38] sm:$0xff] }
 0x10b   : > { %1087 = vst [vmem:[%s4602_s26 + $0xf18] sm:$0xff] %v1086_v35  ;;  %1089 = vst [vmem:[%s4602_s26 + $0xf20] sm:$0xff] %v1088_v36  ;;  %v1096_v40 = vld [vmem:[%s4594_s25 + $0x1e80] sm:$0xff]  ;;  %v1098_v41 = vld [vmem:[%s4594_s25 + $0x1e88] sm:$0xff] }
 0x10c   : > { %1091 = vst [vmem:[%s4602_s26 + $0xf28] sm:$0xff] %v1090_v37  ;;  %1093 = vst [vmem:[%s4602_s26 + $0xf30] sm:$0xff] %v1092_v38  ;;  %v1100_v42 = vld [vmem:[%s4594_s25 + $0x1e90] sm:$0xff]  ;;  %v1102_v43 = vld [vmem:[%s4594_s25 + $0x1e98] sm:$0xff] }
 0x10d   : > { %1095 = vst [vmem:[%s4602_s26 + $0xf38] sm:$0xff] %v1094_v39  ;;  %1097 = vst [vmem:[%s4602_s26 + $0xf40] sm:$0xff] %v1096_v40  ;;  %v1104_v44 = vld [vmem:[%s4594_s25 + $0x1ea0] sm:$0xff]  ;;  %v1106_v45 = vld [vmem:[%s4594_s25 + $0x1ea8] sm:$0xff] }
 0x10e   : > { %1099 = vst [vmem:[%s4602_s26 + $0xf48] sm:$0xff] %v1098_v41  ;;  %1101 = vst [vmem:[%s4602_s26 + $0xf50] sm:$0xff] %v1100_v42  ;;  %v1108_v46 = vld [vmem:[%s4594_s25 + $0x1eb0] sm:$0xff]  ;;  %v1110_v47 = vld [vmem:[%s4594_s25 + $0x1eb8] sm:$0xff] }
 0x10f   : > { %1103 = vst [vmem:[%s4602_s26 + $0xf58] sm:$0xff] %v1102_v43  ;;  %1105 = vst [vmem:[%s4602_s26 + $0xf60] sm:$0xff] %v1104_v44  ;;  %v1112_v48 = vld [vmem:[%s4594_s25 + $0x1f00] sm:$0xff]  ;;  %v1114_v49 = vld [vmem:[%s4594_s25 + $0x1f08] sm:$0xff] }
 0x110   : > { %1107 = vst [vmem:[%s4602_s26 + $0xf68] sm:$0xff] %v1106_v45  ;;  %1109 = vst [vmem:[%s4602_s26 + $0xf70] sm:$0xff] %v1108_v46  ;;  %v1116_v50 = vld [vmem:[%s4594_s25 + $0x1f10] sm:$0xff]  ;;  %v1118_v51 = vld [vmem:[%s4594_s25 + $0x1f18] sm:$0xff] }
 0x111   : > { %1111 = vst [vmem:[%s4602_s26 + $0xf78] sm:$0xff] %v1110_v47  ;;  %1113 = vst [vmem:[%s4602_s26 + $0xf80] sm:$0xff] %v1112_v48  ;;  %v1120_v52 = vld [vmem:[%s4594_s25 + $0x1f20] sm:$0xff]  ;;  %v1122_v53 = vld [vmem:[%s4594_s25 + $0x1f28] sm:$0xff] }
 0x112   : > { %1115 = vst [vmem:[%s4602_s26 + $0xf88] sm:$0xff] %v1114_v49  ;;  %1117 = vst [vmem:[%s4602_s26 + $0xf90] sm:$0xff] %v1116_v50  ;;  %v1124_v54 = vld [vmem:[%s4594_s25 + $0x1f30] sm:$0xff]  ;;  %v1126_v55 = vld [vmem:[%s4594_s25 + $0x1f38] sm:$0xff] }
 0x113   : > { %1119 = vst [vmem:[%s4602_s26 + $0xf98] sm:$0xff] %v1118_v51  ;;  %1121 = vst [vmem:[%s4602_s26 + $0xfa0] sm:$0xff] %v1120_v52  ;;  %v1128_v56 = vld [vmem:[%s4594_s25 + $0x1f80] sm:$0xff]  ;;  %v1130_v57 = vld [vmem:[%s4594_s25 + $0x1f88] sm:$0xff] }
 0x114   : > { %1123 = vst [vmem:[%s4602_s26 + $0xfa8] sm:$0xff] %v1122_v53  ;;  %1125 = vst [vmem:[%s4602_s26 + $0xfb0] sm:$0xff] %v1124_v54  ;;  %v1132_v58 = vld [vmem:[%s4594_s25 + $0x1f90] sm:$0xff]  ;;  %v1134_v59 = vld [vmem:[%s4594_s25 + $0x1f98] sm:$0xff] }
 0x115   : > { %1127 = vst [vmem:[%s4602_s26 + $0xfb8] sm:$0xff] %v1126_v55  ;;  %1129 = vst [vmem:[%s4602_s26 + $0xfc0] sm:$0xff] %v1128_v56  ;;  %v1136_v60 = vld [vmem:[%s4594_s25 + $0x1fa0] sm:$0xff]  ;;  %v1138_v61 = vld [vmem:[%s4594_s25 + $0x1fa8] sm:$0xff] }
 0x116   : > { %1131 = vst [vmem:[%s4602_s26 + $0xfc8] sm:$0xff] %v1130_v57  ;;  %1133 = vst [vmem:[%s4602_s26 + $0xfd0] sm:$0xff] %v1132_v58  ;;  %v1140_v62 = vld [vmem:[%s4594_s25 + $0x1fb0] sm:$0xff]  ;;  %v1142_v63 = vld [vmem:[%s4594_s25 + $0x1fb8] sm:$0xff] }
 0x117   : > { %1135 = vst [vmem:[%s4602_s26 + $0xfd8] sm:$0xff] %v1134_v59  ;;  %1137 = vst [vmem:[%s4602_s26 + $0xfe0] sm:$0xff] %v1136_v60  ;;  %v1144_v0 = vld [vmem:[%s4594_s25 + $0x2000] sm:$0xff]  ;;  %v1146_v1 = vld [vmem:[%s4594_s25 + $0x2008] sm:$0xff] }
 0x118   : > { %1139 = vst [vmem:[%s4602_s26 + $0xfe8] sm:$0xff] %v1138_v61  ;;  %1141 = vst [vmem:[%s4602_s26 + $0xff0] sm:$0xff] %v1140_v62  ;;  %v1148_v2 = vld [vmem:[%s4594_s25 + $0x2010] sm:$0xff]  ;;  %v1150_v3 = vld [vmem:[%s4594_s25 + $0x2018] sm:$0xff] }
 0x119   : > { %1143 = vst [vmem:[%s4602_s26 + $0xff8] sm:$0xff] %v1142_v63  ;;  %1145 = vst [vmem:[%s4602_s26 + $0x1000] sm:$0xff] %v1144_v0  ;;  %v1152_v4 = vld [vmem:[%s4594_s25 + $0x2020] sm:$0xff]  ;;  %v1154_v5 = vld [vmem:[%s4594_s25 + $0x2028] sm:$0xff] }
 0x11a   : > { %1147 = vst [vmem:[%s4602_s26 + $0x1008] sm:$0xff] %v1146_v1  ;;  %1149 = vst [vmem:[%s4602_s26 + $0x1010] sm:$0xff] %v1148_v2  ;;  %v1156_v6 = vld [vmem:[%s4594_s25 + $0x2030] sm:$0xff]  ;;  %v1158_v7 = vld [vmem:[%s4594_s25 + $0x2038] sm:$0xff] }
 0x11b   : > { %1151 = vst [vmem:[%s4602_s26 + $0x1018] sm:$0xff] %v1150_v3  ;;  %1153 = vst [vmem:[%s4602_s26 + $0x1020] sm:$0xff] %v1152_v4  ;;  %v1160_v8 = vld [vmem:[%s4594_s25 + $0x2080] sm:$0xff]  ;;  %v1162_v9 = vld [vmem:[%s4594_s25 + $0x2088] sm:$0xff] }
 0x11c   : > { %1155 = vst [vmem:[%s4602_s26 + $0x1028] sm:$0xff] %v1154_v5  ;;  %1157 = vst [vmem:[%s4602_s26 + $0x1030] sm:$0xff] %v1156_v6  ;;  %v1164_v10 = vld [vmem:[%s4594_s25 + $0x2090] sm:$0xff]  ;;  %v1166_v11 = vld [vmem:[%s4594_s25 + $0x2098] sm:$0xff] }
 0x11d   : > { %1159 = vst [vmem:[%s4602_s26 + $0x1038] sm:$0xff] %v1158_v7  ;;  %1161 = vst [vmem:[%s4602_s26 + $0x1040] sm:$0xff] %v1160_v8  ;;  %v1168_v12 = vld [vmem:[%s4594_s25 + $0x20a0] sm:$0xff]  ;;  %v1170_v13 = vld [vmem:[%s4594_s25 + $0x20a8] sm:$0xff] }
 0x11e   : > { %1163 = vst [vmem:[%s4602_s26 + $0x1048] sm:$0xff] %v1162_v9  ;;  %1165 = vst [vmem:[%s4602_s26 + $0x1050] sm:$0xff] %v1164_v10  ;;  %v1172_v14 = vld [vmem:[%s4594_s25 + $0x20b0] sm:$0xff]  ;;  %v1174_v15 = vld [vmem:[%s4594_s25 + $0x20b8] sm:$0xff] }
 0x11f   : > { %1167 = vst [vmem:[%s4602_s26 + $0x1058] sm:$0xff] %v1166_v11  ;;  %1169 = vst [vmem:[%s4602_s26 + $0x1060] sm:$0xff] %v1168_v12  ;;  %v1176_v16 = vld [vmem:[%s4594_s25 + $0x2100] sm:$0xff]  ;;  %v1178_v17 = vld [vmem:[%s4594_s25 + $0x2108] sm:$0xff] }
 0x120   : > { %1171 = vst [vmem:[%s4602_s26 + $0x1068] sm:$0xff] %v1170_v13  ;;  %1173 = vst [vmem:[%s4602_s26 + $0x1070] sm:$0xff] %v1172_v14  ;;  %v1180_v18 = vld [vmem:[%s4594_s25 + $0x2110] sm:$0xff]  ;;  %v1182_v19 = vld [vmem:[%s4594_s25 + $0x2118] sm:$0xff] }
 0x121   : > { %1175 = vst [vmem:[%s4602_s26 + $0x1078] sm:$0xff] %v1174_v15  ;;  %1177 = vst [vmem:[%s4602_s26 + $0x1080] sm:$0xff] %v1176_v16  ;;  %v1184_v20 = vld [vmem:[%s4594_s25 + $0x2120] sm:$0xff]  ;;  %v1186_v21 = vld [vmem:[%s4594_s25 + $0x2128] sm:$0xff] }
 0x122   : > { %1179 = vst [vmem:[%s4602_s26 + $0x1088] sm:$0xff] %v1178_v17  ;;  %1181 = vst [vmem:[%s4602_s26 + $0x1090] sm:$0xff] %v1180_v18  ;;  %v1188_v22 = vld [vmem:[%s4594_s25 + $0x2130] sm:$0xff]  ;;  %v1190_v23 = vld [vmem:[%s4594_s25 + $0x2138] sm:$0xff] }
 0x123   : > { %1183 = vst [vmem:[%s4602_s26 + $0x1098] sm:$0xff] %v1182_v19  ;;  %1185 = vst [vmem:[%s4602_s26 + $0x10a0] sm:$0xff] %v1184_v20  ;;  %v1192_v24 = vld [vmem:[%s4594_s25 + $0x2180] sm:$0xff]  ;;  %v1194_v25 = vld [vmem:[%s4594_s25 + $0x2188] sm:$0xff] }
 0x124   : > { %1187 = vst [vmem:[%s4602_s26 + $0x10a8] sm:$0xff] %v1186_v21  ;;  %1189 = vst [vmem:[%s4602_s26 + $0x10b0] sm:$0xff] %v1188_v22  ;;  %v1196_v26 = vld [vmem:[%s4594_s25 + $0x2190] sm:$0xff]  ;;  %v1198_v27 = vld [vmem:[%s4594_s25 + $0x2198] sm:$0xff] }
 0x125   : > { %1191 = vst [vmem:[%s4602_s26 + $0x10b8] sm:$0xff] %v1190_v23  ;;  %1193 = vst [vmem:[%s4602_s26 + $0x10c0] sm:$0xff] %v1192_v24  ;;  %v1200_v28 = vld [vmem:[%s4594_s25 + $0x21a0] sm:$0xff]  ;;  %v1202_v29 = vld [vmem:[%s4594_s25 + $0x21a8] sm:$0xff] }
 0x126   : > { %1195 = vst [vmem:[%s4602_s26 + $0x10c8] sm:$0xff] %v1194_v25  ;;  %1197 = vst [vmem:[%s4602_s26 + $0x10d0] sm:$0xff] %v1196_v26  ;;  %v1204_v30 = vld [vmem:[%s4594_s25 + $0x21b0] sm:$0xff]  ;;  %v1206_v31 = vld [vmem:[%s4594_s25 + $0x21b8] sm:$0xff] }
 0x127   : > { %1199 = vst [vmem:[%s4602_s26 + $0x10d8] sm:$0xff] %v1198_v27  ;;  %1201 = vst [vmem:[%s4602_s26 + $0x10e0] sm:$0xff] %v1200_v28  ;;  %v1208_v32 = vld [vmem:[%s4594_s25 + $0x2200] sm:$0xff]  ;;  %v1210_v33 = vld [vmem:[%s4594_s25 + $0x2208] sm:$0xff] }
 0x128   : > { %1203 = vst [vmem:[%s4602_s26 + $0x10e8] sm:$0xff] %v1202_v29  ;;  %1205 = vst [vmem:[%s4602_s26 + $0x10f0] sm:$0xff] %v1204_v30  ;;  %v1212_v34 = vld [vmem:[%s4594_s25 + $0x2210] sm:$0xff]  ;;  %v1214_v35 = vld [vmem:[%s4594_s25 + $0x2218] sm:$0xff] }
 0x129   : > { %1207 = vst [vmem:[%s4602_s26 + $0x10f8] sm:$0xff] %v1206_v31  ;;  %1209 = vst [vmem:[%s4602_s26 + $0x1100] sm:$0xff] %v1208_v32  ;;  %v1216_v36 = vld [vmem:[%s4594_s25 + $0x2220] sm:$0xff]  ;;  %v1218_v37 = vld [vmem:[%s4594_s25 + $0x2228] sm:$0xff] }
 0x12a   : > { %1211 = vst [vmem:[%s4602_s26 + $0x1108] sm:$0xff] %v1210_v33  ;;  %1213 = vst [vmem:[%s4602_s26 + $0x1110] sm:$0xff] %v1212_v34  ;;  %v1220_v38 = vld [vmem:[%s4594_s25 + $0x2230] sm:$0xff]  ;;  %v1222_v39 = vld [vmem:[%s4594_s25 + $0x2238] sm:$0xff] }
 0x12b   : > { %1215 = vst [vmem:[%s4602_s26 + $0x1118] sm:$0xff] %v1214_v35  ;;  %1217 = vst [vmem:[%s4602_s26 + $0x1120] sm:$0xff] %v1216_v36  ;;  %v1224_v40 = vld [vmem:[%s4594_s25 + $0x2280] sm:$0xff]  ;;  %v1226_v41 = vld [vmem:[%s4594_s25 + $0x2288] sm:$0xff] }
 0x12c   : > { %1219 = vst [vmem:[%s4602_s26 + $0x1128] sm:$0xff] %v1218_v37  ;;  %1221 = vst [vmem:[%s4602_s26 + $0x1130] sm:$0xff] %v1220_v38  ;;  %v1228_v42 = vld [vmem:[%s4594_s25 + $0x2290] sm:$0xff]  ;;  %v1230_v43 = vld [vmem:[%s4594_s25 + $0x2298] sm:$0xff] }
 0x12d   : > { %1223 = vst [vmem:[%s4602_s26 + $0x1138] sm:$0xff] %v1222_v39  ;;  %1225 = vst [vmem:[%s4602_s26 + $0x1140] sm:$0xff] %v1224_v40  ;;  %v1232_v44 = vld [vmem:[%s4594_s25 + $0x22a0] sm:$0xff]  ;;  %v1234_v45 = vld [vmem:[%s4594_s25 + $0x22a8] sm:$0xff] }
 0x12e   : > { %1227 = vst [vmem:[%s4602_s26 + $0x1148] sm:$0xff] %v1226_v41  ;;  %1229 = vst [vmem:[%s4602_s26 + $0x1150] sm:$0xff] %v1228_v42  ;;  %v1236_v46 = vld [vmem:[%s4594_s25 + $0x22b0] sm:$0xff]  ;;  %v1238_v47 = vld [vmem:[%s4594_s25 + $0x22b8] sm:$0xff] }
 0x12f   : > { %1231 = vst [vmem:[%s4602_s26 + $0x1158] sm:$0xff] %v1230_v43  ;;  %1233 = vst [vmem:[%s4602_s26 + $0x1160] sm:$0xff] %v1232_v44  ;;  %v1240_v48 = vld [vmem:[%s4594_s25 + $0x2300] sm:$0xff]  ;;  %v1242_v49 = vld [vmem:[%s4594_s25 + $0x2308] sm:$0xff] }
 0x130   : > { %1235 = vst [vmem:[%s4602_s26 + $0x1168] sm:$0xff] %v1234_v45  ;;  %1237 = vst [vmem:[%s4602_s26 + $0x1170] sm:$0xff] %v1236_v46  ;;  %v1244_v50 = vld [vmem:[%s4594_s25 + $0x2310] sm:$0xff]  ;;  %v1246_v51 = vld [vmem:[%s4594_s25 + $0x2318] sm:$0xff] }
 0x131   : > { %1239 = vst [vmem:[%s4602_s26 + $0x1178] sm:$0xff] %v1238_v47  ;;  %1241 = vst [vmem:[%s4602_s26 + $0x1180] sm:$0xff] %v1240_v48  ;;  %v1248_v52 = vld [vmem:[%s4594_s25 + $0x2320] sm:$0xff]  ;;  %v1250_v53 = vld [vmem:[%s4594_s25 + $0x2328] sm:$0xff] }
 0x132   : > { %1243 = vst [vmem:[%s4602_s26 + $0x1188] sm:$0xff] %v1242_v49  ;;  %1245 = vst [vmem:[%s4602_s26 + $0x1190] sm:$0xff] %v1244_v50  ;;  %v1252_v54 = vld [vmem:[%s4594_s25 + $0x2330] sm:$0xff]  ;;  %v1254_v55 = vld [vmem:[%s4594_s25 + $0x2338] sm:$0xff] }
 0x133   : > { %1247 = vst [vmem:[%s4602_s26 + $0x1198] sm:$0xff] %v1246_v51  ;;  %1249 = vst [vmem:[%s4602_s26 + $0x11a0] sm:$0xff] %v1248_v52  ;;  %v1256_v56 = vld [vmem:[%s4594_s25 + $0x2380] sm:$0xff]  ;;  %v1258_v57 = vld [vmem:[%s4594_s25 + $0x2388] sm:$0xff] }
 0x134   : > { %1251 = vst [vmem:[%s4602_s26 + $0x11a8] sm:$0xff] %v1250_v53  ;;  %1253 = vst [vmem:[%s4602_s26 + $0x11b0] sm:$0xff] %v1252_v54  ;;  %v1260_v58 = vld [vmem:[%s4594_s25 + $0x2390] sm:$0xff]  ;;  %v1262_v59 = vld [vmem:[%s4594_s25 + $0x2398] sm:$0xff] }
 0x135   : > { %1255 = vst [vmem:[%s4602_s26 + $0x11b8] sm:$0xff] %v1254_v55  ;;  %1257 = vst [vmem:[%s4602_s26 + $0x11c0] sm:$0xff] %v1256_v56  ;;  %v1264_v60 = vld [vmem:[%s4594_s25 + $0x23a0] sm:$0xff]  ;;  %v1266_v61 = vld [vmem:[%s4594_s25 + $0x23a8] sm:$0xff] }
 0x136   : > { %1259 = vst [vmem:[%s4602_s26 + $0x11c8] sm:$0xff] %v1258_v57  ;;  %1261 = vst [vmem:[%s4602_s26 + $0x11d0] sm:$0xff] %v1260_v58  ;;  %v1268_v62 = vld [vmem:[%s4594_s25 + $0x23b0] sm:$0xff]  ;;  %v1270_v63 = vld [vmem:[%s4594_s25 + $0x23b8] sm:$0xff] }
 0x137   : > { %1263 = vst [vmem:[%s4602_s26 + $0x11d8] sm:$0xff] %v1262_v59  ;;  %1265 = vst [vmem:[%s4602_s26 + $0x11e0] sm:$0xff] %v1264_v60  ;;  %v1272_v0 = vld [vmem:[%s4594_s25 + $0x2400] sm:$0xff]  ;;  %v1274_v1 = vld [vmem:[%s4594_s25 + $0x2408] sm:$0xff] }
 0x138   : > { %1267 = vst [vmem:[%s4602_s26 + $0x11e8] sm:$0xff] %v1266_v61  ;;  %1269 = vst [vmem:[%s4602_s26 + $0x11f0] sm:$0xff] %v1268_v62  ;;  %v1276_v2 = vld [vmem:[%s4594_s25 + $0x2410] sm:$0xff]  ;;  %v1278_v3 = vld [vmem:[%s4594_s25 + $0x2418] sm:$0xff] }
 0x139   : > { %1271 = vst [vmem:[%s4602_s26 + $0x11f8] sm:$0xff] %v1270_v63  ;;  %1273 = vst [vmem:[%s4602_s26 + $0x1200] sm:$0xff] %v1272_v0  ;;  %v1280_v4 = vld [vmem:[%s4594_s25 + $0x2420] sm:$0xff]  ;;  %v1282_v5 = vld [vmem:[%s4594_s25 + $0x2428] sm:$0xff] }
 0x13a   : > { %1275 = vst [vmem:[%s4602_s26 + $0x1208] sm:$0xff] %v1274_v1  ;;  %1277 = vst [vmem:[%s4602_s26 + $0x1210] sm:$0xff] %v1276_v2  ;;  %v1284_v6 = vld [vmem:[%s4594_s25 + $0x2430] sm:$0xff]  ;;  %v1286_v7 = vld [vmem:[%s4594_s25 + $0x2438] sm:$0xff] }
 0x13b   : > { %1279 = vst [vmem:[%s4602_s26 + $0x1218] sm:$0xff] %v1278_v3  ;;  %1281 = vst [vmem:[%s4602_s26 + $0x1220] sm:$0xff] %v1280_v4  ;;  %v1288_v8 = vld [vmem:[%s4594_s25 + $0x2480] sm:$0xff]  ;;  %v1290_v9 = vld [vmem:[%s4594_s25 + $0x2488] sm:$0xff] }
 0x13c   : > { %1283 = vst [vmem:[%s4602_s26 + $0x1228] sm:$0xff] %v1282_v5  ;;  %1285 = vst [vmem:[%s4602_s26 + $0x1230] sm:$0xff] %v1284_v6  ;;  %v1292_v10 = vld [vmem:[%s4594_s25 + $0x2490] sm:$0xff]  ;;  %v1294_v11 = vld [vmem:[%s4594_s25 + $0x2498] sm:$0xff] }
 0x13d   : > { %1287 = vst [vmem:[%s4602_s26 + $0x1238] sm:$0xff] %v1286_v7  ;;  %1289 = vst [vmem:[%s4602_s26 + $0x1240] sm:$0xff] %v1288_v8  ;;  %v1296_v12 = vld [vmem:[%s4594_s25 + $0x24a0] sm:$0xff]  ;;  %v1298_v13 = vld [vmem:[%s4594_s25 + $0x24a8] sm:$0xff] }
 0x13e   : > { %1291 = vst [vmem:[%s4602_s26 + $0x1248] sm:$0xff] %v1290_v9  ;;  %1293 = vst [vmem:[%s4602_s26 + $0x1250] sm:$0xff] %v1292_v10  ;;  %v1300_v14 = vld [vmem:[%s4594_s25 + $0x24b0] sm:$0xff]  ;;  %v1302_v15 = vld [vmem:[%s4594_s25 + $0x24b8] sm:$0xff] }
 0x13f   : > { %1295 = vst [vmem:[%s4602_s26 + $0x1258] sm:$0xff] %v1294_v11  ;;  %1297 = vst [vmem:[%s4602_s26 + $0x1260] sm:$0xff] %v1296_v12  ;;  %v1304_v16 = vld [vmem:[%s4594_s25 + $0x2500] sm:$0xff]  ;;  %v1306_v17 = vld [vmem:[%s4594_s25 + $0x2508] sm:$0xff] }
 0x140   : > { %1299 = vst [vmem:[%s4602_s26 + $0x1268] sm:$0xff] %v1298_v13  ;;  %1301 = vst [vmem:[%s4602_s26 + $0x1270] sm:$0xff] %v1300_v14  ;;  %v1308_v18 = vld [vmem:[%s4594_s25 + $0x2510] sm:$0xff]  ;;  %v1310_v19 = vld [vmem:[%s4594_s25 + $0x2518] sm:$0xff] }
 0x141   : > { %1303 = vst [vmem:[%s4602_s26 + $0x1278] sm:$0xff] %v1302_v15  ;;  %1305 = vst [vmem:[%s4602_s26 + $0x1280] sm:$0xff] %v1304_v16  ;;  %v1312_v20 = vld [vmem:[%s4594_s25 + $0x2520] sm:$0xff]  ;;  %v1314_v21 = vld [vmem:[%s4594_s25 + $0x2528] sm:$0xff] }
 0x142   : > { %1307 = vst [vmem:[%s4602_s26 + $0x1288] sm:$0xff] %v1306_v17  ;;  %1309 = vst [vmem:[%s4602_s26 + $0x1290] sm:$0xff] %v1308_v18  ;;  %v1316_v22 = vld [vmem:[%s4594_s25 + $0x2530] sm:$0xff]  ;;  %v1318_v23 = vld [vmem:[%s4594_s25 + $0x2538] sm:$0xff] }
 0x143   : > { %1311 = vst [vmem:[%s4602_s26 + $0x1298] sm:$0xff] %v1310_v19  ;;  %1313 = vst [vmem:[%s4602_s26 + $0x12a0] sm:$0xff] %v1312_v20  ;;  %v1320_v24 = vld [vmem:[%s4594_s25 + $0x2580] sm:$0xff]  ;;  %v1322_v25 = vld [vmem:[%s4594_s25 + $0x2588] sm:$0xff] }
 0x144   : > { %1315 = vst [vmem:[%s4602_s26 + $0x12a8] sm:$0xff] %v1314_v21  ;;  %1317 = vst [vmem:[%s4602_s26 + $0x12b0] sm:$0xff] %v1316_v22  ;;  %v1324_v26 = vld [vmem:[%s4594_s25 + $0x2590] sm:$0xff]  ;;  %v1326_v27 = vld [vmem:[%s4594_s25 + $0x2598] sm:$0xff] }
 0x145   : > { %1319 = vst [vmem:[%s4602_s26 + $0x12b8] sm:$0xff] %v1318_v23  ;;  %1321 = vst [vmem:[%s4602_s26 + $0x12c0] sm:$0xff] %v1320_v24  ;;  %v1328_v28 = vld [vmem:[%s4594_s25 + $0x25a0] sm:$0xff]  ;;  %v1330_v29 = vld [vmem:[%s4594_s25 + $0x25a8] sm:$0xff] }
 0x146   : > { %1323 = vst [vmem:[%s4602_s26 + $0x12c8] sm:$0xff] %v1322_v25  ;;  %1325 = vst [vmem:[%s4602_s26 + $0x12d0] sm:$0xff] %v1324_v26  ;;  %v1332_v30 = vld [vmem:[%s4594_s25 + $0x25b0] sm:$0xff]  ;;  %v1334_v31 = vld [vmem:[%s4594_s25 + $0x25b8] sm:$0xff] }
 0x147   : > { %1327 = vst [vmem:[%s4602_s26 + $0x12d8] sm:$0xff] %v1326_v27  ;;  %1329 = vst [vmem:[%s4602_s26 + $0x12e0] sm:$0xff] %v1328_v28 }
 0x148   : > { %1331 = vst [vmem:[%s4602_s26 + $0x12e8] sm:$0xff] %v1330_v29  ;;  %1333 = vst [vmem:[%s4602_s26 + $0x12f0] sm:$0xff] %v1332_v30 }
 0x149   : > { %1335 = vst [vmem:[%s4602_s26 + $0x12f8] sm:$0xff] %v1334_v31 }
 0x14a PF: > { %p4372_p11 = scmp.ge.s32.totalorder %s4518_s11, 1  ;;  %p1340_p12 = scmp.lt.s32.totalorder %s4518_s11, 3 }
 0x14c   : > { %p1341_p13 = pnand %p4372_p11, %p1340_p12 }
 0x14d   : > { %s5817_s27 = sand.u32 (!%p1341_p13), 1, %s4502_s7   ;;  %vm4254_vm1 = vcmask (!%p1341_p13), 1041409   ;;  %vm4256_vm2 = vcmask (!%p1341_p13), 1043459   ;;  %vm4258_vm3 = vcmask (!%p1341_p13), 1045509   ;;  %vm4260_vm4 = vcmask (!%p1341_p13), 1047559   ;;  %s4380_s2 = sshll.u32 (!%p1341_p13), %s4510_s9, 8 }
 0x14e   : > { %1344 = sbr.rel (%p1341_p13) target bundleno = 583 (0x247), region = 43  ;;  %s4373_s30 = sshll.u32 (!%p1341_p13), %s5817_s27, 4 }
 0x14f   : > { %s4382_s28 = smul.u32 (!%p1341_p13), 4864, %s5817_s27  ;;  %s1365_s3 = scalar_lea.vmem (!%p1341_p13), [#allocation3], %s4373_s30 }
 0x150   : > { %s4290_s4 = sshll.u32 (!%p1341_p13), %s1365_s3, 4  ;;  %s6641_s13 = scalar_lea.hbm (!%p1341_p13), %s6691_s1, %s4380_s2  ;;  %s6643_s4 = int_to_ptr.vmem [resolvable:$true] %s4290_s4 }
 0x151   : > { %s5820_s29 = scalar_lea.vmem (!%p1341_p13), [#allocation2], %s4382_s28  ;;  %s4276_s9 = scalar_lea.sflag (!%p1341_p13), [#allocation4], %s5817_s27 }
 0x152   : > { %v1375_v32 = vld [vmem:[%s5820_s29] sm:$0xff] (!%p1341_p13)  ;;  %v1376_v33 = vld [vmem:[%s5820_s29 + $0x8] sm:$0xff] (!%p1341_p13)  ;;  %v1377_v34 = vld [vmem:[%s5820_s29 + $0x10] sm:$0xff] (!%p1341_p13)  ;;  %s4440_s15 = scalar_lea.vmem (!%p1341_p13), %s6643_s4, 256  ;;  %s4521_s17 = smov (!%p1341_p13), [#allocation3]  }
 0x153   : > { %v1378_v35 = vld [vmem:[%s5820_s29 + $0x18] sm:$0xff] (!%p1341_p13)  ;;  %v1379_v36 = vld [vmem:[%s5820_s29 + $0x20] sm:$0xff] (!%p1341_p13)  ;;  %v1380_v37 = vld [vmem:[%s5820_s29 + $0x28] sm:$0xff] (!%p1341_p13)  ;;  %p4441_p0 = scmp.ne.s32.totalorder (!%p1341_p13), %s6643_s4, %s4440_s15  ;;  %s4444_s20 = sshll.u32 (!%p1341_p13), %s4521_s17, 4  ;;  %s4445_s20 = int_to_ptr.vmem [resolvable:$false] %s4444_s20 }
 0x154   : > { %v1381_v38 = vld [vmem:[%s5820_s29 + $0x30] sm:$0xff] (!%p1341_p13)  ;;  %v1382_v39 = vld [vmem:[%s5820_s29 + $0x38] sm:$0xff] (!%p1341_p13)  ;;  %v1383_v40 = vld [vmem:[%s5820_s29 + $0x40] sm:$0xff] (!%p1341_p13)  ;;  %s4446_s21 = scalar_lea.vmem (!%p1341_p13), %s4445_s20, 512  ;;  %p4447_p3 = scmp.lt.s32.totalorder (!%p1341_p13), %s6643_s4, %s4445_s20 }
 0x155   : > { %v1384_v41 = vld [vmem:[%s5820_s29 + $0x48] sm:$0xff]  ;;  %v1385_v42 = vld [vmem:[%s5820_s29 + $0x50] sm:$0xff]  ;;  %v1386_v43 = vld [vmem:[%s5820_s29 + $0x58] sm:$0xff]  ;;  %v3477_v53 = vadd.f32 %v1383_v40, %v1375_v32  ;;  %p4442_p1 = pnand %p4441_p0, %p4571_p5  ;;  %p4448_p4 = scmp.lt.s32.totalorder %s4446_s21, %s4440_s15 }
 0x156   : > { %v1387_v44 = vld [vmem:[%s5820_s29 + $0x60] sm:$0xff]  ;;  %v1388_v45 = vld [vmem:[%s5820_s29 + $0x68] sm:$0xff]  ;;  %v1389_v46 = vld [vmem:[%s5820_s29 + $0x70] sm:$0xff]  ;;  %v3520_v54 = vadd.f32 %v1384_v41, %v1376_v33  ;;  %v3563_v55 = vadd.f32 %v1385_v42, %v1377_v34  ;;  %v3606_v56 = vadd.f32 %v1386_v43, %v1378_v35 }
 0x157   : > { %v1390_v47 = vld [vmem:[%s5820_s29 + $0x78] sm:$0xff]  ;;  %v1391_v48 = vld [vmem:[%s5820_s29 + $0x80] sm:$0xff]  ;;  %v1392_v49 = vld [vmem:[%s5820_s29 + $0x88] sm:$0xff]  ;;  %v3649_v60 = vadd.f32 %v1387_v44, %v1379_v36  ;;  %v3692_v61 = vadd.f32 %v1388_v45, %v1380_v37  ;;  %v3735_v62 = vadd.f32 %v1389_v46, %v1381_v38  ;;  %p4443_p2 = pneg %p4442_p1  ;;  %p4449_p6 = por %p4448_p4, %p4447_p3 }
 0x158   : > { %v1393_v50 = vld [vmem:[%s5820_s29 + $0x90] sm:$0xff]  ;;  %v1394_v51 = vld [vmem:[%s5820_s29 + $0x98] sm:$0xff]  ;;  %v1395_v52 = vld [vmem:[%s5820_s29 + $0xa0] sm:$0xff]  ;;  %v3778_v63 = vadd.f32 %v1390_v47, %v1382_v39  ;;  %v3478_v3 = vadd.f32 %v3477_v53, %v1391_v48  ;;  %v3521_v4 = vadd.f32 %v3520_v54, %v1392_v49 }
 0x159   : > { %v1396_v57 = vld [vmem:[%s5820_s29 + $0xa8] sm:$0xff]  ;;  %v1397_v58 = vld [vmem:[%s5820_s29 + $0xb0] sm:$0xff]  ;;  %v1398_v59 = vld [vmem:[%s5820_s29 + $0xb8] sm:$0xff]  ;;  %v3564_v5 = vadd.f32 %v3563_v55, %v1393_v50  ;;  %v3607_v6 = vadd.f32 %v3606_v56, %v1394_v51  ;;  %v3650_v10 = vadd.f32 %v3649_v60, %v1395_v52  ;;  %p4450_p7 = pnand %p4449_p6, %p4443_p2 }
 0x15a   : > { %v1399_v0 = vld [vmem:[%s5820_s29 + $0xc0] sm:$0xff]  ;;  %v1400_v1 = vld [vmem:[%s5820_s29 + $0xc8] sm:$0xff]  ;;  %v1401_v2 = vld [vmem:[%s5820_s29 + $0xd0] sm:$0xff]  ;;  %v3693_v11 = vadd.f32 %v3692_v61, %v1396_v57  ;;  %v3736_v12 = vadd.f32 %v3735_v62, %v1397_v58  ;;  %v3779_v13 = vadd.f32 %v3778_v63, %v1398_v59 }
 0x15b   : > { %v1402_v7 = vld [vmem:[%s5820_s29 + $0xd8] sm:$0xff]  ;;  %v1403_v8 = vld [vmem:[%s5820_s29 + $0xe0] sm:$0xff]  ;;  %v1404_v9 = vld [vmem:[%s5820_s29 + $0xe8] sm:$0xff]  ;;  %v3479_v17 = vadd.f32 %v3478_v3, %v1399_v0  ;;  %v3522_v18 = vadd.f32 %v3521_v4, %v1400_v1  ;;  %v3565_v19 = vadd.f32 %v3564_v5, %v1401_v2 }
 0x15c   : > { %v1405_v14 = vld [vmem:[%s5820_s29 + $0xf0] sm:$0xff]  ;;  %v1406_v15 = vld [vmem:[%s5820_s29 + $0xf8] sm:$0xff]  ;;  %v1407_v16 = vld [vmem:[%s5820_s29 + $0x100] sm:$0xff]  ;;  %v3608_v20 = vadd.f32 %v3607_v6, %v1402_v7  ;;  %v3651_v24 = vadd.f32 %v3650_v10, %v1403_v8  ;;  %v3694_v25 = vadd.f32 %v3693_v11, %v1404_v9 }
 0x15d   : > { %v1408_v21 = vld [vmem:[%s5820_s29 + $0x108] sm:$0xff]  ;;  %v1409_v22 = vld [vmem:[%s5820_s29 + $0x110] sm:$0xff]  ;;  %v1410_v23 = vld [vmem:[%s5820_s29 + $0x118] sm:$0xff]  ;;  %v3737_v26 = vadd.f32 %v3736_v12, %v1405_v14  ;;  %v3780_v27 = vadd.f32 %v3779_v13, %v1406_v15  ;;  %v3480_v31 = vadd.f32 %v3479_v17, %v1407_v16 }
 0x15e   : > { %v1411_v28 = vld [vmem:[%s5820_s29 + $0x120] sm:$0xff]  ;;  %v1412_v29 = vld [vmem:[%s5820_s29 + $0x128] sm:$0xff]  ;;  %v1413_v30 = vld [vmem:[%s5820_s29 + $0x130] sm:$0xff]  ;;  %v3523_v32 = vadd.f32 %v3522_v18, %v1408_v21  ;;  %v3566_v33 = vadd.f32 %v3565_v19, %v1409_v22  ;;  %v3609_v34 = vadd.f32 %v3608_v20, %v1410_v23 }
 0x15f   : > { %v1414_v35 = vld [vmem:[%s5820_s29 + $0x138] sm:$0xff]  ;;  %v1415_v36 = vld [vmem:[%s5820_s29 + $0x140] sm:$0xff]  ;;  %v1416_v37 = vld [vmem:[%s5820_s29 + $0x148] sm:$0xff]  ;;  %v3652_v38 = vadd.f32 %v3651_v24, %v1411_v28  ;;  %v3695_v39 = vadd.f32 %v3694_v25, %v1412_v29  ;;  %v3738_v40 = vadd.f32 %v3737_v26, %v1413_v30 }
 0x160   : > { %v1417_v41 = vld [vmem:[%s5820_s29 + $0x150] sm:$0xff]  ;;  %v1418_v42 = vld [vmem:[%s5820_s29 + $0x158] sm:$0xff]  ;;  %v1419_v43 = vld [vmem:[%s5820_s29 + $0x160] sm:$0xff]  ;;  %v3481_v44 = vadd.f32 %v3480_v31, %v1415_v36  ;;  %v3524_v45 = vadd.f32 %v3523_v32, %v1416_v37  ;;  %v3781_v46 = vadd.f32 %v3780_v27, %v1414_v35 }
 0x161   : > { %v1420_v47 = vld [vmem:[%s5820_s29 + $0x168] sm:$0xff]  ;;  %v1421_v48 = vld [vmem:[%s5820_s29 + $0x170] sm:$0xff]  ;;  %v1422_v49 = vld [vmem:[%s5820_s29 + $0x178] sm:$0xff]  ;;  %v3567_v50 = vadd.f32 %v3566_v33, %v1417_v41  ;;  %v3610_v51 = vadd.f32 %v3609_v34, %v1418_v42  ;;  %v3653_v52 = vadd.f32 %v3652_v38, %v1419_v43 }
 0x162   : > { %v1423_v53 = vld [vmem:[%s5820_s29 + $0x180] sm:$0xff]  ;;  %v1424_v54 = vld [vmem:[%s5820_s29 + $0x188] sm:$0xff]  ;;  %v1425_v55 = vld [vmem:[%s5820_s29 + $0x190] sm:$0xff]  ;;  %v3696_v56 = vadd.f32 %v3695_v39, %v1420_v47  ;;  %v3739_v57 = vadd.f32 %v3738_v40, %v1421_v48  ;;  %v3782_v58 = vadd.f32 %v3781_v46, %v1422_v49 }
 0x163   : > { %v1426_v59 = vld [vmem:[%s5820_s29 + $0x198] sm:$0xff]  ;;  %v1427_v60 = vld [vmem:[%s5820_s29 + $0x1a0] sm:$0xff]  ;;  %v1428_v61 = vld [vmem:[%s5820_s29 + $0x1a8] sm:$0xff]  ;;  %v3482_v62 = vadd.f32 %v3481_v44, %v1423_v53  ;;  %v3525_v63 = vadd.f32 %v3524_v45, %v1424_v54  ;;  %v3568_v0 = vadd.f32 %v3567_v50, %v1425_v55 }
 0x164   : > { %v1429_v1 = vld [vmem:[%s5820_s29 + $0x1b0] sm:$0xff]  ;;  %v1430_v2 = vld [vmem:[%s5820_s29 + $0x1b8] sm:$0xff]  ;;  %v1431_v3 = vld [vmem:[%s5820_s29 + $0x1c0] sm:$0xff]  ;;  %v3611_v4 = vadd.f32 %v3610_v51, %v1426_v59  ;;  %v3654_v5 = vadd.f32 %v3653_v52, %v1427_v60  ;;  %v3697_v6 = vadd.f32 %v3696_v56, %v1428_v61 }
 0x165   : > { %v1432_v7 = vld [vmem:[%s5820_s29 + $0x1c8] sm:$0xff]  ;;  %v1433_v8 = vld [vmem:[%s5820_s29 + $0x1d0] sm:$0xff]  ;;  %v1434_v9 = vld [vmem:[%s5820_s29 + $0x1d8] sm:$0xff]  ;;  %v3483_v10 = vadd.f32 %v3482_v62, %v1431_v3  ;;  %v3740_v11 = vadd.f32 %v3739_v57, %v1429_v1  ;;  %v3783_v12 = vadd.f32 %v3782_v58, %v1430_v2 }
 0x166   : > { %v1435_v13 = vld [vmem:[%s5820_s29 + $0x1e0] sm:$0xff]  ;;  %v1436_v14 = vld [vmem:[%s5820_s29 + $0x1e8] sm:$0xff]  ;;  %v1437_v15 = vld [vmem:[%s5820_s29 + $0x1f0] sm:$0xff]  ;;  %v3526_v16 = vadd.f32 %v3525_v63, %v1432_v7  ;;  %v3569_v17 = vadd.f32 %v3568_v0, %v1433_v8  ;;  %v3612_v18 = vadd.f32 %v3611_v4, %v1434_v9 }
 0x167   : > { %v1438_v19 = vld [vmem:[%s5820_s29 + $0x1f8] sm:$0xff]  ;;  %v1439_v20 = vld [vmem:[%s5820_s29 + $0x200] sm:$0xff]  ;;  %v1440_v21 = vld [vmem:[%s5820_s29 + $0x208] sm:$0xff]  ;;  %v3655_v22 = vadd.f32 %v3654_v5, %v1435_v13  ;;  %v3698_v23 = vadd.f32 %v3697_v6, %v1436_v14  ;;  %v3741_v24 = vadd.f32 %v3740_v11, %v1437_v15 }
 0x168   : > { %v1441_v25 = vld [vmem:[%s5820_s29 + $0x210] sm:$0xff]  ;;  %v1442_v26 = vld [vmem:[%s5820_s29 + $0x218] sm:$0xff]  ;;  %v1443_v27 = vld [vmem:[%s5820_s29 + $0x220] sm:$0xff]  ;;  %v3484_v28 = vadd.f32 %v3483_v10, %v1439_v20  ;;  %v3527_v29 = vadd.f32 %v3526_v16, %v1440_v21  ;;  %v3784_v30 = vadd.f32 %v3783_v12, %v1438_v19 }
 0x169   : > { %v1444_v31 = vld [vmem:[%s5820_s29 + $0x228] sm:$0xff]  ;;  %v1445_v32 = vld [vmem:[%s5820_s29 + $0x230] sm:$0xff]  ;;  %v1446_v33 = vld [vmem:[%s5820_s29 + $0x238] sm:$0xff]  ;;  %v3570_v34 = vadd.f32 %v3569_v17, %v1441_v25  ;;  %v3613_v35 = vadd.f32 %v3612_v18, %v1442_v26  ;;  %v3656_v36 = vadd.f32 %v3655_v22, %v1443_v27 }
 0x16a   : > { %v1447_v37 = vld [vmem:[%s5820_s29 + $0x240] sm:$0xff]  ;;  %v1448_v38 = vld [vmem:[%s5820_s29 + $0x248] sm:$0xff]  ;;  %v1449_v39 = vld [vmem:[%s5820_s29 + $0x250] sm:$0xff]  ;;  %v3699_v40 = vadd.f32 %v3698_v23, %v1444_v31  ;;  %v3742_v41 = vadd.f32 %v3741_v24, %v1445_v32  ;;  %v3785_v42 = vadd.f32 %v3784_v30, %v1446_v33 }
 0x16b   : > { %v1450_v43 = vld [vmem:[%s5820_s29 + $0x258] sm:$0xff]  ;;  %v1451_v44 = vld [vmem:[%s5820_s29 + $0x260] sm:$0xff]  ;;  %v1452_v45 = vld [vmem:[%s5820_s29 + $0x268] sm:$0xff]  ;;  %v3485_v46 = vadd.f32 %v3484_v28, %v1447_v37  ;;  %v3528_v47 = vadd.f32 %v3527_v29, %v1448_v38  ;;  %v3571_v48 = vadd.f32 %v3570_v34, %v1449_v39 }
 0x16c   : > { %v1453_v49 = vld [vmem:[%s5820_s29 + $0x270] sm:$0xff]  ;;  %v1454_v50 = vld [vmem:[%s5820_s29 + $0x278] sm:$0xff]  ;;  %v1455_v51 = vld [vmem:[%s5820_s29 + $0x280] sm:$0xff]  ;;  %v3614_v52 = vadd.f32 %v3613_v35, %v1450_v43  ;;  %v3657_v53 = vadd.f32 %v3656_v36, %v1451_v44  ;;  %v3700_v54 = vadd.f32 %v3699_v40, %v1452_v45 }
 0x16d   : > { %v1456_v55 = vld [vmem:[%s5820_s29 + $0x288] sm:$0xff]  ;;  %v1457_v56 = vld [vmem:[%s5820_s29 + $0x290] sm:$0xff]  ;;  %v1458_v57 = vld [vmem:[%s5820_s29 + $0x298] sm:$0xff]  ;;  %v3486_v58 = vadd.f32 %v3485_v46, %v1455_v51  ;;  %v3743_v59 = vadd.f32 %v3742_v41, %v1453_v49  ;;  %v3786_v60 = vadd.f32 %v3785_v42, %v1454_v50 }
 0x16e   : > { %v1459_v61 = vld [vmem:[%s5820_s29 + $0x2a0] sm:$0xff]  ;;  %v1460_v62 = vld [vmem:[%s5820_s29 + $0x2a8] sm:$0xff]  ;;  %v1461_v63 = vld [vmem:[%s5820_s29 + $0x2b0] sm:$0xff]  ;;  %v3529_v0 = vadd.f32 %v3528_v47, %v1456_v55  ;;  %v3572_v1 = vadd.f32 %v3571_v48, %v1457_v56  ;;  %v3615_v2 = vadd.f32 %v3614_v52, %v1458_v57 }
 0x16f   : > { %v1462_v3 = vld [vmem:[%s5820_s29 + $0x2b8] sm:$0xff]  ;;  %v1463_v4 = vld [vmem:[%s5820_s29 + $0x2c0] sm:$0xff]  ;;  %v1464_v5 = vld [vmem:[%s5820_s29 + $0x2c8] sm:$0xff]  ;;  %v3658_v6 = vadd.f32 %v3657_v53, %v1459_v61  ;;  %v3701_v7 = vadd.f32 %v3700_v54, %v1460_v62  ;;  %v3744_v8 = vadd.f32 %v3743_v59, %v1461_v63 }
 0x170   : > { %v1465_v9 = vld [vmem:[%s5820_s29 + $0x2d0] sm:$0xff]  ;;  %v1466_v10 = vld [vmem:[%s5820_s29 + $0x2d8] sm:$0xff]  ;;  %v1467_v11 = vld [vmem:[%s5820_s29 + $0x2e0] sm:$0xff]  ;;  %v3487_v12 = vadd.f32 %v3486_v58, %v1463_v4  ;;  %v3530_v13 = vadd.f32 %v3529_v0, %v1464_v5  ;;  %v3787_v14 = vadd.f32 %v3786_v60, %v1462_v3 }
 0x171   : > { %v1468_v15 = vld [vmem:[%s5820_s29 + $0x2e8] sm:$0xff]  ;;  %v1469_v16 = vld [vmem:[%s5820_s29 + $0x2f0] sm:$0xff]  ;;  %v1470_v17 = vld [vmem:[%s5820_s29 + $0x2f8] sm:$0xff]  ;;  %v3573_v18 = vadd.f32 %v3572_v1, %v1465_v9  ;;  %v3616_v19 = vadd.f32 %v3615_v2, %v1466_v10  ;;  %v3659_v20 = vadd.f32 %v3658_v6, %v1467_v11 }
 0x172   : > { %v1471_v21 = vld [vmem:[%s5820_s29 + $0x300] sm:$0xff]  ;;  %v1472_v22 = vld [vmem:[%s5820_s29 + $0x308] sm:$0xff]  ;;  %v1473_v23 = vld [vmem:[%s5820_s29 + $0x310] sm:$0xff]  ;;  %v3702_v24 = vadd.f32 %v3701_v7, %v1468_v15  ;;  %v3745_v25 = vadd.f32 %v3744_v8, %v1469_v16  ;;  %v3788_v26 = vadd.f32 %v3787_v14, %v1470_v17 }
 0x173   : > { %v1474_v27 = vld [vmem:[%s5820_s29 + $0x318] sm:$0xff]  ;;  %v1475_v28 = vld [vmem:[%s5820_s29 + $0x320] sm:$0xff]  ;;  %v1476_v29 = vld [vmem:[%s5820_s29 + $0x328] sm:$0xff]  ;;  %v3488_v30 = vadd.f32 %v3487_v12, %v1471_v21  ;;  %v3531_v31 = vadd.f32 %v3530_v13, %v1472_v22  ;;  %v3574_v32 = vadd.f32 %v3573_v18, %v1473_v23 }
 0x174   : > { %v1477_v33 = vld [vmem:[%s5820_s29 + $0x330] sm:$0xff]  ;;  %v1478_v34 = vld [vmem:[%s5820_s29 + $0x338] sm:$0xff]  ;;  %v1479_v35 = vld [vmem:[%s5820_s29 + $0x340] sm:$0xff]  ;;  %v3617_v36 = vadd.f32 %v3616_v19, %v1474_v27  ;;  %v3660_v37 = vadd.f32 %v3659_v20, %v1475_v28  ;;  %v3703_v38 = vadd.f32 %v3702_v24, %v1476_v29 }
 0x175   : > { %v1480_v39 = vld [vmem:[%s5820_s29 + $0x348] sm:$0xff]  ;;  %v1481_v40 = vld [vmem:[%s5820_s29 + $0x350] sm:$0xff]  ;;  %v1482_v41 = vld [vmem:[%s5820_s29 + $0x358] sm:$0xff]  ;;  %v3489_v42 = vadd.f32 %v3488_v30, %v1479_v35  ;;  %v3746_v43 = vadd.f32 %v3745_v25, %v1477_v33  ;;  %v3789_v44 = vadd.f32 %v3788_v26, %v1478_v34 }
 0x176   : > { %v1483_v45 = vld [vmem:[%s5820_s29 + $0x360] sm:$0xff]  ;;  %v1484_v46 = vld [vmem:[%s5820_s29 + $0x368] sm:$0xff]  ;;  %v1485_v47 = vld [vmem:[%s5820_s29 + $0x370] sm:$0xff]  ;;  %v3532_v48 = vadd.f32 %v3531_v31, %v1480_v39  ;;  %v3575_v49 = vadd.f32 %v3574_v32, %v1481_v40  ;;  %v3618_v50 = vadd.f32 %v3617_v36, %v1482_v41 }
 0x177   : > { %v1486_v51 = vld [vmem:[%s5820_s29 + $0x378] sm:$0xff]  ;;  %v1487_v52 = vld [vmem:[%s5820_s29 + $0x380] sm:$0xff]  ;;  %v1488_v53 = vld [vmem:[%s5820_s29 + $0x388] sm:$0xff]  ;;  %v3661_v54 = vadd.f32 %v3660_v37, %v1483_v45  ;;  %v3704_v55 = vadd.f32 %v3703_v38, %v1484_v46  ;;  %v3747_v56 = vadd.f32 %v3746_v43, %v1485_v47 }
 0x178   : > { %v1489_v57 = vld [vmem:[%s5820_s29 + $0x390] sm:$0xff]  ;;  %v1490_v58 = vld [vmem:[%s5820_s29 + $0x398] sm:$0xff]  ;;  %v1491_v59 = vld [vmem:[%s5820_s29 + $0x3a0] sm:$0xff]  ;;  %v3490_v60 = vadd.f32 %v3489_v42, %v1487_v52  ;;  %v3533_v61 = vadd.f32 %v3532_v48, %v1488_v53  ;;  %v3790_v62 = vadd.f32 %v3789_v44, %v1486_v51 }
 0x179   : > { %v1492_v63 = vld [vmem:[%s5820_s29 + $0x3a8] sm:$0xff]  ;;  %v1493_v0 = vld [vmem:[%s5820_s29 + $0x3b0] sm:$0xff]  ;;  %v1494_v1 = vld [vmem:[%s5820_s29 + $0x3b8] sm:$0xff]  ;;  %v3576_v2 = vadd.f32 %v3575_v49, %v1489_v57  ;;  %v3619_v3 = vadd.f32 %v3618_v50, %v1490_v58  ;;  %v3662_v4 = vadd.f32 %v3661_v54, %v1491_v59 }
 0x17a   : > { %v1495_v5 = vld [vmem:[%s5820_s29 + $0x3c0] sm:$0xff]  ;;  %v1496_v6 = vld [vmem:[%s5820_s29 + $0x3c8] sm:$0xff]  ;;  %v1497_v7 = vld [vmem:[%s5820_s29 + $0x3d0] sm:$0xff]  ;;  %v3705_v8 = vadd.f32 %v3704_v55, %v1492_v63  ;;  %v3748_v9 = vadd.f32 %v3747_v56, %v1493_v0  ;;  %v3791_v10 = vadd.f32 %v3790_v62, %v1494_v1 }
 0x17b   : > { %v1498_v11 = vld [vmem:[%s5820_s29 + $0x3d8] sm:$0xff]  ;;  %v1499_v12 = vld [vmem:[%s5820_s29 + $0x3e0] sm:$0xff]  ;;  %v1500_v13 = vld [vmem:[%s5820_s29 + $0x3e8] sm:$0xff]  ;;  %v3491_v14 = vadd.f32 %v3490_v60, %v1495_v5  ;;  %v3534_v15 = vadd.f32 %v3533_v61, %v1496_v6  ;;  %v3577_v16 = vadd.f32 %v3576_v2, %v1497_v7 }
 0x17c   : > { %v1501_v17 = vld [vmem:[%s5820_s29 + $0x3f0] sm:$0xff]  ;;  %v1502_v18 = vld [vmem:[%s5820_s29 + $0x3f8] sm:$0xff]  ;;  %v1503_v19 = vld [vmem:[%s5820_s29 + $0x400] sm:$0xff]  ;;  %v3620_v20 = vadd.f32 %v3619_v3, %v1498_v11  ;;  %v3663_v21 = vadd.f32 %v3662_v4, %v1499_v12  ;;  %v3706_v22 = vadd.f32 %v3705_v8, %v1500_v13 }
 0x17d   : > { %v1504_v23 = vld [vmem:[%s5820_s29 + $0x408] sm:$0xff]  ;;  %v1505_v24 = vld [vmem:[%s5820_s29 + $0x410] sm:$0xff]  ;;  %v1506_v25 = vld [vmem:[%s5820_s29 + $0x418] sm:$0xff]  ;;  %v3492_v26 = vadd.f32 %v3491_v14, %v1503_v19  ;;  %v3749_v27 = vadd.f32 %v3748_v9, %v1501_v17  ;;  %v3792_v28 = vadd.f32 %v3791_v10, %v1502_v18 }
 0x17e   : > { %v1507_v29 = vld [vmem:[%s5820_s29 + $0x420] sm:$0xff]  ;;  %v1508_v30 = vld [vmem:[%s5820_s29 + $0x428] sm:$0xff]  ;;  %v1509_v31 = vld [vmem:[%s5820_s29 + $0x430] sm:$0xff]  ;;  %v3535_v32 = vadd.f32 %v3534_v15, %v1504_v23  ;;  %v3578_v33 = vadd.f32 %v3577_v16, %v1505_v24  ;;  %v3621_v34 = vadd.f32 %v3620_v20, %v1506_v25 }
 0x17f   : > { %v1510_v35 = vld [vmem:[%s5820_s29 + $0x438] sm:$0xff]  ;;  %v1511_v36 = vld [vmem:[%s5820_s29 + $0x440] sm:$0xff]  ;;  %v1512_v37 = vld [vmem:[%s5820_s29 + $0x448] sm:$0xff]  ;;  %v3664_v38 = vadd.f32 %v3663_v21, %v1507_v29  ;;  %v3707_v39 = vadd.f32 %v3706_v22, %v1508_v30  ;;  %v3750_v40 = vadd.f32 %v3749_v27, %v1509_v31 }
 0x180   : > { %v1513_v41 = vld [vmem:[%s5820_s29 + $0x450] sm:$0xff]  ;;  %v1514_v42 = vld [vmem:[%s5820_s29 + $0x458] sm:$0xff]  ;;  %v1515_v43 = vld [vmem:[%s5820_s29 + $0x460] sm:$0xff]  ;;  %v3493_v44 = vadd.f32 %v3492_v26, %v1511_v36  ;;  %v3536_v45 = vadd.f32 %v3535_v32, %v1512_v37  ;;  %v3793_v46 = vadd.f32 %v3792_v28, %v1510_v35 }
 0x181   : > { %v1516_v47 = vld [vmem:[%s5820_s29 + $0x468] sm:$0xff]  ;;  %v1517_v48 = vld [vmem:[%s5820_s29 + $0x470] sm:$0xff]  ;;  %v1518_v49 = vld [vmem:[%s5820_s29 + $0x478] sm:$0xff]  ;;  %v3579_v50 = vadd.f32 %v3578_v33, %v1513_v41  ;;  %v3622_v51 = vadd.f32 %v3621_v34, %v1514_v42  ;;  %v3665_v52 = vadd.f32 %v3664_v38, %v1515_v43 }
 0x182   : > { %v1519_v53 = vld [vmem:[%s5820_s29 + $0x480] sm:$0xff]  ;;  %v1520_v54 = vld [vmem:[%s5820_s29 + $0x488] sm:$0xff]  ;;  %v1521_v55 = vld [vmem:[%s5820_s29 + $0x490] sm:$0xff]  ;;  %v3708_v56 = vadd.f32 %v3707_v39, %v1516_v47  ;;  %v3751_v57 = vadd.f32 %v3750_v40, %v1517_v48  ;;  %v3794_v58 = vadd.f32 %v3793_v46, %v1518_v49 }
 0x183   : > { %v1522_v59 = vld [vmem:[%s5820_s29 + $0x498] sm:$0xff]  ;;  %v1523_v60 = vld [vmem:[%s5820_s29 + $0x4a0] sm:$0xff]  ;;  %v1524_v61 = vld [vmem:[%s5820_s29 + $0x4a8] sm:$0xff]  ;;  %v3494_v62 = vadd.f32 %v3493_v44, %v1519_v53  ;;  %v3537_v63 = vadd.f32 %v3536_v45, %v1520_v54  ;;  %v3580_v0 = vadd.f32 %v3579_v50, %v1521_v55 }
 0x184   : > { %v1525_v1 = vld [vmem:[%s5820_s29 + $0x4b0] sm:$0xff]  ;;  %v1526_v2 = vld [vmem:[%s5820_s29 + $0x4b8] sm:$0xff]  ;;  %v1527_v3 = vld [vmem:[%s5820_s29 + $0x4c0] sm:$0xff]  ;;  %v3623_v4 = vadd.f32 %v3622_v51, %v1522_v59  ;;  %v3666_v5 = vadd.f32 %v3665_v52, %v1523_v60  ;;  %v3709_v6 = vadd.f32 %v3708_v56, %v1524_v61 }
 0x185   : > { %v1528_v7 = vld [vmem:[%s5820_s29 + $0x4c8] sm:$0xff]  ;;  %v1529_v8 = vld [vmem:[%s5820_s29 + $0x4d0] sm:$0xff]  ;;  %v1530_v9 = vld [vmem:[%s5820_s29 + $0x4d8] sm:$0xff]  ;;  %v3495_v10 = vadd.f32 %v3494_v62, %v1527_v3  ;;  %v3752_v11 = vadd.f32 %v3751_v57, %v1525_v1  ;;  %v3795_v12 = vadd.f32 %v3794_v58, %v1526_v2 }
 0x186   : > { %v1531_v13 = vld [vmem:[%s5820_s29 + $0x4e0] sm:$0xff]  ;;  %v1532_v14 = vld [vmem:[%s5820_s29 + $0x4e8] sm:$0xff]  ;;  %v1533_v15 = vld [vmem:[%s5820_s29 + $0x4f0] sm:$0xff]  ;;  %v3538_v16 = vadd.f32 %v3537_v63, %v1528_v7  ;;  %v3581_v17 = vadd.f32 %v3580_v0, %v1529_v8  ;;  %v3624_v18 = vadd.f32 %v3623_v4, %v1530_v9 }
 0x187   : > { %v1534_v19 = vld [vmem:[%s5820_s29 + $0x4f8] sm:$0xff]  ;;  %v1535_v20 = vld [vmem:[%s5820_s29 + $0x500] sm:$0xff]  ;;  %v1536_v21 = vld [vmem:[%s5820_s29 + $0x508] sm:$0xff]  ;;  %v3667_v22 = vadd.f32 %v3666_v5, %v1531_v13  ;;  %v3710_v23 = vadd.f32 %v3709_v6, %v1532_v14  ;;  %v3753_v24 = vadd.f32 %v3752_v11, %v1533_v15 }
 0x188   : > { %v1537_v25 = vld [vmem:[%s5820_s29 + $0x510] sm:$0xff]  ;;  %v1538_v26 = vld [vmem:[%s5820_s29 + $0x518] sm:$0xff]  ;;  %v1539_v27 = vld [vmem:[%s5820_s29 + $0x520] sm:$0xff]  ;;  %v3496_v28 = vadd.f32 %v3495_v10, %v1535_v20  ;;  %v3539_v29 = vadd.f32 %v3538_v16, %v1536_v21  ;;  %v3796_v30 = vadd.f32 %v3795_v12, %v1534_v19 }
 0x189   : > { %v1540_v31 = vld [vmem:[%s5820_s29 + $0x528] sm:$0xff]  ;;  %v1541_v32 = vld [vmem:[%s5820_s29 + $0x530] sm:$0xff]  ;;  %v1542_v33 = vld [vmem:[%s5820_s29 + $0x538] sm:$0xff]  ;;  %v3582_v34 = vadd.f32 %v3581_v17, %v1537_v25  ;;  %v3625_v35 = vadd.f32 %v3624_v18, %v1538_v26  ;;  %v3668_v36 = vadd.f32 %v3667_v22, %v1539_v27 }
 0x18a   : > { %v1543_v37 = vld [vmem:[%s5820_s29 + $0x540] sm:$0xff]  ;;  %v1544_v38 = vld [vmem:[%s5820_s29 + $0x548] sm:$0xff]  ;;  %v1545_v39 = vld [vmem:[%s5820_s29 + $0x550] sm:$0xff]  ;;  %v3711_v40 = vadd.f32 %v3710_v23, %v1540_v31  ;;  %v3754_v41 = vadd.f32 %v3753_v24, %v1541_v32  ;;  %v3797_v42 = vadd.f32 %v3796_v30, %v1542_v33 }
 0x18b   : > { %v1546_v43 = vld [vmem:[%s5820_s29 + $0x558] sm:$0xff]  ;;  %v1547_v44 = vld [vmem:[%s5820_s29 + $0x560] sm:$0xff]  ;;  %v1548_v45 = vld [vmem:[%s5820_s29 + $0x568] sm:$0xff]  ;;  %v3497_v46 = vadd.f32 %v3496_v28, %v1543_v37  ;;  %v3540_v47 = vadd.f32 %v3539_v29, %v1544_v38  ;;  %v3583_v48 = vadd.f32 %v3582_v34, %v1545_v39 }
 0x18c   : > { %v1549_v49 = vld [vmem:[%s5820_s29 + $0x570] sm:$0xff]  ;;  %v1550_v50 = vld [vmem:[%s5820_s29 + $0x578] sm:$0xff]  ;;  %v1551_v51 = vld [vmem:[%s5820_s29 + $0x580] sm:$0xff]  ;;  %v3626_v52 = vadd.f32 %v3625_v35, %v1546_v43  ;;  %v3669_v53 = vadd.f32 %v3668_v36, %v1547_v44  ;;  %v3712_v54 = vadd.f32 %v3711_v40, %v1548_v45 }
 0x18d   : > { %v1552_v55 = vld [vmem:[%s5820_s29 + $0x588] sm:$0xff]  ;;  %v1553_v56 = vld [vmem:[%s5820_s29 + $0x590] sm:$0xff]  ;;  %v1554_v57 = vld [vmem:[%s5820_s29 + $0x598] sm:$0xff]  ;;  %v3498_v58 = vadd.f32 %v3497_v46, %v1551_v51  ;;  %v3755_v59 = vadd.f32 %v3754_v41, %v1549_v49  ;;  %v3798_v60 = vadd.f32 %v3797_v42, %v1550_v50 }
 0x18e   : > { %v1555_v61 = vld [vmem:[%s5820_s29 + $0x5a0] sm:$0xff]  ;;  %v1556_v62 = vld [vmem:[%s5820_s29 + $0x5a8] sm:$0xff]  ;;  %v1557_v63 = vld [vmem:[%s5820_s29 + $0x5b0] sm:$0xff]  ;;  %v3541_v0 = vadd.f32 %v3540_v47, %v1552_v55  ;;  %v3584_v1 = vadd.f32 %v3583_v48, %v1553_v56  ;;  %v3627_v2 = vadd.f32 %v3626_v52, %v1554_v57 }
 0x18f   : > { %v1558_v3 = vld [vmem:[%s5820_s29 + $0x5b8] sm:$0xff]  ;;  %v1559_v4 = vld [vmem:[%s5820_s29 + $0x5c0] sm:$0xff]  ;;  %v1560_v5 = vld [vmem:[%s5820_s29 + $0x5c8] sm:$0xff]  ;;  %v3670_v6 = vadd.f32 %v3669_v53, %v1555_v61  ;;  %v3713_v7 = vadd.f32 %v3712_v54, %v1556_v62  ;;  %v3756_v8 = vadd.f32 %v3755_v59, %v1557_v63 }
 0x190   : > { %v1561_v9 = vld [vmem:[%s5820_s29 + $0x5d0] sm:$0xff]  ;;  %v1562_v10 = vld [vmem:[%s5820_s29 + $0x5d8] sm:$0xff]  ;;  %v1563_v11 = vld [vmem:[%s5820_s29 + $0x5e0] sm:$0xff]  ;;  %v3499_v12 = vadd.f32 %v3498_v58, %v1559_v4  ;;  %v3542_v13 = vadd.f32 %v3541_v0, %v1560_v5  ;;  %v3799_v14 = vadd.f32 %v3798_v60, %v1558_v3 }
 0x191   : > { %v1564_v15 = vld [vmem:[%s5820_s29 + $0x5e8] sm:$0xff]  ;;  %v1565_v16 = vld [vmem:[%s5820_s29 + $0x5f0] sm:$0xff]  ;;  %v1566_v17 = vld [vmem:[%s5820_s29 + $0x5f8] sm:$0xff]  ;;  %v3585_v18 = vadd.f32 %v3584_v1, %v1561_v9  ;;  %v3628_v19 = vadd.f32 %v3627_v2, %v1562_v10  ;;  %v3671_v20 = vadd.f32 %v3670_v6, %v1563_v11 }
 0x192   : > { %v1567_v21 = vld [vmem:[%s5820_s29 + $0x600] sm:$0xff]  ;;  %v1568_v22 = vld [vmem:[%s5820_s29 + $0x608] sm:$0xff]  ;;  %v1569_v23 = vld [vmem:[%s5820_s29 + $0x610] sm:$0xff]  ;;  %v3714_v24 = vadd.f32 %v3713_v7, %v1564_v15  ;;  %v3757_v25 = vadd.f32 %v3756_v8, %v1565_v16  ;;  %v3800_v26 = vadd.f32 %v3799_v14, %v1566_v17 }
 0x193   : > { %v1570_v27 = vld [vmem:[%s5820_s29 + $0x618] sm:$0xff]  ;;  %v1571_v28 = vld [vmem:[%s5820_s29 + $0x620] sm:$0xff]  ;;  %v1572_v29 = vld [vmem:[%s5820_s29 + $0x628] sm:$0xff]  ;;  %v3500_v30 = vadd.f32 %v3499_v12, %v1567_v21  ;;  %v3543_v31 = vadd.f32 %v3542_v13, %v1568_v22  ;;  %v3586_v32 = vadd.f32 %v3585_v18, %v1569_v23 }
 0x194   : > { %v1573_v33 = vld [vmem:[%s5820_s29 + $0x630] sm:$0xff]  ;;  %v1574_v34 = vld [vmem:[%s5820_s29 + $0x638] sm:$0xff]  ;;  %v1575_v35 = vld [vmem:[%s5820_s29 + $0x640] sm:$0xff]  ;;  %v3629_v36 = vadd.f32 %v3628_v19, %v1570_v27  ;;  %v3672_v37 = vadd.f32 %v3671_v20, %v1571_v28  ;;  %v3715_v38 = vadd.f32 %v3714_v24, %v1572_v29 }
 0x195   : > { %v1576_v39 = vld [vmem:[%s5820_s29 + $0x648] sm:$0xff]  ;;  %v1577_v40 = vld [vmem:[%s5820_s29 + $0x650] sm:$0xff]  ;;  %v1578_v41 = vld [vmem:[%s5820_s29 + $0x658] sm:$0xff]  ;;  %v3501_v42 = vadd.f32 %v3500_v30, %v1575_v35  ;;  %v3758_v43 = vadd.f32 %v3757_v25, %v1573_v33  ;;  %v3801_v44 = vadd.f32 %v3800_v26, %v1574_v34 }
 0x196   : > { %v1579_v45 = vld [vmem:[%s5820_s29 + $0x660] sm:$0xff]  ;;  %v1580_v46 = vld [vmem:[%s5820_s29 + $0x668] sm:$0xff]  ;;  %v1581_v47 = vld [vmem:[%s5820_s29 + $0x670] sm:$0xff]  ;;  %v3544_v48 = vadd.f32 %v3543_v31, %v1576_v39  ;;  %v3587_v49 = vadd.f32 %v3586_v32, %v1577_v40  ;;  %v3630_v50 = vadd.f32 %v3629_v36, %v1578_v41 }
 0x197   : > { %v1582_v51 = vld [vmem:[%s5820_s29 + $0x678] sm:$0xff]  ;;  %v1583_v52 = vld [vmem:[%s5820_s29 + $0x680] sm:$0xff]  ;;  %v1584_v53 = vld [vmem:[%s5820_s29 + $0x688] sm:$0xff]  ;;  %v3673_v54 = vadd.f32 %v3672_v37, %v1579_v45  ;;  %v3716_v55 = vadd.f32 %v3715_v38, %v1580_v46  ;;  %v3759_v56 = vadd.f32 %v3758_v43, %v1581_v47 }
 0x198   : > { %v1585_v57 = vld [vmem:[%s5820_s29 + $0x690] sm:$0xff]  ;;  %v1586_v58 = vld [vmem:[%s5820_s29 + $0x698] sm:$0xff]  ;;  %v1587_v59 = vld [vmem:[%s5820_s29 + $0x6a0] sm:$0xff]  ;;  %v3502_v60 = vadd.f32 %v3501_v42, %v1583_v52  ;;  %v3545_v61 = vadd.f32 %v3544_v48, %v1584_v53  ;;  %v3802_v62 = vadd.f32 %v3801_v44, %v1582_v51 }
 0x199   : > { %v1588_v63 = vld [vmem:[%s5820_s29 + $0x6a8] sm:$0xff]  ;;  %v1589_v0 = vld [vmem:[%s5820_s29 + $0x6b0] sm:$0xff]  ;;  %v1590_v1 = vld [vmem:[%s5820_s29 + $0x6b8] sm:$0xff]  ;;  %v3588_v2 = vadd.f32 %v3587_v49, %v1585_v57  ;;  %v3631_v3 = vadd.f32 %v3630_v50, %v1586_v58  ;;  %v3674_v4 = vadd.f32 %v3673_v54, %v1587_v59 }
 0x19a   : > { %v1591_v5 = vld [vmem:[%s5820_s29 + $0x6c0] sm:$0xff]  ;;  %v1592_v6 = vld [vmem:[%s5820_s29 + $0x6c8] sm:$0xff]  ;;  %v1593_v7 = vld [vmem:[%s5820_s29 + $0x6d0] sm:$0xff]  ;;  %v3717_v8 = vadd.f32 %v3716_v55, %v1588_v63  ;;  %v3760_v14 = vadd.f32 %v3759_v56, %v1589_v0  ;;  %v3803_v15 = vadd.f32 %v3802_v62, %v1590_v1 }
 0x19b   : > { %v1594_v9 = vld [vmem:[%s5820_s29 + $0x6d8] sm:$0xff]  ;;  %v1595_v10 = vld [vmem:[%s5820_s29 + $0x6e0] sm:$0xff]  ;;  %v1596_v11 = vld [vmem:[%s5820_s29 + $0x6e8] sm:$0xff]  ;;  %v3503_v12 = vadd.f32 %v3502_v60, %v1591_v5  ;;  %v3546_v13 = vadd.f32 %v3545_v61, %v1592_v6  ;;  %v3589_v19 = vadd.f32 %v3588_v2, %v1593_v7 }
 0x19c   : > { %v1597_v16 = vld [vmem:[%s5820_s29 + $0x6f0] sm:$0xff]  ;;  %v1598_v17 = vld [vmem:[%s5820_s29 + $0x6f8] sm:$0xff]  ;;  %v1599_v18 = vld [vmem:[%s5820_s29 + $0x700] sm:$0xff]  ;;  %v3632_v23 = vadd.f32 %v3631_v3, %v1594_v9  ;;  %v3675_v24 = vadd.f32 %v3674_v4, %v1595_v10  ;;  %v3718_v28 = vadd.f32 %v3717_v8, %v1596_v11 }
 0x19d   : > { %v1600_v20 = vld [vmem:[%s5820_s29 + $0x708] sm:$0xff]  ;;  %v1601_v21 = vld [vmem:[%s5820_s29 + $0x710] sm:$0xff]  ;;  %v3504_v22 = vadd.f32 %v3503_v12, %v1599_v18  ;;  %v1602_v25 = vld [vmem:[%s5820_s29 + $0x718] sm:$0xff]  ;;  %v3761_v32 = vadd.f32 %v3760_v14, %v1597_v16  ;;  %v3804_v33 = vadd.f32 %v3803_v15, %v1598_v17 }
 0x19e   : > { %v1603_v26 = vld [vmem:[%s5820_s29 + $0x720] sm:$0xff]  ;;  %v3547_v27 = vadd.f32 %v3546_v13, %v1600_v20  ;;  %v1604_v29 = vld [vmem:[%s5820_s29 + $0x728] sm:$0xff]  ;;  %v1605_v34 = vld [vmem:[%s5820_s29 + $0x730] sm:$0xff]  ;;  %v3590_v37 = vadd.f32 %v3589_v19, %v1601_v21  ;;  %v3633_v41 = vadd.f32 %v3632_v23, %v1602_v25 }
 0x19f   : > { %v1607_v30 = vld [vmem:[%s5820_s29 + $0x740] sm:$0xff]  ;;  %v1608_v31 = vld [vmem:[%s5820_s29 + $0x748] sm:$0xff]  ;;  %v1606_v35 = vld [vmem:[%s5820_s29 + $0x738] sm:$0xff]  ;;  %v3676_v42 = vadd.f32 %v3675_v24, %v1603_v26  ;;  %v3719_v46 = vadd.f32 %v3718_v28, %v1604_v29  ;;  %v3762_v48 = vadd.f32 %v3761_v32, %v1605_v34 }
 0x1a0   : > { %v3505_v36 = vadd.f32 %v3504_v22, %v1607_v30  ;;  %v1609_v38 = vld [vmem:[%s5820_s29 + $0x750] sm:$0xff]  ;;  %v1610_v39 = vld [vmem:[%s5820_s29 + $0x758] sm:$0xff]  ;;  %v3548_v40 = vadd.f32 %v3547_v27, %v1608_v31  ;;  %v1611_v43 = vld [vmem:[%s5820_s29 + $0x760] sm:$0xff]  ;;  %v3805_v49 = vadd.f32 %v3804_v33, %v1606_v35 }
 0x1a1   : > { %v1615_v44 = vld [vmem:[%s5820_s29 + $0x780] sm:$0xff]  ;;  %v1616_v45 = vld [vmem:[%s5820_s29 + $0x788] sm:$0xff]  ;;  %v1613_v50 = vld [vmem:[%s5820_s29 + $0x770] sm:$0xff]  ;;  %v3591_v53 = vadd.f32 %v3590_v37, %v1609_v38  ;;  %v3634_v57 = vadd.f32 %v3633_v41, %v1610_v39  ;;  %v3677_v58 = vadd.f32 %v3676_v42, %v1611_v43 }
 0x1a2   : > { %v1612_v47 = vld [vmem:[%s5820_s29 + $0x768] sm:$0xff]  ;;  %v1614_v51 = vld [vmem:[%s5820_s29 + $0x778] sm:$0xff]  ;;  %v3506_v52 = vadd.f32 %v3505_v36, %v1615_v44  ;;  %v1617_v54 = vld [vmem:[%s5820_s29 + $0x790] sm:$0xff]  ;;  %v3549_v56 = vadd.f32 %v3548_v40, %v1616_v45  ;;  %v3763_v0 = vadd.f32 %v3762_v48, %v1613_v50  ;;  %v2790_v36 = vlaneseq }
 0x1a3   : > { %v1623_v55 = vld [vmem:[%s5820_s29 + $0x7c0] sm:$0xff]  ;;  %v1618_v59 = vld [vmem:[%s5820_s29 + $0x798] sm:$0xff]  ;;  %v1624_v61 = vld [vmem:[%s5820_s29 + $0x7c8] sm:$0xff]  ;;  %v3720_v62 = vadd.f32 %v3719_v46, %v1612_v47  ;;  %v3806_v1 = vadd.f32 %v3805_v49, %v1614_v51  ;;  %v3592_v5 = vadd.f32 %v3591_v53, %v1617_v54 }
 0x1a4   : > { %v1619_v60 = vld [vmem:[%s5820_s29 + $0x7a0] sm:$0xff]  ;;  %v1620_v63 = vld [vmem:[%s5820_s29 + $0x7a8] sm:$0xff]  ;;  %v1621_v2 = vld [vmem:[%s5820_s29 + $0x7b0] sm:$0xff]  ;;  %v3507_v4 = vadd.f32 %v3506_v52, %v1623_v55  ;;  %v3550_v8 = vadd.f32 %v3549_v56, %v1624_v61  ;;  %v3635_v9 = vadd.f32 %v3634_v57, %v1618_v59  ;;  %v6096_v53 = vshrl.u32 %v2790_v36, 7 }
 0x1a5   : > { %v1622_v3 = vld [vmem:[%s5820_s29 + $0x7b8] sm:$0xff]  ;;  %v1625_v6 = vld [vmem:[%s5820_s29 + $0x7d0] sm:$0xff]  ;;  %v1631_v7 = vld [vmem:[%s5820_s29 + $0x800] sm:$0xff]  ;;  %v3678_v10 = vadd.f32 %v3677_v58, %v1619_v60  ;;  %v3721_v14 = vadd.f32 %v3720_v62, %v1620_v63  ;;  %v3764_v16 = vadd.f32 %v3763_v0, %v1621_v2 }
 0x1a6   : > { %v1626_v11 = vld [vmem:[%s5820_s29 + $0x7d8] sm:$0xff]  ;;  %v1627_v12 = vld [vmem:[%s5820_s29 + $0x7e0] sm:$0xff]  ;;  %v1632_v13 = vld [vmem:[%s5820_s29 + $0x808] sm:$0xff]  ;;  %v3807_v17 = vadd.f32 %v3806_v1, %v1622_v3  ;;  %v3508_v20 = vadd.f32 %v3507_v4, %v1631_v7  ;;  %v3593_v21 = vadd.f32 %v3592_v5, %v1625_v6  ;;  %v6107_v6 = vadd.s32 296, %v6096_v53 }
 0x1a7   : > { %v1628_v15 = vld [vmem:[%s5820_s29 + $0x7e8] sm:$0xff]  ;;  %v1629_v18 = vld [vmem:[%s5820_s29 + $0x7f0] sm:$0xff]  ;;  %v1630_v19 = vld [vmem:[%s5820_s29 + $0x7f8] sm:$0xff]  ;;  %v3551_v24 = vadd.f32 %v3550_v8, %v1632_v13  ;;  %v3636_v25 = vadd.f32 %v3635_v9, %v1626_v11  ;;  %v3679_v26 = vadd.f32 %v3678_v10, %v1627_v12 }
 0x1a8   : > { %v1633_v22 = vld [vmem:[%s5820_s29 + $0x810] sm:$0xff]  ;;  %v1639_v23 = vld [vmem:[%s5820_s29 + $0x840] sm:$0xff]  ;;  %v1634_v27 = vld [vmem:[%s5820_s29 + $0x818] sm:$0xff]  ;;  %v3722_v30 = vadd.f32 %v3721_v14, %v1628_v15  ;;  %v3765_v32 = vadd.f32 %v3764_v16, %v1629_v18  ;;  %v3808_v33 = vadd.f32 %v3807_v17, %v1630_v19  ;;  %vm2868_vm0 = vcmp.lt.s32.totalorder %v6107_v6, 300 }
 0x1a9   : > { %v1635_v28 = vld [vmem:[%s5820_s29 + $0x820] sm:$0xff]  ;;  %v1640_v29 = vld [vmem:[%s5820_s29 + $0x848] sm:$0xff]  ;;  %v1637_v34 = vld [vmem:[%s5820_s29 + $0x830] sm:$0xff]  ;;  %v3509_v37 = vadd.f32 %v3508_v20, %v1639_v23  ;;  %v3594_v38 = vadd.f32 %v3593_v21, %v1633_v22  ;;  %v3637_v42 = vadd.f32 %v3636_v25, %v1634_v27 }
 0x1aa   : > { %v1636_v31 = vld [vmem:[%s5820_s29 + $0x828] sm:$0xff]  ;;  %v1638_v35 = vld [vmem:[%s5820_s29 + $0x838] sm:$0xff]  ;;  %v1641_v39 = vld [vmem:[%s5820_s29 + $0x850] sm:$0xff]  ;;  %v3552_v41 = vadd.f32 %v3551_v24, %v1640_v29  ;;  %v3680_v43 = vadd.f32 %v3679_v26, %v1635_v28  ;;  %v3766_v49 = vadd.f32 %v3765_v32, %v1637_v34 }
 0x1ab   : > { %v1647_v40 = vld [vmem:[%s5820_s29 + $0x880] sm:$0xff]  ;;  %v1642_v44 = vld [vmem:[%s5820_s29 + $0x858] sm:$0xff]  ;;  %v1648_v46 = vld [vmem:[%s5820_s29 + $0x888] sm:$0xff]  ;;  %v3723_v47 = vadd.f32 %v3722_v30, %v1636_v31  ;;  %v3809_v50 = vadd.f32 %v3808_v33, %v1638_v35  ;;  %v3595_v55 = vadd.f32 %v3594_v38, %v1641_v39 }
 0x1ac   : > { %v1643_v45 = vld [vmem:[%s5820_s29 + $0x860] sm:$0xff]  ;;  %v1644_v48 = vld [vmem:[%s5820_s29 + $0x868] sm:$0xff]  ;;  %v1645_v51 = vld [vmem:[%s5820_s29 + $0x870] sm:$0xff]  ;;  %v3510_v54 = vadd.f32 %v3509_v37, %v1647_v40  ;;  %v3553_v58 = vadd.f32 %v3552_v41, %v1648_v46  ;;  %v3638_v59 = vadd.f32 %v3637_v42, %v1642_v44  ;;  %v4520_v42 = vmov 1983009808  }
 0x1ad   : > { %v1646_v52 = vld [vmem:[%s5820_s29 + $0x878] sm:$0xff]  ;;  %v1649_v56 = vld [vmem:[%s5820_s29 + $0x890] sm:$0xff]  ;;  %v1655_v57 = vld [vmem:[%s5820_s29 + $0x8c0] sm:$0xff]  ;;  %v3681_v60 = vadd.f32 %v3680_v43, %v1643_v45  ;;  %v3724_v0 = vadd.f32 %v3723_v47, %v1644_v48  ;;  %v3767_v2 = vadd.f32 %v3766_v49, %v1645_v51  ;;  %v6133_v43 = vunpack.c.l.s4 %v4520_v42 }
 0x1ae   : > { %v1650_v61 = vld [vmem:[%s5820_s29 + $0x898] sm:$0xff]  ;;  %v1651_v62 = vld [vmem:[%s5820_s29 + $0x8a0] sm:$0xff]  ;;  %v1656_v63 = vld [vmem:[%s5820_s29 + $0x8c8] sm:$0xff]  ;;  %v3810_v3 = vadd.f32 %v3809_v50, %v1646_v52  ;;  %v3511_v7 = vadd.f32 %v3510_v54, %v1655_v57  ;;  %v3596_v8 = vadd.f32 %v3595_v55, %v1649_v56 }
 0x1af   : > { %v1652_v1 = vld [vmem:[%s5820_s29 + $0x8a8] sm:$0xff]  ;;  %v1653_v4 = vld [vmem:[%s5820_s29 + $0x8b0] sm:$0xff]  ;;  %v1654_v5 = vld [vmem:[%s5820_s29 + $0x8b8] sm:$0xff]  ;;  %v3554_v12 = vadd.f32 %v3553_v58, %v1656_v63  ;;  %v3639_v13 = vadd.f32 %v3638_v59, %v1650_v61  ;;  %v3682_v14 = vadd.f32 %v3681_v60, %v1651_v62 }
 0x1b0   : > { %v1657_v9 = vld [vmem:[%s5820_s29 + $0x8d0] sm:$0xff]  ;;  %v1658_v10 = vld [vmem:[%s5820_s29 + $0x8d8] sm:$0xff]  ;;  %v1663_v11 = vld [vmem:[%s5820_s29 + $0x900] sm:$0xff]  ;;  %v3725_v18 = vadd.f32 %v3724_v0, %v1652_v1  ;;  %v3768_v21 = vadd.f32 %v3767_v2, %v1653_v4  ;;  %v3811_v22 = vadd.f32 %v3810_v3, %v1654_v5 }
 0x1b1   : > { %v1659_v15 = vld [vmem:[%s5820_s29 + $0x8e0] sm:$0xff]  ;;  %v1664_v16 = vld [vmem:[%s5820_s29 + $0x908] sm:$0xff]  ;;  %v1661_v23 = vld [vmem:[%s5820_s29 + $0x8f0] sm:$0xff]  ;;  %v3512_v26 = vadd.f32 %v3511_v7, %v1663_v11  ;;  %v3597_v27 = vadd.f32 %v3596_v8, %v1657_v9  ;;  %v3640_v33 = vadd.f32 %v3639_v13, %v1658_v10  ;;  %v4185_v11 = vunpack.c.0.s8 %v6133_v43 }
 0x1b2   : > { %v1671_v17 = vld [vmem:[%s5820_s29 + $0x940] sm:$0xff]  ;;  %v1660_v19 = vld [vmem:[%s5820_s29 + $0x8e8] sm:$0xff]  ;;  %v1662_v24 = vld [vmem:[%s5820_s29 + $0x8f8] sm:$0xff]  ;;  %v3555_v32 = vadd.f32 %v3554_v12, %v1664_v16  ;;  %v3683_v34 = vadd.f32 %v3682_v14, %v1659_v15  ;;  %v3769_v47 = vadd.f32 %v3768_v21, %v1661_v23 }
 0x1b3   : > { %v1672_v20 = vld [vmem:[%s5820_s29 + $0x948] sm:$0xff]  ;;  %v1665_v25 = vld [vmem:[%s5820_s29 + $0x910] sm:$0xff]  ;;  %v1666_v28 = vld [vmem:[%s5820_s29 + $0x918] sm:$0xff]  ;;  %v3165_v31 = vsel %vm2868_vm0, %v1671_v17, 0.0  ;;  %v3726_v41 = vadd.f32 %v3725_v18, %v1660_v19  ;;  %v3812_v48 = vadd.f32 %v3811_v22, %v1662_v24 }
 0x1b4   : > { %v1667_v29 = vld [vmem:[%s5820_s29 + $0x920] sm:$0xff]  ;;  %v1668_v30 = vld [vmem:[%s5820_s29 + $0x928] sm:$0xff]  ;;  %v1669_v35 = vld [vmem:[%s5820_s29 + $0x930] sm:$0xff]  ;;  %v3166_v40 = vsel %vm2868_vm0, %v1672_v20, 0.0  ;;  %v6141_v52 = vadd.f32 %v3512_v26, %v3165_v31  ;;  %v3598_v54 = vadd.f32 %v3597_v27, %v1665_v25  ;;  %v3641_v62 = vadd.f32 %v3640_v33, %v1666_v28 }
 0x1b5   : > { %v1670_v36 = vld [vmem:[%s5820_s29 + $0x938] sm:$0xff]  ;;  %v1673_v37 = vld [vmem:[%s5820_s29 + $0x950] sm:$0xff]  ;;  %v1675_v39 = vld [vmem:[%s5820_s29 + $0x960] sm:$0xff]  ;;  %v6150_v61 = vadd.f32 %v3555_v32, %v3166_v40  ;;  %v3684_v63 = vadd.f32 %v3683_v34, %v1667_v29  ;;  %v3727_v10 = vadd.f32 %v3726_v41, %v1668_v30  ;;  %v6175_v19 = vadd.f32 %v3769_v47, %v1669_v35 }
 0x1b6   : > { %v1674_v38 = vld [vmem:[%s5820_s29 + $0x958] sm:$0xff]  ;;  %v1676_v44 = vld [vmem:[%s5820_s29 + $0x968] sm:$0xff]  ;;  %v1677_v45 = vld [vmem:[%s5820_s29 + $0x970] sm:$0xff]  ;;  %v3167_v60 = vsel %vm2868_vm0, %v1673_v37, 0.0  ;;  %v3169_v9 = vsel %vm2868_vm0, %v1675_v39, 0.0  ;;  %v6177_v20 = vadd.f32 %v3812_v48, %v1670_v36  ;;  %v3514_v26 = vrot.slane %v6141_v52, 4 }
 0x1b7   : > { %v1678_v46 = vld [vmem:[%s5820_s29 + $0x978] sm:$0xff]  ;;  %v1679_v49 = vld [vmem:[%s5820_s29 + $0x980] sm:$0xff]  ;;  %v1680_v50 = vld [vmem:[%s5820_s29 + $0x988] sm:$0xff]  ;;  %v3168_v8 = vsel %vm2868_vm0, %v1674_v38, 0.0  ;;  %v3170_v17 = vsel %vm2868_vm0, %v1676_v44, 0.0  ;;  %v6173_v18 = vsel %vm2868_vm0, %v1677_v45, 0.0  ;;  %v6188_v27 = vadd.f32 %v3598_v54, %v3167_v60 }
 0x1b8   : > { %v1687_v51 = vld [vmem:[%s5820_s29 + $0x9c0] sm:$0xff]  ;;  %v1681_v55 = vld [vmem:[%s5820_s29 + $0x990] sm:$0xff]  ;;  %v1682_v56 = vld [vmem:[%s5820_s29 + $0x998] sm:$0xff]  ;;  %v6185_v25 = vsel %vm2868_vm0, %v1678_v46, 0.0  ;;  %v3557_v33 = vrot.slane %v6150_v61, 4  ;;  %v6195_v34 = vadd.f32 %v3641_v62, %v3168_v8  ;;  %v6197_v35 = vadd.f32 %v3684_v63, %v3169_v9 }
 0x1b9   : > { %v1688_v57 = vld [vmem:[%s5820_s29 + $0x9c8] sm:$0xff]  ;;  %v1689_v58 = vld [vmem:[%s5820_s29 + $0x9d0] sm:$0xff]  ;;  %v1690_v59 = vld [vmem:[%s5820_s29 + $0x9d8] sm:$0xff]  ;;  %v3821_v28 = vadd.f32 %v1687_v51, %v1679_v49  ;;  %v6203_v41 = vadd.f32 %v3727_v10, %v3170_v17 }
 0x1ba   : > { %v1683_v0 = vld [vmem:[%s5820_s29 + $0x9a0] sm:$0xff]  ;;  %v1684_v1 = vld [vmem:[%s5820_s29 + $0x9a8] sm:$0xff]  ;;  %v1685_v2 = vld [vmem:[%s5820_s29 + $0x9b0] sm:$0xff]  ;;  %v3864_v36 = vadd.f32 %v1688_v57, %v1680_v50  ;;  %v3907_v44 = vadd.f32 %v1689_v58, %v1681_v55  ;;  %v3950_v45 = vadd.f32 %v1690_v59, %v1682_v56 }
 0x1bb   : > { %v1691_v3 = vld [vmem:[%s5820_s29 + $0x9e0] sm:$0xff]  ;;  %v1692_v4 = vld [vmem:[%s5820_s29 + $0x9e8] sm:$0xff]  ;;  %v1693_v5 = vld [vmem:[%s5820_s29 + $0x9f0] sm:$0xff] }
 0x1bc   : > { %v1695_v7 = vld [vmem:[%s5820_s29 + $0xa00] sm:$0xff]  ;;  %v1686_v12 = vld [vmem:[%s5820_s29 + $0x9b8] sm:$0xff]  ;;  %v1696_v14 = vld [vmem:[%s5820_s29 + $0xa08] sm:$0xff]  ;;  %v3993_v51 = vadd.f32 %v1691_v3, %v1683_v0  ;;  %v4036_v54 = vadd.f32 %v1692_v4, %v1684_v1  ;;  %v4079_v57 = vadd.f32 %v1693_v5, %v1685_v2 }
 0x1bd   : > { %v1694_v13 = vld [vmem:[%s5820_s29 + $0x9f8] sm:$0xff]  ;;  %v1697_v15 = vld [vmem:[%s5820_s29 + $0xa10] sm:$0xff]  ;;  %v1699_v21 = vld [vmem:[%s5820_s29 + $0xa20] sm:$0xff]  ;;  %v3822_v42 = vadd.f32 %v3821_v28, %v1695_v7  ;;  %v3865_v50 = vadd.f32 %v3864_v36, %v1696_v14 }
 0x1be   : > { %v1698_v16 = vld [vmem:[%s5820_s29 + $0xa18] sm:$0xff]  ;;  %v1700_v22 = vld [vmem:[%s5820_s29 + $0xa28] sm:$0xff]  ;;  %v1701_v23 = vld [vmem:[%s5820_s29 + $0xa30] sm:$0xff]  ;;  %v3908_v58 = vadd.f32 %v3907_v44, %v1697_v15  ;;  %v4122_v7 = vadd.f32 %v1694_v13, %v1686_v12  ;;  %v3994_v2 = vadd.f32 %v3993_v51, %v1699_v21 }
 0x1bf   : > { %v1703_v24 = vld [vmem:[%s5820_s29 + $0xa40] sm:$0xff]  ;;  %v1702_v29 = vld [vmem:[%s5820_s29 + $0xa38] sm:$0xff]  ;;  %v1704_v30 = vld [vmem:[%s5820_s29 + $0xa48] sm:$0xff]  ;;  %v3951_v59 = vadd.f32 %v3950_v45, %v1698_v16  ;;  %v4037_v3 = vadd.f32 %v4036_v54, %v1700_v22  ;;  %v4080_v4 = vadd.f32 %v4079_v57, %v1701_v23 }
 0x1c0   : > { %v1705_v31 = vld [vmem:[%s5820_s29 + $0xa50] sm:$0xff]  ;;  %v1706_v32 = vld [vmem:[%s5820_s29 + $0xa58] sm:$0xff]  ;;  %v1707_v37 = vld [vmem:[%s5820_s29 + $0xa60] sm:$0xff]  ;;  %v3823_v56 = vadd.f32 %v3822_v42, %v1703_v24  ;;  %v3866_v1 = vadd.f32 %v3865_v50, %v1704_v30  ;;  %v4123_v24 = vadd.f32 %v4122_v7, %v1702_v29 }
 0x1c1   : > { %v1708_v38 = vld [vmem:[%s5820_s29 + $0xa68] sm:$0xff]  ;;  %v1709_v39 = vld [vmem:[%s5820_s29 + $0xa70] sm:$0xff]  ;;  %v1711_v40 = vld [vmem:[%s5820_s29 + $0xa80] sm:$0xff]  ;;  %v3909_v13 = vadd.f32 %v3908_v58, %v1705_v31  ;;  %v3952_v16 = vadd.f32 %v3951_v59, %v1706_v32  ;;  %v3995_v23 = vadd.f32 %v3994_v2, %v1707_v37 }
 0x1c2   : > { %v1710_v46 = vld [vmem:[%s5820_s29 + $0xa78] sm:$0xff]  ;;  %v1712_v47 = vld [vmem:[%s5820_s29 + $0xa88] sm:$0xff]  ;;  %v1713_v48 = vld [vmem:[%s5820_s29 + $0xa90] sm:$0xff]  ;;  %v3824_v12 = vadd.f32 %v3823_v56, %v1711_v40  ;;  %v4038_v42 = vadd.f32 %v4037_v3, %v1708_v38  ;;  %v4081_v44 = vadd.f32 %v4080_v4, %v1709_v39 }
 0x1c3   : > { %v1714_v49 = vld [vmem:[%s5820_s29 + $0xa98] sm:$0xff]  ;;  %v1715_v60 = vld [vmem:[%s5820_s29 + $0xaa0] sm:$0xff]  ;;  %v1716_v62 = vld [vmem:[%s5820_s29 + $0xaa8] sm:$0xff]  ;;  %v3867_v22 = vadd.f32 %v3866_v1, %v1712_v47  ;;  %v3910_v32 = vadd.f32 %v3909_v13, %v1713_v48  ;;  %v4124_v54 = vadd.f32 %v4123_v24, %v1710_v46 }
 0x1c4   : > { %v1717_v63 = vld [vmem:[%s5820_s29 + $0xab0] sm:$0xff]  ;;  %v1719_v55 = vld [vmem:[%s5820_s29 + $0xac0] sm:$0xff]  ;;  %v1718_v8 = vld [vmem:[%s5820_s29 + $0xab8] sm:$0xff]  ;;  %v3953_v51 = vadd.f32 %v3952_v16, %v1714_v49  ;;  %v3996_v39 = vadd.f32 %v3995_v23, %v1715_v60  ;;  %v4039_v58 = vadd.f32 %v4038_v42, %v1716_v62 }
 0x1c5   : > { %v1720_v9 = vld [vmem:[%s5820_s29 + $0xac8] sm:$0xff]  ;;  %v1721_v10 = vld [vmem:[%s5820_s29 + $0xad0] sm:$0xff]  ;;  %v1722_v0 = vld [vmem:[%s5820_s29 + $0xad8] sm:$0xff]  ;;  %v3825_v29 = vadd.f32 %v3824_v12, %v1719_v55  ;;  %v4082_v59 = vadd.f32 %v4081_v44, %v1717_v63  ;;  %v4125_v3 = vadd.f32 %v4124_v54, %v1718_v8 }
 0x1c6   : > { %v1723_v5 = vld [vmem:[%s5820_s29 + $0xae0] sm:$0xff]  ;;  %v1724_v14 = vld [vmem:[%s5820_s29 + $0xae8] sm:$0xff]  ;;  %v1725_v17 = vld [vmem:[%s5820_s29 + $0xaf0] sm:$0xff]  ;;  %v3868_v38 = vadd.f32 %v3867_v22, %v1720_v9  ;;  %v3911_v49 = vadd.f32 %v3910_v32, %v1721_v10  ;;  %v3954_v2 = vadd.f32 %v3953_v51, %v1722_v0 }
 0x1c7   : > { %v1727_v15 = vld [vmem:[%s5820_s29 + $0xb00] sm:$0xff]  ;;  %v1726_v28 = vld [vmem:[%s5820_s29 + $0xaf8] sm:$0xff]  ;;  %v1728_v36 = vld [vmem:[%s5820_s29 + $0xb08] sm:$0xff]  ;;  %v3997_v63 = vadd.f32 %v3996_v39, %v1723_v5  ;;  %v4040_v13 = vadd.f32 %v4039_v58, %v1724_v14  ;;  %v4083_v16 = vadd.f32 %v4082_v59, %v1725_v17 }
 0x1c8   : > { %v1729_v30 = vld [vmem:[%s5820_s29 + $0xb10] sm:$0xff]  ;;  %v1730_v21 = vld [vmem:[%s5820_s29 + $0xb18] sm:$0xff]  ;;  %v1731_v45 = vld [vmem:[%s5820_s29 + $0xb20] sm:$0xff]  ;;  %v3826_v46 = vadd.f32 %v3825_v29, %v1727_v15  ;;  %v3869_v62 = vadd.f32 %v3868_v38, %v1728_v36  ;;  %v4126_v42 = vadd.f32 %v4125_v3, %v1726_v28 }
 0x1c9   : > { %v1732_v50 = vld [vmem:[%s5820_s29 + $0xb28] sm:$0xff]  ;;  %v1733_v40 = vld [vmem:[%s5820_s29 + $0xb30] sm:$0xff]  ;;  %v1735_v31 = vld [vmem:[%s5820_s29 + $0xb40] sm:$0xff]  ;;  %v3912_v0 = vadd.f32 %v3911_v49, %v1729_v30  ;;  %v3955_v23 = vadd.f32 %v3954_v2, %v1730_v21  ;;  %v3998_v17 = vadd.f32 %v3997_v63, %v1731_v45 }
 0x1ca   : > { %v1734_v57 = vld [vmem:[%s5820_s29 + $0xb38] sm:$0xff]  ;;  %v1736_v56 = vld [vmem:[%s5820_s29 + $0xb48] sm:$0xff]  ;;  %v1737_v47 = vld [vmem:[%s5820_s29 + $0xb50] sm:$0xff]  ;;  %v3827_v8 = vadd.f32 %v3826_v46, %v1735_v31  ;;  %v4041_v32 = vadd.f32 %v4040_v13, %v1732_v50  ;;  %v4084_v51 = vadd.f32 %v4083_v16, %v1733_v40 }
 0x1cb   : > { %v1738_v37 = vld [vmem:[%s5820_s29 + $0xb58] sm:$0xff]  ;;  %v1739_v7 = vld [vmem:[%s5820_s29 + $0xb60] sm:$0xff]  ;;  %v1740_v1 = vld [vmem:[%s5820_s29 + $0xb68] sm:$0xff]  ;;  %v3870_v14 = vadd.f32 %v3869_v62, %v1736_v56  ;;  %v3913_v21 = vadd.f32 %v3912_v0, %v1737_v47  ;;  %v4127_v58 = vadd.f32 %v4126_v42, %v1734_v57 }
 0x1cc   : > { %v1741_v55 = vld [vmem:[%s5820_s29 + $0xb70] sm:$0xff]  ;;  %v1743_v48 = vld [vmem:[%s5820_s29 + $0xb80] sm:$0xff]  ;;  %v1742_v4 = vld [vmem:[%s5820_s29 + $0xb78] sm:$0xff]  ;;  %v3956_v39 = vadd.f32 %v3955_v23, %v1738_v37  ;;  %v3999_v40 = vadd.f32 %v3998_v17, %v1739_v7  ;;  %v4042_v49 = vadd.f32 %v4041_v32, %v1740_v1 }
 0x1cd   : > { %v1744_v12 = vld [vmem:[%s5820_s29 + $0xb88] sm:$0xff]  ;;  %v1745_v9 = vld [vmem:[%s5820_s29 + $0xb90] sm:$0xff]  ;;  %v1746_v60 = vld [vmem:[%s5820_s29 + $0xb98] sm:$0xff]  ;;  %v3828_v28 = vadd.f32 %v3827_v8, %v1743_v48  ;;  %v4085_v2 = vadd.f32 %v4084_v51, %v1741_v55  ;;  %v4128_v13 = vadd.f32 %v4127_v58, %v1742_v4 }
 0x1ce   : > { %v1747_v24 = vld [vmem:[%s5820_s29 + $0xba0] sm:$0xff]  ;;  %v1748_v22 = vld [vmem:[%s5820_s29 + $0xba8] sm:$0xff]  ;;  %v1749_v15 = vld [vmem:[%s5820_s29 + $0xbb0] sm:$0xff]  ;;  %v3871_v50 = vadd.f32 %v3870_v14, %v1744_v12  ;;  %v3914_v37 = vadd.f32 %v3913_v21, %v1745_v9  ;;  %v3957_v63 = vadd.f32 %v3956_v39, %v1746_v60 }
 0x1cf   : > { %v1751_v10 = vld [vmem:[%s5820_s29 + $0xbc0] sm:$0xff]  ;;  %v1750_v44 = vld [vmem:[%s5820_s29 + $0xbb8] sm:$0xff]  ;;  %v1752_v29 = vld [vmem:[%s5820_s29 + $0xbc8] sm:$0xff]  ;;  %v4000_v55 = vadd.f32 %v3999_v40, %v1747_v24  ;;  %v4043_v0 = vadd.f32 %v4042_v49, %v1748_v22  ;;  %v4086_v23 = vadd.f32 %v4085_v2, %v1749_v15 }
 0x1d0   : > { %v1753_v36 = vld [vmem:[%s5820_s29 + $0xbd0] sm:$0xff]  ;;  %v1754_v5 = vld [vmem:[%s5820_s29 + $0xbd8] sm:$0xff]  ;;  %v1755_v54 = vld [vmem:[%s5820_s29 + $0xbe0] sm:$0xff]  ;;  %v3829_v57 = vadd.f32 %v3828_v28, %v1751_v10  ;;  %v3872_v1 = vadd.f32 %v3871_v50, %v1752_v29  ;;  %v4129_v17 = vadd.f32 %v4128_v13, %v1750_v44 }
 0x1d1   : > { %v1756_v38 = vld [vmem:[%s5820_s29 + $0xbe8] sm:$0xff]  ;;  %v1757_v31 = vld [vmem:[%s5820_s29 + $0xbf0] sm:$0xff]  ;;  %v1759_v30 = vld [vmem:[%s5820_s29 + $0xc00] sm:$0xff]  ;;  %v3915_v60 = vadd.f32 %v3914_v37, %v1753_v36  ;;  %v3958_v4 = vadd.f32 %v3957_v63, %v1754_v5  ;;  %v4001_v24 = vadd.f32 %v4000_v55, %v1755_v54 }
 0x1d2   : > { %v1758_v59 = vld [vmem:[%s5820_s29 + $0xbf8] sm:$0xff]  ;;  %v1760_v46 = vld [vmem:[%s5820_s29 + $0xc08] sm:$0xff]  ;;  %v1761_v56 = vld [vmem:[%s5820_s29 + $0xc10] sm:$0xff]  ;;  %v3830_v9 = vadd.f32 %v3829_v57, %v1759_v30  ;;  %v4044_v22 = vadd.f32 %v4043_v0, %v1756_v38  ;;  %v4087_v15 = vadd.f32 %v4086_v23, %v1757_v31 }
 0x1d3   : > { %v1762_v45 = vld [vmem:[%s5820_s29 + $0xc18] sm:$0xff]  ;;  %v1763_v3 = vld [vmem:[%s5820_s29 + $0xc20] sm:$0xff]  ;;  %v1764_v62 = vld [vmem:[%s5820_s29 + $0xc28] sm:$0xff]  ;;  %v3873_v29 = vadd.f32 %v3872_v1, %v1760_v46  ;;  %v3916_v36 = vadd.f32 %v3915_v60, %v1761_v56  ;;  %v4130_v44 = vadd.f32 %v4129_v17, %v1758_v59 }
 0x1d4   : > { %v1765_v48 = vld [vmem:[%s5820_s29 + $0xc30] sm:$0xff]  ;;  %v1767_v47 = vld [vmem:[%s5820_s29 + $0xc40] sm:$0xff]  ;;  %v1766_v16 = vld [vmem:[%s5820_s29 + $0xc38] sm:$0xff]  ;;  %v3959_v5 = vadd.f32 %v3958_v4, %v1762_v45  ;;  %v4002_v54 = vadd.f32 %v4001_v24, %v1763_v3  ;;  %v4045_v38 = vadd.f32 %v4044_v22, %v1764_v62 }
 0x1d5   : > { %v1768_v8 = vld [vmem:[%s5820_s29 + $0xc48] sm:$0xff]  ;;  %v1769_v12 = vld [vmem:[%s5820_s29 + $0xc50] sm:$0xff]  ;;  %v1770_v7 = vld [vmem:[%s5820_s29 + $0xc58] sm:$0xff]  ;;  %v3831_v30 = vadd.f32 %v3830_v9, %v1767_v47  ;;  %v4088_v31 = vadd.f32 %v4087_v15, %v1765_v48  ;;  %v4131_v59 = vadd.f32 %v4130_v44, %v1766_v16 }
 0x1d6   : > { %v1771_v42 = vld [vmem:[%s5820_s29 + $0xc60] sm:$0xff]  ;;  %v1772_v14 = vld [vmem:[%s5820_s29 + $0xc68] sm:$0xff]  ;;  %v1773_v10 = vld [vmem:[%s5820_s29 + $0xc70] sm:$0xff]  ;;  %v3874_v46 = vadd.f32 %v3873_v29, %v1768_v8  ;;  %v3917_v56 = vadd.f32 %v3916_v36, %v1769_v12  ;;  %v3960_v45 = vadd.f32 %v3959_v5, %v1770_v7 }
 0x1d7   : > { %v1774_v32 = vld [vmem:[%s5820_s29 + $0xc78] sm:$0xff]  ;;  %v1775_v51 = vld [vmem:[%s5820_s29 + $0xc80] sm:$0xff]  ;;  %v1776_v28 = vld [vmem:[%s5820_s29 + $0xc88] sm:$0xff]  ;;  %v4003_v3 = vadd.f32 %v4002_v54, %v1771_v42  ;;  %v4046_v62 = vadd.f32 %v4045_v38, %v1772_v14  ;;  %v4089_v48 = vadd.f32 %v4088_v31, %v1773_v10 }
 0x1d8   : > { %v1777_v21 = vld [vmem:[%s5820_s29 + $0xc90] sm:$0xff]  ;;  %v1778_v39 = vld [vmem:[%s5820_s29 + $0xc98] sm:$0xff]  ;;  %v1779_v58 = vld [vmem:[%s5820_s29 + $0xca0] sm:$0xff]  ;;  %v3832_v47 = vadd.f32 %v3831_v30, %v1775_v51  ;;  %v3875_v8 = vadd.f32 %v3874_v46, %v1776_v28  ;;  %v4132_v16 = vadd.f32 %v4131_v59, %v1774_v32 }
 0x1d9   : > { %v1780_v50 = vld [vmem:[%s5820_s29 + $0xca8] sm:$0xff]  ;;  %v1781_v40 = vld [vmem:[%s5820_s29 + $0xcb0] sm:$0xff]  ;;  %v1782_v49 = vld [vmem:[%s5820_s29 + $0xcb8] sm:$0xff]  ;;  %v3918_v12 = vadd.f32 %v3917_v56, %v1777_v21  ;;  %v3961_v7 = vadd.f32 %v3960_v45, %v1778_v39  ;;  %v4004_v42 = vadd.f32 %v4003_v3, %v1779_v58  ;;  %v6306_v3 = vadd.f32 %v6175_v19, %v6173_v18 }
 0x1da   : > { %v1783_v2 = vld [vmem:[%s5820_s29 + $0xcc0] sm:$0xff]  ;;  %v1784_v57 = vld [vmem:[%s5820_s29 + $0xcc8] sm:$0xff]  ;;  %v1785_v37 = vld [vmem:[%s5820_s29 + $0xcd0] sm:$0xff]  ;;  %v4047_v14 = vadd.f32 %v4046_v62, %v1780_v50  ;;  %v4090_v10 = vadd.f32 %v4089_v48, %v1781_v40  ;;  %v4133_v32 = vadd.f32 %v4132_v16, %v1782_v49 }
 0x1db   : > { %v1786_v63 = vld [vmem:[%s5820_s29 + $0xcd8] sm:$0xff]  ;;  %v1787_v13 = vld [vmem:[%s5820_s29 + $0xce0] sm:$0xff]  ;;  %v1788_v1 = vld [vmem:[%s5820_s29 + $0xce8] sm:$0xff]  ;;  %v3833_v9 = vadd.f32 %v3832_v47, %v1783_v2  ;;  %v3876_v51 = vadd.f32 %v3875_v8, %v1784_v57  ;;  %v3919_v15 = vadd.f32 %v3918_v12, %v1785_v37 }
 0x1dc   : > { %v1789_v55 = vld [vmem:[%s5820_s29 + $0xcf0] sm:$0xff]  ;;  %v1790_v0 = vld [vmem:[%s5820_s29 + $0xcf8] sm:$0xff]  ;;  %v1791_v23 = vld [vmem:[%s5820_s29 + $0xd00] sm:$0xff]  ;;  %v3962_v21 = vadd.f32 %v3961_v7, %v1786_v63  ;;  %v4005_v58 = vadd.f32 %v4004_v42, %v1787_v13  ;;  %v4048_v44 = vadd.f32 %v4047_v14, %v1788_v1 }
 0x1dd   : > { %v1792_v60 = vld [vmem:[%s5820_s29 + $0xd08] sm:$0xff]  ;;  %v1793_v4 = vld [vmem:[%s5820_s29 + $0xd10] sm:$0xff]  ;;  %v1794_v17 = vld [vmem:[%s5820_s29 + $0xd18] sm:$0xff]  ;;  %v3834_v22 = vadd.f32 %v3833_v9, %v1791_v23  ;;  %v4091_v50 = vadd.f32 %v4090_v10, %v1789_v55  ;;  %v4134_v49 = vadd.f32 %v4133_v32, %v1790_v0 }
 0x1de   : > { %v1795_v28 = vld [vmem:[%s5820_s29 + $0xd20] sm:$0xff]  ;;  %v1796_v29 = vld [vmem:[%s5820_s29 + $0xd28] sm:$0xff]  ;;  %v1797_v24 = vld [vmem:[%s5820_s29 + $0xd30] sm:$0xff]  ;;  %v3877_v5 = vadd.f32 %v3876_v51, %v1792_v60  ;;  %v3920_v31 = vadd.f32 %v3919_v15, %v1793_v4  ;;  %v3963_v2 = vadd.f32 %v3962_v21, %v1794_v17 }
 0x1df   : > { %v1798_v39 = vld [vmem:[%s5820_s29 + $0xd38] sm:$0xff]  ;;  %v1799_v30 = vld [vmem:[%s5820_s29 + $0xd40] sm:$0xff]  ;;  %v1800_v36 = vld [vmem:[%s5820_s29 + $0xd48] sm:$0xff]  ;;  %v4006_v45 = vadd.f32 %v4005_v58, %v1795_v28  ;;  %v4049_v59 = vadd.f32 %v4048_v44, %v1796_v29  ;;  %v4092_v63 = vadd.f32 %v4091_v50, %v1797_v24  ;;  %v6320_v24 = vadd.f32 %v3514_v26, %v6141_v52 }
 0x1e0   : > { %v1801_v40 = vld [vmem:[%s5820_s29 + $0xd50] sm:$0xff]  ;;  %v1802_v46 = vld [vmem:[%s5820_s29 + $0xd58] sm:$0xff]  ;;  %v1803_v54 = vld [vmem:[%s5820_s29 + $0xd60] sm:$0xff]  ;;  %v3835_v38 = vadd.f32 %v3834_v22, %v1799_v30  ;;  %v3878_v56 = vadd.f32 %v3877_v5, %v1800_v36  ;;  %v4135_v55 = vadd.f32 %v4134_v49, %v1798_v39  ;;  %v3600_v26 = vrot.slane %v6188_v27, 4 }
 0x1e1   : > { %v1804_v57 = vld [vmem:[%s5820_s29 + $0xd68] sm:$0xff]  ;;  %v1805_v37 = vld [vmem:[%s5820_s29 + $0xd70] sm:$0xff]  ;;  %v1806_v47 = vld [vmem:[%s5820_s29 + $0xd78] sm:$0xff]  ;;  %v3921_v62 = vadd.f32 %v3920_v31, %v1801_v40  ;;  %v3964_v48 = vadd.f32 %v3963_v2, %v1802_v46  ;;  %v4007_v16 = vadd.f32 %v4006_v45, %v1803_v54 }
 0x1e2   : > { %v1807_v13 = vld [vmem:[%s5820_s29 + $0xd80] sm:$0xff]  ;;  %v1808_v1 = vld [vmem:[%s5820_s29 + $0xd88] sm:$0xff]  ;;  %v1809_v8 = vld [vmem:[%s5820_s29 + $0xd90] sm:$0xff]  ;;  %v4050_v60 = vadd.f32 %v4049_v59, %v1804_v57  ;;  %v4093_v42 = vadd.f32 %v4092_v63, %v1805_v37  ;;  %v4136_v14 = vadd.f32 %v4135_v55, %v1806_v47  ;;  %v3643_v57 = vrot.slane %v6195_v34, 4 }
 0x1e3   : > { %v1810_v0 = vld [vmem:[%s5820_s29 + $0xd98] sm:$0xff]  ;;  %v1811_v23 = vld [vmem:[%s5820_s29 + $0xda0] sm:$0xff]  ;;  %v1812_v9 = vld [vmem:[%s5820_s29 + $0xda8] sm:$0xff]  ;;  %v3836_v12 = vadd.f32 %v3835_v38, %v1807_v13  ;;  %v3879_v7 = vadd.f32 %v3878_v56, %v1808_v1  ;;  %v3922_v19 = vadd.f32 %v3921_v62, %v1809_v8 }
 0x1e4   : > { %v1813_v4 = vld [vmem:[%s5820_s29 + $0xdb0] sm:$0xff]  ;;  %v1814_v17 = vld [vmem:[%s5820_s29 + $0xdb8] sm:$0xff]  ;;  %v1815_v18 = vld [vmem:[%s5820_s29 + $0xdc0] sm:$0xff]  ;;  %v3965_v51 = vadd.f32 %v3964_v48, %v1810_v0  ;;  %v4008_v15 = vadd.f32 %v4007_v16, %v1811_v23  ;;  %v4051_v21 = vadd.f32 %v4050_v60, %v1812_v9  ;;  %v6342_v23 = vadd.f32 %v3557_v33, %v6150_v61 }
 0x1e5   : > { %v1816_v10 = vld [vmem:[%s5820_s29 + $0xdc8] sm:$0xff]  ;;  %v1817_v28 = vld [vmem:[%s5820_s29 + $0xdd0] sm:$0xff]  ;;  %v1818_v29 = vld [vmem:[%s5820_s29 + $0xdd8] sm:$0xff]  ;;  %v3837_v22 = vadd.f32 %v3836_v12, %v1815_v18  ;;  %v4094_v44 = vadd.f32 %v4093_v42, %v1813_v4  ;;  %v4137_v38 = vadd.f32 %v4136_v14, %v1814_v17  ;;  %v6346_v9 = vadd.f32 %v6177_v20, %v6185_v25 }
 0x1e6   : > { %v1819_v32 = vld [vmem:[%s5820_s29 + $0xde0] sm:$0xff]  ;;  %v1820_v39 = vld [vmem:[%s5820_s29 + $0xde8] sm:$0xff]  ;;  %v1821_v30 = vld [vmem:[%s5820_s29 + $0xdf0] sm:$0xff]  ;;  %v3880_v36 = vadd.f32 %v3879_v7, %v1816_v10  ;;  %v3923_v5 = vadd.f32 %v3922_v19, %v1817_v28  ;;  %v3966_v58 = vadd.f32 %v3965_v51, %v1818_v29  ;;  %v3686_v20 = vrot.slane %v6197_v35, 4 }
 0x1e7   : > { %v1822_v50 = vld [vmem:[%s5820_s29 + $0xdf8] sm:$0xff]  ;;  %v1823_v40 = vld [vmem:[%s5820_s29 + $0xe00] sm:$0xff]  ;;  %v1824_v52 = vld [vmem:[%s5820_s29 + $0xe08] sm:$0xff]  ;;  %v4009_v46 = vadd.f32 %v4008_v15, %v1819_v32  ;;  %v4052_v54 = vadd.f32 %v4051_v21, %v1820_v39  ;;  %v4095_v56 = vadd.f32 %v4094_v44, %v1821_v30  ;;  %v3729_v15 = vrot.slane %v6203_v41, 4 }
 0x1e8   : > { %v1825_v31 = vld [vmem:[%s5820_s29 + $0xe10] sm:$0xff]  ;;  %v1826_v2 = vld [vmem:[%s5820_s29 + $0xe18] sm:$0xff]  ;;  %v1827_v49 = vld [vmem:[%s5820_s29 + $0xe20] sm:$0xff]  ;;  %v3838_v37 = vadd.f32 %v3837_v22, %v1823_v40  ;;  %v3881_v47 = vadd.f32 %v3880_v36, %v1824_v52  ;;  %v4138_v62 = vadd.f32 %v4137_v38, %v1822_v50  ;;  %v3516_v38 = vrot.slane %v6320_v24, 2 }
 0x1e9   : > { %v1828_v45 = vld [vmem:[%s5820_s29 + $0xe28] sm:$0xff]  ;;  %v1829_v59 = vld [vmem:[%s5820_s29 + $0xe30] sm:$0xff]  ;;  %v1830_v63 = vld [vmem:[%s5820_s29 + $0xe38] sm:$0xff]  ;;  %v3924_v13 = vadd.f32 %v3923_v5, %v1825_v31  ;;  %v3967_v1 = vadd.f32 %v3966_v58, %v1826_v2  ;;  %v4010_v8 = vadd.f32 %v4009_v46, %v1827_v49  ;;  %v3772_v58 = vrot.slane %v6306_v3, 4 }
 0x1ea   : > { %v1831_v48 = vld [vmem:[%s5820_s29 + $0xe40] sm:$0xff]  ;;  %v1832_v55 = vld [vmem:[%s5820_s29 + $0xe48] sm:$0xff]  ;;  %v1833_v0 = vld [vmem:[%s5820_s29 + $0xe50] sm:$0xff]  ;;  %v4053_v12 = vadd.f32 %v4052_v54, %v1828_v45  ;;  %v4096_v7 = vadd.f32 %v4095_v56, %v1829_v59  ;;  %v4139_v51 = vadd.f32 %v4138_v62, %v1830_v63  ;;  %v6373_v45 = vadd.f32 %v3600_v26, %v6188_v27 }
 0x1eb   : > { %v1834_v16 = vld [vmem:[%s5820_s29 + $0xe58] sm:$0xff]  ;;  %v1835_v60 = vld [vmem:[%s5820_s29 + $0xe60] sm:$0xff]  ;;  %v1836_v4 = vld [vmem:[%s5820_s29 + $0xe68] sm:$0xff]  ;;  %v3839_v17 = vadd.f32 %v3838_v37, %v1831_v48  ;;  %v3882_v18 = vadd.f32 %v3881_v47, %v1832_v55  ;;  %v3925_v19 = vadd.f32 %v3924_v13, %v1833_v0  ;;  %v6381_v48 = vadd.f32 %v3643_v57, %v6195_v34 }
 0x1ec   : > { %v1837_v61 = vld [vmem:[%s5820_s29 + $0xe70] sm:$0xff]  ;;  %v1838_v33 = vld [vmem:[%s5820_s29 + $0xe78] sm:$0xff]  ;;  %v1839_v42 = vld [vmem:[%s5820_s29 + $0xe80] sm:$0xff]  ;;  %v3968_v25 = vadd.f32 %v3967_v1, %v1834_v16  ;;  %v4011_v14 = vadd.f32 %v4010_v8, %v1835_v60  ;;  %v4054_v10 = vadd.f32 %v4053_v12, %v1836_v4  ;;  %v3815_v16 = vrot.slane %v6346_v9, 4 }
 0x1ed   : > { %v1840_v28 = vld [vmem:[%s5820_s29 + $0xe88] sm:$0xff]  ;;  %v1841_v29 = vld [vmem:[%s5820_s29 + $0xe90] sm:$0xff]  ;;  %v1842_v22 = vld [vmem:[%s5820_s29 + $0xe98] sm:$0xff]  ;;  %v3840_v21 = vadd.f32 %v3839_v17, %v1839_v42  ;;  %v4097_v32 = vadd.f32 %v4096_v7, %v1837_v61  ;;  %v4140_v39 = vadd.f32 %v4139_v51, %v1838_v33 }
 0x1ee   : > { %v1843_v30 = vld [vmem:[%s5820_s29 + $0xea0] sm:$0xff]  ;;  %v1844_v36 = vld [vmem:[%s5820_s29 + $0xea8] sm:$0xff]  ;;  %v1845_v5 = vld [vmem:[%s5820_s29 + $0xeb0] sm:$0xff]  ;;  %v3883_v44 = vadd.f32 %v3882_v18, %v1840_v28  ;;  %v3926_v50 = vadd.f32 %v3925_v19, %v1841_v29  ;;  %v3969_v40 = vadd.f32 %v3968_v25, %v1842_v22  ;;  %v3559_v19 = vrot.slane %v6342_v23, 2 }
 0x1ef   : > { %v1846_v52 = vld [vmem:[%s5820_s29 + $0xeb8] sm:$0xff]  ;;  %v1847_v46 = vld [vmem:[%s5820_s29 + $0xec0] sm:$0xff]  ;;  %v1848_v54 = vld [vmem:[%s5820_s29 + $0xec8] sm:$0xff]  ;;  %v4012_v31 = vadd.f32 %v4011_v14, %v1843_v30  ;;  %v4055_v2 = vadd.f32 %v4054_v10, %v1844_v36  ;;  %v4098_v49 = vadd.f32 %v4097_v32, %v1845_v5  ;;  %v6395_v10 = vadd.f32 %v3686_v20, %v6197_v35 }
 0x1f0   : > { %v1849_v37 = vld [vmem:[%s5820_s29 + $0xed0] sm:$0xff]  ;;  %v1850_v47 = vld [vmem:[%s5820_s29 + $0xed8] sm:$0xff]  ;;  %v1851_v56 = vld [vmem:[%s5820_s29 + $0xee0] sm:$0xff]  ;;  %v3841_v59 = vadd.f32 %v3840_v21, %v1847_v46  ;;  %v3884_v63 = vadd.f32 %v3883_v44, %v1848_v54  ;;  %v4141_v13 = vadd.f32 %v4140_v39, %v1846_v52  ;;  %v6401_v30 = vadd.f32 %v3729_v15, %v6203_v41 }
 0x1f1   : > { %v1852_v1 = vld [vmem:[%s5820_s29 + $0xee8] sm:$0xff]  ;;  %v1853_v8 = vld [vmem:[%s5820_s29 + $0xef0] sm:$0xff]  ;;  %v1854_v62 = vld [vmem:[%s5820_s29 + $0xef8] sm:$0xff]  ;;  %v3927_v55 = vadd.f32 %v3926_v50, %v1849_v37  ;;  %v3970_v0 = vadd.f32 %v3969_v40, %v1850_v47  ;;  %v4013_v12 = vadd.f32 %v4012_v31, %v1851_v56  ;;  %v6407_v40 = vadd.f32 %v3772_v58, %v6306_v3 }
 0x1f2   : > { %v1855_v27 = vld [vmem:[%s5820_s29 + $0xf00] sm:$0xff]  ;;  %v1856_v26 = vld [vmem:[%s5820_s29 + $0xf08] sm:$0xff]  ;;  %v1857_v7 = vld [vmem:[%s5820_s29 + $0xf10] sm:$0xff]  ;;  %v4056_v60 = vadd.f32 %v4055_v2, %v1852_v1  ;;  %v4099_v4 = vadd.f32 %v4098_v49, %v1853_v8  ;;  %v4142_v17 = vadd.f32 %v4141_v13, %v1854_v62  ;;  %v6413_v2 = vadd.f32 %v3516_v38, %v6320_v24 }
 0x1f3   : > { %v1858_v18 = vld [vmem:[%s5820_s29 + $0xf18] sm:$0xff]  ;;  %v1859_v34 = vld [vmem:[%s5820_s29 + $0xf20] sm:$0xff]  ;;  %v1860_v57 = vld [vmem:[%s5820_s29 + $0xf28] sm:$0xff]  ;;  %v3842_v51 = vadd.f32 %v3841_v59, %v1855_v27  ;;  %v3885_v61 = vadd.f32 %v3884_v63, %v1856_v26  ;;  %v3928_v33 = vadd.f32 %v3927_v55, %v1857_v7  ;;  %v3602_v59 = vrot.slane %v6373_v45, 2 }
 0x1f4   : > { %v1861_v42 = vld [vmem:[%s5820_s29 + $0xf30] sm:$0xff]  ;;  %v1862_v25 = vld [vmem:[%s5820_s29 + $0xf38] sm:$0xff]  ;;  %v1863_v14 = vld [vmem:[%s5820_s29 + $0xf40] sm:$0xff]  ;;  %v3971_v28 = vadd.f32 %v3970_v0, %v1858_v18  ;;  %v4014_v29 = vadd.f32 %v4013_v12, %v1859_v34  ;;  %v4057_v22 = vadd.f32 %v4056_v60, %v1860_v57  ;;  %v3645_v62 = vrot.slane %v6381_v48, 2 }
 0x1f5   : > { %v1864_v21 = vld [vmem:[%s5820_s29 + $0xf48] sm:$0xff]  ;;  %v1865_v32 = vld [vmem:[%s5820_s29 + $0xf50] sm:$0xff]  ;;  %v1866_v39 = vld [vmem:[%s5820_s29 + $0xf58] sm:$0xff]  ;;  %v3843_v36 = vadd.f32 %v3842_v51, %v1863_v14  ;;  %v4100_v5 = vadd.f32 %v4099_v4, %v1861_v42  ;;  %v4143_v44 = vadd.f32 %v4142_v17, %v1862_v25  ;;  %v6427_v60 = vadd.f32 %v3815_v16, %v6346_v9 }
 0x1f6   : > { %v1867_v50 = vld [vmem:[%s5820_s29 + $0xf60] sm:$0xff]  ;;  %v1868_v35 = vld [vmem:[%s5820_s29 + $0xf68] sm:$0xff]  ;;  %v1869_v20 = vld [vmem:[%s5820_s29 + $0xf70] sm:$0xff]  ;;  %v3886_v52 = vadd.f32 %v3885_v61, %v1864_v21  ;;  %v3929_v46 = vadd.f32 %v3928_v33, %v1865_v32  ;;  %v3972_v54 = vadd.f32 %v3971_v28, %v1866_v39  ;;  %v6433_v61 = vadd.f32 %v3559_v19, %v6342_v23 }
 0x1f7   : > { %v1870_v31 = vld [vmem:[%s5820_s29 + $0xf78] sm:$0xff]  ;;  %v1871_v41 = vld [vmem:[%s5820_s29 + $0xf80] sm:$0xff]  ;;  %v1872_v15 = vld [vmem:[%s5820_s29 + $0xf88] sm:$0xff]  ;;  %v4015_v49 = vadd.f32 %v4014_v29, %v1867_v50  ;;  %v4058_v37 = vadd.f32 %v4057_v22, %v1868_v35  ;;  %v4101_v47 = vadd.f32 %v4100_v5, %v1869_v20  ;;  %v3688_v28 = vrot.slane %v6395_v10, 2 }
 0x1f8   : > { %v1873_v56 = vld [vmem:[%s5820_s29 + $0xf90] sm:$0xff]  ;;  %v1874_v3 = vld [vmem:[%s5820_s29 + $0xf98] sm:$0xff]  ;;  %v1875_v58 = vld [vmem:[%s5820_s29 + $0xfa0] sm:$0xff]  ;;  %v3844_v63 = vadd.f32 %v3843_v36, %v1871_v41  ;;  %v3887_v13 = vadd.f32 %v3886_v52, %v1872_v15  ;;  %v4144_v1 = vadd.f32 %v4143_v44, %v1870_v31  ;;  %v3731_v39 = vrot.slane %v6401_v30, 2 }
 0x1f9   : > { %v1876_v8 = vld [vmem:[%s5820_s29 + $0xfa8] sm:$0xff]  ;;  %v1877_v24 = vld [vmem:[%s5820_s29 + $0xfb0] sm:$0xff]  ;;  %v1878_v38 = vld [vmem:[%s5820_s29 + $0xfb8] sm:$0xff]  ;;  %v3930_v55 = vadd.f32 %v3929_v46, %v1873_v56  ;;  %v3973_v0 = vadd.f32 %v3972_v54, %v1874_v3  ;;  %v4016_v12 = vadd.f32 %v4015_v49, %v1875_v58  ;;  %v3774_v52 = vrot.slane %v6407_v40, 2 }
 0x1fa   : > { %v1879_v27 = vld [vmem:[%s5820_s29 + $0xfc0] sm:$0xff]  ;;  %v1880_v26 = vld [vmem:[%s5820_s29 + $0xfc8] sm:$0xff]  ;;  %v1881_v7 = vld [vmem:[%s5820_s29 + $0xfd0] sm:$0xff]  ;;  %v4059_v4 = vadd.f32 %v4058_v37, %v1876_v8  ;;  %v4102_v17 = vadd.f32 %v4101_v47, %v1877_v24  ;;  %v4145_v18 = vadd.f32 %v4144_v1, %v1878_v38  ;;  %v3518_v37 = vrot.slane %v6413_v2, 1 }
 0x1fb   : > { %v1882_v34 = vld [vmem:[%s5820_s29 + $0xfd8] sm:$0xff]  ;;  %v1883_v57 = vld [vmem:[%s5820_s29 + $0xfe0] sm:$0xff]  ;;  %v1884_v51 = vld [vmem:[%s5820_s29 + $0xfe8] sm:$0xff]  ;;  %v3845_v33 = vadd.f32 %v3844_v63, %v1879_v27  ;;  %v3888_v42 = vadd.f32 %v3887_v13, %v1880_v26  ;;  %v3931_v25 = vadd.f32 %v3930_v55, %v1881_v7  ;;  %v6455_v1 = vadd.f32 %v3602_v59, %v6373_v45 }
 0x1fc   : > { %v1885_v14 = vld [vmem:[%s5820_s29 + $0xff0] sm:$0xff]  ;;  %v1886_v9 = vld [vmem:[%s5820_s29 + $0xff8] sm:$0xff]  ;;  %v1887_v16 = vld [vmem:[%s5820_s29 + $0x1000] sm:$0xff]  ;;  %v3974_v29 = vadd.f32 %v3973_v0, %v1882_v34  ;;  %v4017_v22 = vadd.f32 %v4016_v12, %v1883_v57  ;;  %v4060_v21 = vadd.f32 %v4059_v4, %v1884_v51  ;;  %v6461_v27 = vadd.f32 %v3645_v62, %v6381_v48 }
 0x1fd   : > { %v1888_v32 = vld [vmem:[%s5820_s29 + $0x1008] sm:$0xff]  ;;  %v1889_v23 = vld [vmem:[%s5820_s29 + $0x1010] sm:$0xff]  ;;  %v1890_v19 = vld [vmem:[%s5820_s29 + $0x1018] sm:$0xff]  ;;  %v3846_v36 = vadd.f32 %v3845_v33, %v1887_v16  ;;  %v4103_v5 = vadd.f32 %v4102_v17, %v1885_v14  ;;  %v4146_v44 = vadd.f32 %v4145_v18, %v1886_v9  ;;  %v3817_v18 = vrot.slane %v6427_v60, 2 }
 0x1fe   : > { %v1891_v50 = vld [vmem:[%s5820_s29 + $0x1020] sm:$0xff]  ;;  %v1892_v35 = vld [vmem:[%s5820_s29 + $0x1028] sm:$0xff]  ;;  %v1893_v20 = vld [vmem:[%s5820_s29 + $0x1030] sm:$0xff]  ;;  %v3889_v46 = vadd.f32 %v3888_v42, %v1888_v32  ;;  %v3932_v54 = vadd.f32 %v3931_v25, %v1889_v23  ;;  %v3975_v31 = vadd.f32 %v3974_v29, %v1890_v19  ;;  %v3561_v42 = vrot.slane %v6433_v61, 1 }
 0x1ff   : > { %v1894_v41 = vld [vmem:[%s5820_s29 + $0x1038] sm:$0xff]  ;;  %v1895_v15 = vld [vmem:[%s5820_s29 + $0x1040] sm:$0xff]  ;;  %v1896_v49 = vld [vmem:[%s5820_s29 + $0x1048] sm:$0xff]  ;;  %v4018_v47 = vadd.f32 %v4017_v22, %v1891_v50  ;;  %v4061_v56 = vadd.f32 %v4060_v21, %v1892_v35  ;;  %v4104_v3 = vadd.f32 %v4103_v5, %v1893_v20  ;;  %v6475_v21 = vadd.f32 %v3688_v28, %v6395_v10 }
 0x200   : > { %v1897_v58 = vld [vmem:[%s5820_s29 + $0x1050] sm:$0xff]  ;;  %v1898_v63 = vld [vmem:[%s5820_s29 + $0x1058] sm:$0xff]  ;;  %v1899_v13 = vld [vmem:[%s5820_s29 + $0x1060] sm:$0xff]  ;;  %v3847_v8 = vadd.f32 %v3846_v36, %v1895_v15  ;;  %v3890_v24 = vadd.f32 %v3889_v46, %v1896_v49  ;;  %v4147_v38 = vadd.f32 %v4146_v44, %v1894_v41  ;;  %v6481_v50 = vadd.f32 %v3731_v39, %v6401_v30 }
 0x201   : > { %v1900_v55 = vld [vmem:[%s5820_s29 + $0x1068] sm:$0xff]  ;;  %v1901_v0 = vld [vmem:[%s5820_s29 + $0x1070] sm:$0xff]  ;;  %v1902_v12 = vld [vmem:[%s5820_s29 + $0x1078] sm:$0xff]  ;;  %v3933_v26 = vadd.f32 %v3932_v54, %v1897_v58  ;;  %v3976_v7 = vadd.f32 %v3975_v31, %v1898_v63  ;;  %v4019_v4 = vadd.f32 %v4018_v47, %v1899_v13  ;;  %v6487_v31 = vadd.f32 %v3774_v52, %v6407_v40 }
 0x202   : > { %v1903_v17 = vld [vmem:[%s5820_s29 + $0x1080] sm:$0xff]  ;;  %v1904_v45 = vld [vmem:[%s5820_s29 + $0x1088] sm:$0xff]  ;;  %v1905_v59 = vld [vmem:[%s5820_s29 + $0x1090] sm:$0xff]  ;;  %v4062_v34 = vadd.f32 %v4061_v56, %v1900_v55  ;;  %v4105_v57 = vadd.f32 %v4104_v3, %v1901_v0  ;;  %v4148_v51 = vadd.f32 %v4147_v38, %v1902_v12  ;;  %v6493_v56 = vadd.f32 %v3518_v37, %v6413_v2 }
 0x203   : > { %v1906_v33 = vld [vmem:[%s5820_s29 + $0x1098] sm:$0xff]  ;;  %v1907_v48 = vld [vmem:[%s5820_s29 + $0x10a0] sm:$0xff]  ;;  %v1908_v62 = vld [vmem:[%s5820_s29 + $0x10a8] sm:$0xff]  ;;  %v3848_v25 = vadd.f32 %v3847_v8, %v1903_v17  ;;  %v3891_v14 = vadd.f32 %v3890_v24, %v1904_v45  ;;  %v3934_v9 = vadd.f32 %v3933_v26, %v1905_v59  ;;  %v3604_v8 = vrot.slane %v6455_v1, 1 }
 0x204   : > { %v1909_v16 = vld [vmem:[%s5820_s29 + $0x10b0] sm:$0xff]  ;;  %v1910_v29 = vld [vmem:[%s5820_s29 + $0x10b8] sm:$0xff]  ;;  %v1911_v22 = vld [vmem:[%s5820_s29 + $0x10c0] sm:$0xff]  ;;  %v3977_v32 = vadd.f32 %v3976_v7, %v1906_v33  ;;  %v4020_v23 = vadd.f32 %v4019_v4, %v1907_v48  ;;  %v4063_v19 = vadd.f32 %v4062_v34, %v1908_v62  ;;  %v3647_v12 = vrot.slane %v6461_v27, 1 }
 0x205   : > { %v1912_v36 = vld [vmem:[%s5820_s29 + $0x10c8] sm:$0xff]  ;;  %v1913_v5 = vld [vmem:[%s5820_s29 + $0x10d0] sm:$0xff]  ;;  %v1914_v44 = vld [vmem:[%s5820_s29 + $0x10d8] sm:$0xff]  ;;  %v3849_v35 = vadd.f32 %v3848_v25, %v1911_v22  ;;  %v4106_v20 = vadd.f32 %v4105_v57, %v1909_v16  ;;  %v4149_v46 = vadd.f32 %v4148_v51, %v1910_v29  ;;  %v6507_v34 = vadd.f32 %v3817_v18, %v6427_v60 }
 0x206   : > { %v1915_v54 = vld [vmem:[%s5820_s29 + $0x10e0] sm:$0xff]  ;;  %v1916_v10 = vld [vmem:[%s5820_s29 + $0x10e8] sm:$0xff]  ;;  %v1917_v28 = vld [vmem:[%s5820_s29 + $0x10f0] sm:$0xff]  ;;  %v3892_v41 = vadd.f32 %v3891_v14, %v1912_v36  ;;  %v3935_v15 = vadd.f32 %v3934_v9, %v1913_v5  ;;  %v3978_v49 = vadd.f32 %v3977_v32, %v1914_v44  ;;  %v6513_v14 = vadd.f32 %v3561_v42, %v6433_v61 }
 0x207   : > { %v1918_v47 = vld [vmem:[%s5820_s29 + $0x10f8] sm:$0xff]  ;;  %v1919_v30 = vld [vmem:[%s5820_s29 + $0x1100] sm:$0xff]  ;;  %v1920_v39 = vld [vmem:[%s5820_s29 + $0x1108] sm:$0xff]  ;;  %v4021_v3 = vadd.f32 %v4020_v23, %v1915_v54  ;;  %v4064_v58 = vadd.f32 %v4063_v19, %v1916_v10  ;;  %v4107_v63 = vadd.f32 %v4106_v20, %v1917_v28  ;;  %v3690_v32 = vrot.slane %v6475_v21, 1 }
 0x208   : > { %v1921_v13 = vld [vmem:[%s5820_s29 + $0x1110] sm:$0xff]  ;;  %v1922_v40 = vld [vmem:[%s5820_s29 + $0x1118] sm:$0xff]  ;;  %v1923_v52 = vld [vmem:[%s5820_s29 + $0x1120] sm:$0xff]  ;;  %v3850_v24 = vadd.f32 %v3849_v35, %v1919_v30  ;;  %v3893_v38 = vadd.f32 %v3892_v41, %v1920_v39  ;;  %v4150_v55 = vadd.f32 %v4149_v46, %v1918_v47  ;;  %v3733_v44 = vrot.slane %v6481_v50, 1 }
 0x209   : > { %v1924_v0 = vld [vmem:[%s5820_s29 + $0x1128] sm:$0xff]  ;;  %v1925_v2 = vld [vmem:[%s5820_s29 + $0x1130] sm:$0xff]  ;;  %v1926_v37 = vld [vmem:[%s5820_s29 + $0x1138] sm:$0xff]  ;;  %v3936_v26 = vadd.f32 %v3935_v15, %v1921_v13  ;;  %v3979_v7 = vadd.f32 %v3978_v49, %v1922_v40  ;;  %v4022_v4 = vadd.f32 %v4021_v3, %v1923_v52  ;;  %v3776_v41 = vrot.slane %v6487_v31, 1 }
 0x20a   : > { %v1927_v17 = vld [vmem:[%s5820_s29 + $0x1140] sm:$0xff]  ;;  %v1928_v45 = vld [vmem:[%s5820_s29 + $0x1148] sm:$0xff]  ;;  %v1929_v59 = vld [vmem:[%s5820_s29 + $0x1150] sm:$0xff]  ;;  %v4065_v57 = vadd.f32 %v4064_v58, %v1924_v0  ;;  %v4108_v51 = vadd.f32 %v4107_v63, %v1925_v2  ;;  %v4151_v33 = vadd.f32 %v4150_v55, %v1926_v37  ;;  %v6531_v58 = vadd.f32 %v3604_v8, %v6455_v1 }
 0x20b   : > { %v1930_v48 = vld [vmem:[%s5820_s29 + $0x1158] sm:$0xff]  ;;  %v1931_v62 = vld [vmem:[%s5820_s29 + $0x1160] sm:$0xff]  ;;  %v1932_v25 = vld [vmem:[%s5820_s29 + $0x1168] sm:$0xff]  ;;  %v3851_v9 = vadd.f32 %v3850_v24, %v1927_v17  ;;  %v3894_v16 = vadd.f32 %v3893_v38, %v1928_v45  ;;  %v3937_v29 = vadd.f32 %v3936_v26, %v1929_v59  ;;  %v6537_v55 = vadd.f32 %v3647_v12, %v6461_v27 }
 0x20c   : > { %v1933_v22 = vld [vmem:[%s5820_s29 + $0x1170] sm:$0xff]  ;;  %v1934_v60 = vld [vmem:[%s5820_s29 + $0x1178] sm:$0xff]  ;;  %v1935_v18 = vld [vmem:[%s5820_s29 + $0x1180] sm:$0xff]  ;;  %v3980_v23 = vadd.f32 %v3979_v7, %v1930_v48  ;;  %v4023_v19 = vadd.f32 %v4022_v4, %v1931_v62  ;;  %v4066_v36 = vadd.f32 %v4065_v57, %v1932_v25  ;;  %v3819_v7 = vrot.slane %v6507_v34, 1 }
 0x20d   : > { %v1936_v5 = vld [vmem:[%s5820_s29 + $0x1188] sm:$0xff]  ;;  %v1937_v61 = vld [vmem:[%s5820_s29 + $0x1190] sm:$0xff]  ;;  %v1938_v42 = vld [vmem:[%s5820_s29 + $0x1198] sm:$0xff]  ;;  %v3852_v35 = vadd.f32 %v3851_v9, %v1935_v18  ;;  %v4109_v20 = vadd.f32 %v4108_v51, %v1933_v22  ;;  %v4152_v46 = vadd.f32 %v4151_v33, %v1934_v60  ;;  %v6547_v57 = vadd.f32 %v3690_v32, %v6475_v21 }
 0x20e   : > { %v1939_v54 = vld [vmem:[%s5820_s29 + $0x11a0] sm:$0xff]  ;;  %v1940_v10 = vld [vmem:[%s5820_s29 + $0x11a8] sm:$0xff]  ;;  %v1941_v28 = vld [vmem:[%s5820_s29 + $0x11b0] sm:$0xff]  ;;  %v3895_v15 = vadd.f32 %v3894_v16, %v1936_v5  ;;  %v3938_v49 = vadd.f32 %v3937_v29, %v1937_v61  ;;  %v3981_v47 = vadd.f32 %v3980_v23, %v1938_v42  ;;  %v6553_v16 = vadd.f32 %v3733_v44, %v6481_v50 }
 0x20f   : > { %v1942_v30 = vld [vmem:[%s5820_s29 + $0x11b8] sm:$0xff]  ;;  %v1943_v39 = vld [vmem:[%s5820_s29 + $0x11c0] sm:$0xff]  ;;  %v1944_v3 = vld [vmem:[%s5820_s29 + $0x11c8] sm:$0xff]  ;;  %v4024_v63 = vadd.f32 %v4023_v19, %v1939_v54  ;;  %v4067_v13 = vadd.f32 %v4066_v36, %v1940_v10  ;;  %v4110_v40 = vadd.f32 %v4109_v20, %v1941_v28  ;;  %v6559_v23 = vadd.f32 %v3776_v41, %v6487_v31 }
 0x210   : > { %v1945_v52 = vld [vmem:[%s5820_s29 + $0x11d0] sm:$0xff]  ;;  %v1946_v24 = vld [vmem:[%s5820_s29 + $0x11d8] sm:$0xff]  ;;  %v1947_v38 = vld [vmem:[%s5820_s29 + $0x11e0] sm:$0xff]  ;;  %v3853_v0 = vadd.f32 %v3852_v35, %v1943_v39  ;;  %v3896_v2 = vadd.f32 %v3895_v15, %v1944_v3  ;;  %v4153_v37 = vadd.f32 %v4152_v46, %v1942_v30  ;;  %v6565_v44 = vadd.f32 %v3819_v7, %v6507_v34 }
 0x211   : > { %v1948_v26 = vld [vmem:[%s5820_s29 + $0x11e8] sm:$0xff]  ;;  %v1949_v1 = vld [vmem:[%s5820_s29 + $0x11f0] sm:$0xff]  ;;  %v1950_v8 = vld [vmem:[%s5820_s29 + $0x11f8] sm:$0xff]  ;;  %v3939_v4 = vadd.f32 %v3938_v49, %v1945_v52  ;;  %v3982_v17 = vadd.f32 %v3981_v47, %v1946_v24  ;;  %v4025_v45 = vadd.f32 %v4024_v63, %v1947_v38  ;;  %v6576_v63 = vsub.s32 %v4185_v11, %v6096_v53 }
 0x212   : > { %v1951_v59 = vld [vmem:[%s5820_s29 + $0x1200] sm:$0xff]  ;;  %v1952_v27 = vld [vmem:[%s5820_s29 + $0x1208] sm:$0xff]  ;;  %v1953_v12 = vld [vmem:[%s5820_s29 + $0x1210] sm:$0xff]  ;;  %v4068_v51 = vadd.f32 %v4067_v13, %v1948_v26  ;;  %v4111_v33 = vadd.f32 %v4110_v40, %v1949_v1  ;;  %v4154_v48 = vadd.f32 %v4153_v37, %v1950_v8  ;;  %v4198_v1 = vcombine.low %v6547_v57, %v6553_v16 }
 0x213   : > { %v1954_v62 = vld [vmem:[%s5820_s29 + $0x1218] sm:$0xff]  ;;  %v1955_v25 = vld [vmem:[%s5820_s29 + $0x1220] sm:$0xff]  ;;  %v1956_v9 = vld [vmem:[%s5820_s29 + $0x1228] sm:$0xff]  ;;  %v3854_v29 = vadd.f32 %v3853_v0, %v1951_v59  ;;  %v3897_v22 = vadd.f32 %v3896_v2, %v1952_v27  ;;  %v3940_v60 = vadd.f32 %v3939_v4, %v1953_v12  ;;  %v4181_v0 = vcombine.low %v6493_v56, %v6513_v14 }
 0x214   : > { %v1957_v18 = vld [vmem:[%s5820_s29 + $0x1230] sm:$0xff]  ;;  %v1958_v21 = vld [vmem:[%s5820_s29 + $0x1238] sm:$0xff]  ;;  %v1959_v32 = vld [vmem:[%s5820_s29 + $0x1240] sm:$0xff]  ;;  %v3983_v19 = vadd.f32 %v3982_v17, %v1954_v62  ;;  %v4026_v36 = vadd.f32 %v4025_v45, %v1955_v25  ;;  %v4069_v5 = vadd.f32 %v4068_v51, %v1956_v9  ;;  %v4182_v2 = vcombine.low %v6531_v58, %v6537_v55 }
 0x215   : > { %v1960_v50 = vld [vmem:[%s5820_s29 + $0x1248] sm:$0xff]  ;;  %v1961_v61 = vld [vmem:[%s5820_s29 + $0x1250] sm:$0xff]  ;;  %v1962_v42 = vld [vmem:[%s5820_s29 + $0x1258] sm:$0xff]  ;;  %v3855_v35 = vadd.f32 %v3854_v29, %v1959_v32  ;;  %v4112_v20 = vadd.f32 %v4111_v33, %v1957_v18  ;;  %v4155_v46 = vadd.f32 %v4154_v48, %v1958_v21  ;;  %v4199_v8 = vcombine.low %v6559_v23, %v6565_v44 }
 0x216   : > { %v1963_v31 = vld [vmem:[%s5820_s29 + $0x1260] sm:$0xff]  ;;  %v1964_v54 = vld [vmem:[%s5820_s29 + $0x1268] sm:$0xff]  ;;  %v1965_v10 = vld [vmem:[%s5820_s29 + $0x1270] sm:$0xff]  ;;  %v3898_v28 = vadd.f32 %v3897_v22, %v1960_v50  ;;  %v3941_v41 = vadd.f32 %v3940_v60, %v1961_v61  ;;  %v3984_v15 = vadd.f32 %v3983_v19, %v1962_v42 }
 0x217   : > { %v1966_v49 = vld [vmem:[%s5820_s29 + $0x1278] sm:$0xff]  ;;  %v1967_v47 = vld [vmem:[%s5820_s29 + $0x1280] sm:$0xff]  ;;  %v1968_v30 = vld [vmem:[%s5820_s29 + $0x1288] sm:$0xff]  ;;  %v4027_v34 = vadd.f32 %v4026_v36, %v1963_v31  ;;  %v4070_v39 = vadd.f32 %v4069_v5, %v1964_v54  ;;  %v4113_v3 = vadd.f32 %v4112_v20, %v1965_v10 }
 0x218   : > { %v1969_v13 = vld [vmem:[%s5820_s29 + $0x1290] sm:$0xff]  ;;  %v1970_v40 = vld [vmem:[%s5820_s29 + $0x1298] sm:$0xff]  ;;  %v1971_v52 = vld [vmem:[%s5820_s29 + $0x12a0] sm:$0xff]  ;;  %v3856_v24 = vadd.f32 %v3855_v35, %v1967_v47  ;;  %v4156_v38 = vadd.f32 %v4155_v46, %v1966_v49  ;;  %v3899_v11 = vadd.f32 %v3898_v28, %v1968_v30 }
 0x219   : > { %v1972_v37 = vld [vmem:[%s5820_s29 + $0x12a8] sm:$0xff]  ;;  %v1973_v43 = vld [vmem:[%s5820_s29 + $0x12b0] sm:$0xff]  ;;  %v1974_v53 = vld [vmem:[%s5820_s29 + $0x12b8] sm:$0xff]  ;;  %v3942_v26 = vadd.f32 %v3941_v41, %v1969_v13  ;;  %v3985_v45 = vadd.f32 %v3984_v15, %v1970_v40  ;;  %v4028_v59 = vadd.f32 %v4027_v34, %v1971_v52 }
 0x21a   : > { %v1975_v7 = vld [vmem:[%s5820_s29 + $0x12c0] sm:$0xff]  ;;  %v1976_v4 = vld [vmem:[%s5820_s29 + $0x12c8] sm:$0xff]  ;;  %v1977_v17 = vld [vmem:[%s5820_s29 + $0x12d0] sm:$0xff]  ;;  %v4071_v27 = vadd.f32 %v4070_v39, %v1972_v37  ;;  %v4114_v12 = vadd.f32 %v4113_v3, %v1973_v43  ;;  %v4157_v29 = vadd.f32 %v4156_v38, %v1974_v53 }
 0x21b   : > { %v1978_v51 = vld [vmem:[%s5820_s29 + $0x12d8] sm:$0xff]  ;;  %v1979_v33 = vld [vmem:[%s5820_s29 + $0x12e0] sm:$0xff]  ;;  %v1980_v48 = vld [vmem:[%s5820_s29 + $0x12e8] sm:$0xff]  ;;  %v3469_v62 = vsel %vm2868_vm0, %v1975_v7, 0.0  ;;  %v3470_v25 = vsel %vm2868_vm0, %v1976_v4, 0.0  ;;  %v3471_v9 = vsel %vm2868_vm0, %v1977_v17, 0.0 }
 0x21c   : > { %v1981_v22 = vld [vmem:[%s5820_s29 + $0x12f0] sm:$0xff]  ;;  %v1982_v60 = vld [vmem:[%s5820_s29 + $0x12f8] sm:$0xff]  ;;  %v3472_v18 = vsel %vm2868_vm0, %v1978_v51, 0.0  ;;  %v3473_v21 = vsel %vm2868_vm0, %v1979_v33, 0.0  ;;  %v3474_v32 = vsel %vm2868_vm0, %v1980_v48, 0.0  ;;  %v3857_v19 = vadd.f32 %v3856_v24, %v3469_v62 }
 0x21d   : > { %v3475_v36 = vsel %vm2868_vm0, %v1981_v22, 0.0  ;;  %v3476_v5 = vsel %vm2868_vm0, %v1982_v60, 0.0  ;;  %v3900_v50 = vadd.f32 %v3899_v11, %v3470_v25  ;;  %v3943_v61 = vadd.f32 %v3942_v26, %v3471_v9 }
 0x21e   : > { %v3858_v42 = vrot.slane %v3857_v19, 4  ;;  %v3986_v35 = vadd.f32 %v3985_v45, %v3472_v18  ;;  %v4029_v20 = vadd.f32 %v4028_v59, %v3473_v21  ;;  %v4072_v46 = vadd.f32 %v4071_v27, %v3474_v32 }
 0x21f   : > { %v3901_v31 = vrot.slane %v3900_v50, 4  ;;  %v3944_v54 = vrot.slane %v3943_v61, 4  ;;  %v4115_v10 = vadd.f32 %v4114_v12, %v3475_v36  ;;  %v4158_v28 = vadd.f32 %v4157_v29, %v3476_v5 }
 0x220   : > { %v3859_v41 = vadd.f32 %v3858_v42, %v3857_v19  ;;  %v3987_v15 = vrot.slane %v3986_v35, 4  ;;  %v4030_v49 = vrot.slane %v4029_v20, 4  ;;  %v4073_v47 = vrot.slane %v4072_v46, 4 }
 0x221   : > { %v3902_v30 = vadd.f32 %v3901_v31, %v3900_v50  ;;  %v3945_v34 = vadd.f32 %v3944_v54, %v3943_v61  ;;  %v4116_v39 = vrot.slane %v4115_v10, 4  ;;  %v4159_v3 = vrot.slane %v4158_v28, 4 }
 0x222   : > { %v3860_v6 = vrot.slane %v3859_v41, 2  ;;  %v3988_v13 = vadd.f32 %v3987_v15, %v3986_v35  ;;  %v4031_v40 = vadd.f32 %v4030_v49, %v4029_v20  ;;  %v4074_v52 = vadd.f32 %v4073_v47, %v4072_v46 }
 0x223   : > { %v3903_v24 = vrot.slane %v3902_v30, 2  ;;  %v3946_v38 = vrot.slane %v3945_v34, 2  ;;  %v4117_v37 = vadd.f32 %v4116_v39, %v4115_v10  ;;  %v4160_v43 = vadd.f32 %v4159_v3, %v4158_v28 }
 0x224   : > { %v3861_v53 = vadd.f32 %v3860_v6, %v3859_v41  ;;  %v3989_v11 = vrot.slane %v3988_v13, 2  ;;  %v4032_v26 = vrot.slane %v4031_v40, 2  ;;  %v4075_v7 = vrot.slane %v4074_v52, 2 }
 0x225   : > { %v3904_v4 = vadd.f32 %v3903_v24, %v3902_v30  ;;  %v3947_v17 = vadd.f32 %v3946_v38, %v3945_v34  ;;  %v4118_v45 = vrot.slane %v4117_v37, 2  ;;  %v4161_v59 = vrot.slane %v4160_v43, 2 }
 0x226   : > { %v3862_v27 = vrot.slane %v3861_v53, 1  ;;  %v3990_v12 = vadd.f32 %v3989_v11, %v3988_v13  ;;  %v4033_v51 = vadd.f32 %v4032_v26, %v4031_v40  ;;  %v4076_v33 = vadd.f32 %v4075_v7, %v4074_v52 }
 0x227   : > { %v3905_v48 = vrot.slane %v3904_v4, 1  ;;  %v3948_v62 = vrot.slane %v3947_v17, 1  ;;  %v4119_v25 = vadd.f32 %v4118_v45, %v4117_v37  ;;  %v4162_v9 = vadd.f32 %v4161_v59, %v4160_v43 }
 0x228   : > { %v3863_v29 = vadd.f32 %v3862_v27, %v3861_v53  ;;  %v3991_v22 = vrot.slane %v3990_v12, 1  ;;  %v4034_v60 = vrot.slane %v4033_v51, 1  ;;  %v4077_v18 = vrot.slane %v4076_v33, 1 }
 0x229   : > { %v3906_v21 = vadd.f32 %v3905_v48, %v3904_v4  ;;  %v3949_v32 = vadd.f32 %v3948_v62, %v3947_v17  ;;  %v4120_v19 = vrot.slane %v4119_v25, 1  ;;  %v4163_v36 = vrot.slane %v4162_v9, 1 }
 0x22a   : > { %v3992_v5 = vadd.f32 %v3991_v22, %v3990_v12  ;;  %v4035_v50 = vadd.f32 %v4034_v60, %v4033_v51  ;;  %v4078_v61 = vadd.f32 %v4077_v18, %v4076_v33  ;;  %v4189_v46 = vrot.slane %v4181_v0, %v6576_v63 }
 0x22b   : > { %v4121_v42 = vadd.f32 %v4120_v19, %v4119_v25  ;;  %v4164_v35 = vadd.f32 %v4163_v36, %v4162_v9  ;;  %v4215_v20 = vcombine.low %v3863_v29, %v3906_v21  ;;  %v4196_v31 = vrot.slane %v4182_v2, %v6576_v63 }
 0x22c   : > { %v4216_v54 = vcombine.low %v3949_v32, %v3992_v5  ;;  %v4232_v10 = vcombine.low %v4035_v50, %v4078_v61  ;;  %v4206_v28 = vrot.slane %v4198_v1, %v6576_v63  ;;  %v4213_v41 = vrot.slane %v4199_v8, %v6576_v63 }
 0x22d   : > { %v4223_v56 = vrot.slane %v4215_v20, %v6576_v63  ;;  %v4233_v14 = vcombine.low %v4121_v42, %v4164_v35  ;;  %v4197_v2 = vcombine.low %v4189_v46, %v4196_v31 }
 0x22e   : > { %v4230_v0 = vrot.slane %v4216_v54, %v6576_v63  ;;  %v4240_v58 = vrot.slane %v4232_v10, %v6576_v63  ;;  %v4214_v57 = vcombine.low %v4206_v28, %v4213_v41 }
 0x22f   : > { %v4247_v55 = vrot.slane %v4233_v14, %v6576_v63 }
 0x230   : > { %v4231_v15 = vcombine.low %v4223_v56, %v4230_v0 }
 0x231   : > { %v4248_v16 = vcombine.low %v4240_v58, %v4247_v55 }
 0x232   : > { %v4253_v1 = vrot.slane %v4231_v15, 7 }
 0x233   : > { %v4264_v23 = vrot.slane %v4248_v16, 7 }
 0x234   : > { %v4255_v44 = vsel %vm4254_vm1, %v4253_v1, %v4197_v2 }
 0x235   : > { %v4257_v8 = vsel %vm4256_vm2, %v4253_v1, %v4255_v44  ;;  %v4265_v49 = vsel %vm4254_vm1, %v4264_v23, %v4214_v57 }
 0x236   : > { %v4259_v47 = vsel %vm4258_vm3, %v4253_v1, %v4257_v8  ;;  %v4266_v30 = vsel %vm4256_vm2, %v4264_v23, %v4265_v49 }
 0x237   : > { %v4261_v63 = vsel %vm4260_vm4, %v4253_v1, %v4259_v47  ;;  %v4267_v34 = vsel %vm4258_vm3, %v4264_v23, %v4266_v30 }
 0x238   : > { %v4268_v39 = vsel %vm4260_vm4, %v4264_v23, %v4267_v34  ;;  %4273 = vst [vmem:[%s1365_s3] sm:$0xff] %v4261_v63 }
 0x239   : > { %4274 = vst [vmem:[%s1365_s3 + $0x8] sm:$0xff] %v4268_v39 }
 0x23a   : > { %4453 = shalt.err (!%p4450_p7)
}
 0x23b   : > { %s4454_s22 = scalar_lea.hbm %s6641_s13, 256  ;;  %s4458_s25 = scalar_lea.hbm %s6691_s1, 512 }
 0x23c   : > { %p4455_p8 = scmp.ne.s32.totalorder %s6641_s13, %s4454_s22  ;;  %p4459_p13 = scmp.lt.u32.totalorder %s6641_s13, %s6691_s1 }
 0x23d   : > { %p4460_p0 = scmp.lt.u32.totalorder %s4458_s25, %s4454_s22  ;;  %p4462_p2 = scmp.lt.u32.totalorder %s4454_s22, %s6641_s13 }
 0x23e   : > { %p4456_p11 = pnand %p4455_p8, %p4571_p5 }
 0x23f   : > { %p4461_p1 = por %p4460_p0, %p4459_p13 }
 0x240   : > { %p4457_p12 = pneg %p4456_p11 }
 0x241   : > { %p4463_p3 = por %p4462_p2, %p4461_p1 }
 0x243   : > { %p4464_p4 = pnand %p4463_p3, %p4457_p12 }
 0x245   : > { %4467 = shalt.err (!%p4464_p4)
}
 0x246   : > { %4383 = dma.vmem_to_hbm [thread:$0]  (%p4571_p5), %s6643_s4, 256, %s6641_s13, %s4276_s9  }
 0x247 PF: > { %s4302_s28 = sand.u32 1, %s4498_s6   ;;  %p4386_p6 = pnand %p4369_p10, %p4582_p9 }
 0x248   : > { %s4303_s29 = scalar_lea.sflag [#allocation4], %s4302_s28 }
 0x249   : > { %4493 = dma.done.wait (!%p4386_p6), %s4303_s29, 256  }
 0x24a   : > { %4495 = vsyncadd (!%p4386_p6), %s4303_s29, 4294967040  ;;  %s14_s11 = sadd.s32 1, %s4518_s11   ;;  %s6694_s6 = smov %s4502_s7 }
 0x24b   : > { %p11_p7 = scmp.ge.s32.totalorder %s14_s11, 4   ;;  %s6695_s7 = smov %s4506_s8 }
 0x24c   : > { %s6696_s8 = smov %s4580_s18  ;;  %s6697_s9 = smov %s4514_s10 }
 0x24d   : > { %s6698_s10 = smov %s6700_s14  ;;  %13 = sbr.rel (!%p11_p7) target bundleno = 4 (0x4), region = 99 }
 0x254   :  { %4308 = vsyncpa [#allocation4], 1 }
 0x255   :  { %4310 = vsyncpa [#allocation4 + $0x1], 1 }

</bundles_post_ra>
